<compile_context>
chip_gen: v7x
topology: tpu7x:2x2x1
jax: 0.10.0
libtpu: 0.0.40
codegen_flags: <defaults>
</compile_context>

<pallas_src>
import functools

import jax
import jax.numpy as jnp
from jax.experimental import pallas as pl
from jax.experimental.pallas import tpu as pltpu


# ------------------------------- fused kernel ------------------------------- #

def _lenet3d_fused_kernel(lab_ref,                       # SMEM scalars (B,) int32
                          p1_ref, w1b_ref, w2m_ref,      # conv stages (bf16)
                          wp_ref, b1_ref,                # fc1 (bf16 weight, f32 bias)
                          w2fc_ref, b2_ref,              # fc2 (f32)
                          loss_ref,                      # (1,1) f32 output
                          *, batch, n_spatial, conv2_c, hidden, n_classes):
    # ---- conv1 + ReLU.  Block-diagonal weight (kron(I8, W1)) makes the output of this
    #      single lane-dense matmul exactly the conv2 im2col patch matrix.
    p2 = jnp.dot(p1_ref[...], w1b_ref[...], preferred_element_type=jnp.float32)
    p2 = jnp.maximum(p2, 0.0)                                  # (S*B, 256) f32

    # ---- conv2 + ReLU.
    y2 = jnp.dot(p2.astype(jnp.bfloat16), w2m_ref[...],
                 preferred_element_type=jnp.float32)
    y2 = jnp.maximum(y2, 0.0)                                  # (S*B, 64), rows = (s, b)

    # ---- flatten + fc1.  The torch flatten mixes the spatial and channel axes, which
    #      would need an in-kernel relayout; instead fc1_w rows were pre-permuted to
    #      (spatial, channel) order and the 4096-long contraction is decomposed into
    #      n_spatial small MXU matmuls over aligned weight slices (accumulated in f32).
    z1 = jnp.zeros((batch, hidden), jnp.float32)
    for s in range(n_spatial):                                 # static unroll
        lhs = y2[s * batch:(s + 1) * batch, :].astype(jnp.bfloat16)     # (B, 64)
        rhs = wp_ref[pl.ds(s * conv2_c, conv2_c), :]                    # (64, 128) bf16
        z1 = z1 + jnp.dot(lhs, rhs, preferred_element_type=jnp.float32)
    z1 = z1 + b1_ref[...]                                      # (B, 128)
    a1 = jnp.where(z1 >= 0.0, z1, 0.01 * z1)                   # LeakyReLU (slope 0.01)

    # ---- fc2 (kept f32: tiny, protects logit precision on all generations).
    logits = jnp.dot(a1, w2fc_ref[...], preferred_element_type=jnp.float32) + b2_ref[...]

    # ---- CrossEntropy (mean).  Labels come from SMEM scalars (no VMEM tile).
    m = jnp.max(logits, axis=-1, keepdims=True)                            # (B, 1)
    lse = m + jnp.log(jnp.sum(jnp.exp(logits - m), axis=-1, keepdims=True))
    rows = jax.lax.broadcasted_iota(jnp.int32, (batch, n_classes), 0)
    cols = jax.lax.broadcasted_iota(jnp.int32, (batch, n_classes), 1)
    lab_mat = jnp.zeros((batch, n_classes), jnp.int32)
    for b in range(batch):                                     # B is tiny (2)
        lab_mat = jnp.where(rows == b, lab_ref[b], lab_mat)
    picked = jnp.sum(jnp.where(cols == lab_mat, logits, 0.0), axis=-1, keepdims=True)
    per_sample = lse - picked                                  # (B, 1)
    loss_ref[...] = jnp.sum(per_sample, axis=0, keepdims=True) * (1.0 / batch)


# ------------------------------ host-side prep ------------------------------ #

def prepare_params(raw):
    """One-time transform of PyTorch-layout params into the fused-kernel layout."""
    w1 = raw["conv1_w"]                              # (32, 3, 2, 2, 2)
    w2 = raw["conv2_w"]                              # (64, 32, 2, 2, 2)
    fc1_w = raw["fc1_w"]                             # (4096, 128) == torch weight.T

    # conv1 as matmul: rows k=(c0,kd,kh,kw), cols c1; then block-diag over the 8
    # intra-(conv2)-block offsets so conv1's output is already the conv2 patch matrix.
    w1m = w1.reshape(32, 3 * 8).T                                    # (24, 32)
    w1_block = jnp.kron(jnp.eye(8, dtype=w1m.dtype), w1m)            # (192, 256)

    # conv2 as matmul: rows = (e_d, e_h, e_w, c1), cols = c2.
    w2m = w2.transpose(2, 3, 4, 1, 0).reshape(8 * 32, 64)            # (256, 64)

    # fc1 rows permuted from torch's (c2, s) flatten order to the kernel's (s, c2).
    wp = fc1_w.reshape(64, 64, 128).transpose(1, 0, 2).reshape(64 * 64, 128)

    return {
        "w1_block": w1_block.astype(jnp.bfloat16),
        "w2m": w2m.astype(jnp.bfloat16),
        "fc1_w": wp.astype(jnp.bfloat16),
        "fc1_b": raw["fc1_b"].reshape(1, 128).astype(jnp.float32),
        "fc2_w": raw["fc2_w"].astype(jnp.float32),                   # (128, 10)
        "fc2_b": raw["fc2_b"].reshape(1, 10).astype(jnp.float32),
    }


def _im2col_fused(x):
    # x: (B, C, D, H, W) with k=stride=2 convs applied twice (D,H,W divisible by 4).
    # Output rows ordered (D2, H2, W2, b)  [conv2 output position major, batch minor],
    # cols ordered (e_d, e_h, e_w, c0, kd, kh, kw)  -> shape (S*B, 8*C*8).
    B, C, D, H, W = x.shape
    x = x.reshape(B, C, D // 4, 2, 2, H // 4, 2, 2, W // 4, 2, 2)
    # dims: (b, c0, D2, e_d, kd, H2, e_h, kh, W2, e_w, kw)
    x = x.transpose(2, 5, 8, 0, 3, 6, 9, 1, 4, 7, 10)
    S = (D // 4) * (H // 4) * (W // 4)
    return x.reshape(S * B, 8 * C * 8)


# ------------------------------- pallas wrapper ------------------------------ #

def _fused_call(patches, labels, p):
    SB, K1 = patches.shape                        # (128, 192)
    B = labels.shape[0]
    S = SB // B                                   # 64 conv2 output positions
    P2C = p["w1_block"].shape[1]                  # 256
    C2 = p["w2m"].shape[1]                        # 64
    H1 = p["fc1_w"].shape[1]                      # 128
    NCLS = p["fc2_w"].shape[1]                    # 10

    kernel = functools.partial(_lenet3d_fused_kernel, batch=B, n_spatial=S,
                               conv2_c=C2, hidden=H1, n_classes=NCLS)

    cost = pl.CostEstimate(
        flops=2 * (SB * K1 * P2C + SB * P2C * C2 + B * S * C2 * H1 + B * H1 * NCLS),
        transcendentals=B * (NCLS + 1),
        bytes_accessed=(patches.size * 2 + p["w1_block"].size * 2 + p["w2m"].size * 2
                        + p["fc1_w"].size * 2 + p["fc1_b"].size * 4
                        + p["fc2_w"].size * 4 + p["fc2_b"].size * 4
                        + labels.size * 4 + 4),
    )

    grid_spec = pltpu.PrefetchScalarGridSpec(
        num_scalar_prefetch=1,                    # labels -> SMEM scalars
        grid=(1,),
        in_specs=[
            pl.BlockSpec((SB, K1), lambda i, lab: (0, 0)),       # patches  (bf16)
            pl.BlockSpec((K1, P2C), lambda i, lab: (0, 0)),      # w1_block (bf16)
            pl.BlockSpec((P2C, C2), lambda i, lab: (0, 0)),      # w2m      (bf16)
            pl.BlockSpec((S * C2, H1), lambda i, lab: (0, 0)),   # fc1_w    (bf16)
            pl.BlockSpec((1, H1), lambda i, lab: (0, 0)),        # fc1_b    (f32)
            pl.BlockSpec((H1, NCLS), lambda i, lab: (0, 0)),     # fc2_w    (f32)
            pl.BlockSpec((1, NCLS), lambda i, lab: (0, 0)),      # fc2_b    (f32)
        ],
        out_specs=pl.BlockSpec((1, 1), lambda i, lab: (0, 0)),
    )

    loss = pl.pallas_call(
        kernel,
        out_shape=jax.ShapeDtypeStruct((1, 1), jnp.float32),
        grid_spec=grid_spec,
        compiler_params=pltpu.CompilerParams(dimension_semantics=("arbitrary",)),
        cost_estimate=cost,
    )(labels, patches, p["w1_block"], p["w2m"], p["fc1_w"],
      p["fc1_b"], p["fc2_w"], p["fc2_b"])
    return loss[0, 0]


def lenet3d_forward(x, labels, params):
    # x: (B, 3, 16, 16, 16) f32, labels: (B,) int, params from prepare_params().
    patches = _im2col_fused(x).astype(jnp.bfloat16)   # single cheap XLA transform of x
    return _fused_call(patches, labels.astype(jnp.int32), params)


# ------------------------------------ main ----------------------------------- #

if __name__ == "__main__":
    key = jax.random.PRNGKey(0)
    k_x, k_lab, k_c1, k_c2, k_w1, k_b1, k_w2, k_b2 = jax.random.split(key, 8)

    B = 2
    x = jax.random.normal(k_x, (B, 3, 16, 16, 16), dtype=jnp.float32)
    labels = jax.random.randint(k_lab, (B,), 0, 10, dtype=jnp.int32)

    # Deterministic synthetic parameters in the PyTorch module's native layout.
    raw_params = {
        "conv1_w": 0.1 * jax.random.normal(k_c1, (32, 3, 2, 2, 2), dtype=jnp.float32),
        "conv2_w": 0.1 * jax.random.normal(k_c2, (64, 32, 2, 2, 2), dtype=jnp.float32),
        # stored as (in_features, out_features) == torch Linear weight.T
        "fc1_w": 0.02 * jax.random.normal(k_w1, (4 ** 3 * 64, 128), dtype=jnp.float32),
        "fc1_b": 0.02 * jax.random.normal(k_b1, (128,), dtype=jnp.float32),
        "fc2_w": 0.05 * jax.random.normal(k_w2, (128, 10), dtype=jnp.float32),
        "fc2_b": 0.05 * jax.random.normal(k_b2, (10,), dtype=jnp.float32),
    }
    params = prepare_params(raw_params)       # one-time layout transform (not per call)

    loss = jax.jit(lenet3d_forward)(x, labels, params)
    jax.block_until_ready(loss)
    assert loss.shape == () and loss.dtype == jnp.float32
    assert bool(jnp.isfinite(loss))
    print("KERNEL_OK")
</pallas_src>

<mosaic_0001>
module attributes {stable_mosaic.version = 11 : i64} {
  func.func @_lenet3d_fused_kernel(%arg0: i32, %arg1: memref<2xi32, #tpu.memory_space<smem>>, %arg2: memref<128x192xbf16, #tpu.memory_space<vmem>>, %arg3: memref<192x256xbf16, #tpu.memory_space<vmem>>, %arg4: memref<256x64xbf16, #tpu.memory_space<vmem>>, %arg5: memref<4096x128xbf16, #tpu.memory_space<vmem>>, %arg6: memref<1x128xf32, #tpu.memory_space<vmem>>, %arg7: memref<128x10xf32, #tpu.memory_space<vmem>>, %arg8: memref<1x10xf32, #tpu.memory_space<vmem>>, %arg9: memref<1x1xf32, #tpu.memory_space<vmem>>) attributes {dimension_semantics = [#tpu.dimension_semantics<arbitrary>], iteration_bounds = array<i64: 1>, scalar_prefetch = 1 : i64, scratch_operands = 0 : i64, tpu.core_type = #tpu.core_type<tc>, window_params = [{pipeline_mode = #tpu.pipeline_mode<synchronous>, transform_indices = @transform_0, window_bounds = array<i64: 128, 192>}, {pipeline_mode = #tpu.pipeline_mode<synchronous>, transform_indices = @transform_1, window_bounds = array<i64: 192, 256>}, {pipeline_mode = #tpu.pipeline_mode<synchronous>, transform_indices = @transform_2, window_bounds = array<i64: 256, 64>}, {pipeline_mode = #tpu.pipeline_mode<synchronous>, transform_indices = @transform_3, window_bounds = array<i64: 4096, 128>}, {pipeline_mode = #tpu.pipeline_mode<synchronous>, transform_indices = @transform_4, window_bounds = array<i64: 1, 128>}, {pipeline_mode = #tpu.pipeline_mode<synchronous>, transform_indices = @transform_5, window_bounds = array<i64: 128, 10>}, {pipeline_mode = #tpu.pipeline_mode<synchronous>, transform_indices = @transform_6, window_bounds = array<i64: 1, 10>}, {pipeline_mode = #tpu.pipeline_mode<synchronous>, transform_indices = @transform_7, window_bounds = array<i64: 1, 1>}]} {
    %c0 = arith.constant 0 : index
    %c0_0 = arith.constant 0 : index
    %0 = vector.load %arg2[%c0, %c0_0] : memref<128x192xbf16, #tpu.memory_space<vmem>>, vector<128x192xbf16>
    %c0_1 = arith.constant 0 : index
    %c0_2 = arith.constant 0 : index
    %1 = vector.load %arg3[%c0_1, %c0_2] : memref<192x256xbf16, #tpu.memory_space<vmem>>, vector<192x256xbf16>
    %cst = arith.constant dense<0.000000e+00> : vector<128x256xf32>
    %2 = tpu.matmul %0, %1, %cst {dimension_numbers = #tpu.dot_dimension_numbers<[1], [0], [0], [1], [0, 0, 1, 1], [], []>} : vector<128x192xbf16>, vector<192x256xbf16>, vector<128x256xf32> -> vector<128x256xf32>
    %cst_3 = arith.constant 0.000000e+00 : f32
    %3 = vector.broadcast %cst_3 : f32 to vector<128x256xf32>
    %4 = arith.maximumf %2, %3 : vector<128x256xf32>
    %5 = arith.truncf %4 : vector<128x256xf32> to vector<128x256xbf16>
    %c0_4 = arith.constant 0 : index
    %c0_5 = arith.constant 0 : index
    %6 = vector.load %arg4[%c0_4, %c0_5] : memref<256x64xbf16, #tpu.memory_space<vmem>>, vector<256x64xbf16>
    %cst_6 = arith.constant dense<0.000000e+00> : vector<128x64xf32>
    %7 = tpu.matmul %5, %6, %cst_6 {dimension_numbers = #tpu.dot_dimension_numbers<[1], [0], [0], [1], [0, 0, 1, 1], [], []>} : vector<128x256xbf16>, vector<256x64xbf16>, vector<128x64xf32> -> vector<128x64xf32>
    %cst_7 = arith.constant 0.000000e+00 : f32
    %8 = vector.broadcast %cst_7 : f32 to vector<128x64xf32>
    %9 = arith.maximumf %7, %8 : vector<128x64xf32>
    %cst_8 = arith.constant 0.000000e+00 : f32
    %10 = vector.broadcast %cst_8 : f32 to vector<2x128xf32>
    %11 = vector.extract_strided_slice %9 {offsets = [0, 0], sizes = [2, 64], strides = [1, 1]} : vector<128x64xf32> to vector<2x64xf32>
    %12 = arith.truncf %11 : vector<2x64xf32> to vector<2x64xbf16>
    %c0_9 = arith.constant 0 : index
    %c0_10 = arith.constant 0 : index
    %13 = vector.load %arg5[%c0_9, %c0_10] : memref<4096x128xbf16, #tpu.memory_space<vmem>>, vector<64x128xbf16>
    %cst_11 = arith.constant dense<0.000000e+00> : vector<2x128xf32>
    %14 = tpu.matmul %12, %13, %cst_11 {dimension_numbers = #tpu.dot_dimension_numbers<[1], [0], [0], [1], [0, 0, 1, 1], [], []>} : vector<2x64xbf16>, vector<64x128xbf16>, vector<2x128xf32> -> vector<2x128xf32>
    %15 = arith.addf %10, %14 : vector<2x128xf32>
    %16 = vector.extract_strided_slice %9 {offsets = [2, 0], sizes = [2, 64], strides = [1, 1]} : vector<128x64xf32> to vector<2x64xf32>
    %17 = arith.truncf %16 : vector<2x64xf32> to vector<2x64xbf16>
    %c64 = arith.constant 64 : index
    %c0_12 = arith.constant 0 : index
    %18 = vector.load %arg5[%c64, %c0_12] : memref<4096x128xbf16, #tpu.memory_space<vmem>>, vector<64x128xbf16>
    %cst_13 = arith.constant dense<0.000000e+00> : vector<2x128xf32>
    %19 = tpu.matmul %17, %18, %cst_13 {dimension_numbers = #tpu.dot_dimension_numbers<[1], [0], [0], [1], [0, 0, 1, 1], [], []>} : vector<2x64xbf16>, vector<64x128xbf16>, vector<2x128xf32> -> vector<2x128xf32>
    %20 = arith.addf %15, %19 : vector<2x128xf32>
    %21 = vector.extract_strided_slice %9 {offsets = [4, 0], sizes = [2, 64], strides = [1, 1]} : vector<128x64xf32> to vector<2x64xf32>
    %22 = arith.truncf %21 : vector<2x64xf32> to vector<2x64xbf16>
    %c128 = arith.constant 128 : index
    %c0_14 = arith.constant 0 : index
    %23 = vector.load %arg5[%c128, %c0_14] : memref<4096x128xbf16, #tpu.memory_space<vmem>>, vector<64x128xbf16>
    %cst_15 = arith.constant dense<0.000000e+00> : vector<2x128xf32>
    %24 = tpu.matmul %22, %23, %cst_15 {dimension_numbers = #tpu.dot_dimension_numbers<[1], [0], [0], [1], [0, 0, 1, 1], [], []>} : vector<2x64xbf16>, vector<64x128xbf16>, vector<2x128xf32> -> vector<2x128xf32>
    %25 = arith.addf %20, %24 : vector<2x128xf32>
    %26 = vector.extract_strided_slice %9 {offsets = [6, 0], sizes = [2, 64], strides = [1, 1]} : vector<128x64xf32> to vector<2x64xf32>
    %27 = arith.truncf %26 : vector<2x64xf32> to vector<2x64xbf16>
    %c192 = arith.constant 192 : index
    %c0_16 = arith.constant 0 : index
    %28 = vector.load %arg5[%c192, %c0_16] : memref<4096x128xbf16, #tpu.memory_space<vmem>>, vector<64x128xbf16>
    %cst_17 = arith.constant dense<0.000000e+00> : vector<2x128xf32>
    %29 = tpu.matmul %27, %28, %cst_17 {dimension_numbers = #tpu.dot_dimension_numbers<[1], [0], [0], [1], [0, 0, 1, 1], [], []>} : vector<2x64xbf16>, vector<64x128xbf16>, vector<2x128xf32> -> vector<2x128xf32>
    %30 = arith.addf %25, %29 : vector<2x128xf32>
    %31 = vector.extract_strided_slice %9 {offsets = [8, 0], sizes = [2, 64], strides = [1, 1]} : vector<128x64xf32> to vector<2x64xf32>
    %32 = arith.truncf %31 : vector<2x64xf32> to vector<2x64xbf16>
    %c256 = arith.constant 256 : index
    %c0_18 = arith.constant 0 : index
    %33 = vector.load %arg5[%c256, %c0_18] : memref<4096x128xbf16, #tpu.memory_space<vmem>>, vector<64x128xbf16>
    %cst_19 = arith.constant dense<0.000000e+00> : vector<2x128xf32>
    %34 = tpu.matmul %32, %33, %cst_19 {dimension_numbers = #tpu.dot_dimension_numbers<[1], [0], [0], [1], [0, 0, 1, 1], [], []>} : vector<2x64xbf16>, vector<64x128xbf16>, vector<2x128xf32> -> vector<2x128xf32>
    %35 = arith.addf %30, %34 : vector<2x128xf32>
    %36 = vector.extract_strided_slice %9 {offsets = [10, 0], sizes = [2, 64], strides = [1, 1]} : vector<128x64xf32> to vector<2x64xf32>
    %37 = arith.truncf %36 : vector<2x64xf32> to vector<2x64xbf16>
    %c320 = arith.constant 320 : index
    %c0_20 = arith.constant 0 : index
    %38 = vector.load %arg5[%c320, %c0_20] : memref<4096x128xbf16, #tpu.memory_space<vmem>>, vector<64x128xbf16>
    %cst_21 = arith.constant dense<0.000000e+00> : vector<2x128xf32>
    %39 = tpu.matmul %37, %38, %cst_21 {dimension_numbers = #tpu.dot_dimension_numbers<[1], [0], [0], [1], [0, 0, 1, 1], [], []>} : vector<2x64xbf16>, vector<64x128xbf16>, vector<2x128xf32> -> vector<2x128xf32>
    %40 = arith.addf %35, %39 : vector<2x128xf32>
    %41 = vector.extract_strided_slice %9 {offsets = [12, 0], sizes = [2, 64], strides = [1, 1]} : vector<128x64xf32> to vector<2x64xf32>
    %42 = arith.truncf %41 : vector<2x64xf32> to vector<2x64xbf16>
    %c384 = arith.constant 384 : index
    %c0_22 = arith.constant 0 : index
    %43 = vector.load %arg5[%c384, %c0_22] : memref<4096x128xbf16, #tpu.memory_space<vmem>>, vector<64x128xbf16>
    %cst_23 = arith.constant dense<0.000000e+00> : vector<2x128xf32>
    %44 = tpu.matmul %42, %43, %cst_23 {dimension_numbers = #tpu.dot_dimension_numbers<[1], [0], [0], [1], [0, 0, 1, 1], [], []>} : vector<2x64xbf16>, vector<64x128xbf16>, vector<2x128xf32> -> vector<2x128xf32>
    %45 = arith.addf %40, %44 : vector<2x128xf32>
    %46 = vector.extract_strided_slice %9 {offsets = [14, 0], sizes = [2, 64], strides = [1, 1]} : vector<128x64xf32> to vector<2x64xf32>
    %47 = arith.truncf %46 : vector<2x64xf32> to vector<2x64xbf16>
    %c448 = arith.constant 448 : index
    %c0_24 = arith.constant 0 : index
    %48 = vector.load %arg5[%c448, %c0_24] : memref<4096x128xbf16, #tpu.memory_space<vmem>>, vector<64x128xbf16>
    %cst_25 = arith.constant dense<0.000000e+00> : vector<2x128xf32>
    %49 = tpu.matmul %47, %48, %cst_25 {dimension_numbers = #tpu.dot_dimension_numbers<[1], [0], [0], [1], [0, 0, 1, 1], [], []>} : vector<2x64xbf16>, vector<64x128xbf16>, vector<2x128xf32> -> vector<2x128xf32>
    %50 = arith.addf %45, %49 : vector<2x128xf32>
    %51 = vector.extract_strided_slice %9 {offsets = [16, 0], sizes = [2, 64], strides = [1, 1]} : vector<128x64xf32> to vector<2x64xf32>
    %52 = arith.truncf %51 : vector<2x64xf32> to vector<2x64xbf16>
    %c512 = arith.constant 512 : index
    %c0_26 = arith.constant 0 : index
    %53 = vector.load %arg5[%c512, %c0_26] : memref<4096x128xbf16, #tpu.memory_space<vmem>>, vector<64x128xbf16>
    %cst_27 = arith.constant dense<0.000000e+00> : vector<2x128xf32>
    %54 = tpu.matmul %52, %53, %cst_27 {dimension_numbers = #tpu.dot_dimension_numbers<[1], [0], [0], [1], [0, 0, 1, 1], [], []>} : vector<2x64xbf16>, vector<64x128xbf16>, vector<2x128xf32> -> vector<2x128xf32>
    %55 = arith.addf %50, %54 : vector<2x128xf32>
    %56 = vector.extract_strided_slice %9 {offsets = [18, 0], sizes = [2, 64], strides = [1, 1]} : vector<128x64xf32> to vector<2x64xf32>
    %57 = arith.truncf %56 : vector<2x64xf32> to vector<2x64xbf16>
    %c576 = arith.constant 576 : index
    %c0_28 = arith.constant 0 : index
    %58 = vector.load %arg5[%c576, %c0_28] : memref<4096x128xbf16, #tpu.memory_space<vmem>>, vector<64x128xbf16>
    %cst_29 = arith.constant dense<0.000000e+00> : vector<2x128xf32>
    %59 = tpu.matmul %57, %58, %cst_29 {dimension_numbers = #tpu.dot_dimension_numbers<[1], [0], [0], [1], [0, 0, 1, 1], [], []>} : vector<2x64xbf16>, vector<64x128xbf16>, vector<2x128xf32> -> vector<2x128xf32>
    %60 = arith.addf %55, %59 : vector<2x128xf32>
    %61 = vector.extract_strided_slice %9 {offsets = [20, 0], sizes = [2, 64], strides = [1, 1]} : vector<128x64xf32> to vector<2x64xf32>
    %62 = arith.truncf %61 : vector<2x64xf32> to vector<2x64xbf16>
    %c640 = arith.constant 640 : index
    %c0_30 = arith.constant 0 : index
    %63 = vector.load %arg5[%c640, %c0_30] : memref<4096x128xbf16, #tpu.memory_space<vmem>>, vector<64x128xbf16>
    %cst_31 = arith.constant dense<0.000000e+00> : vector<2x128xf32>
    %64 = tpu.matmul %62, %63, %cst_31 {dimension_numbers = #tpu.dot_dimension_numbers<[1], [0], [0], [1], [0, 0, 1, 1], [], []>} : vector<2x64xbf16>, vector<64x128xbf16>, vector<2x128xf32> -> vector<2x128xf32>
    %65 = arith.addf %60, %64 : vector<2x128xf32>
    %66 = vector.extract_strided_slice %9 {offsets = [22, 0], sizes = [2, 64], strides = [1, 1]} : vector<128x64xf32> to vector<2x64xf32>
    %67 = arith.truncf %66 : vector<2x64xf32> to vector<2x64xbf16>
    %c704 = arith.constant 704 : index
    %c0_32 = arith.constant 0 : index
    %68 = vector.load %arg5[%c704, %c0_32] : memref<4096x128xbf16, #tpu.memory_space<vmem>>, vector<64x128xbf16>
    %cst_33 = arith.constant dense<0.000000e+00> : vector<2x128xf32>
    %69 = tpu.matmul %67, %68, %cst_33 {dimension_numbers = #tpu.dot_dimension_numbers<[1], [0], [0], [1], [0, 0, 1, 1], [], []>} : vector<2x64xbf16>, vector<64x128xbf16>, vector<2x128xf32> -> vector<2x128xf32>
    %70 = arith.addf %65, %69 : vector<2x128xf32>
    %71 = vector.extract_strided_slice %9 {offsets = [24, 0], sizes = [2, 64], strides = [1, 1]} : vector<128x64xf32> to vector<2x64xf32>
    %72 = arith.truncf %71 : vector<2x64xf32> to vector<2x64xbf16>
    %c768 = arith.constant 768 : index
    %c0_34 = arith.constant 0 : index
    %73 = vector.load %arg5[%c768, %c0_34] : memref<4096x128xbf16, #tpu.memory_space<vmem>>, vector<64x128xbf16>
    %cst_35 = arith.constant dense<0.000000e+00> : vector<2x128xf32>
    %74 = tpu.matmul %72, %73, %cst_35 {dimension_numbers = #tpu.dot_dimension_numbers<[1], [0], [0], [1], [0, 0, 1, 1], [], []>} : vector<2x64xbf16>, vector<64x128xbf16>, vector<2x128xf32> -> vector<2x128xf32>
    %75 = arith.addf %70, %74 : vector<2x128xf32>
    %76 = vector.extract_strided_slice %9 {offsets = [26, 0], sizes = [2, 64], strides = [1, 1]} : vector<128x64xf32> to vector<2x64xf32>
    %77 = arith.truncf %76 : vector<2x64xf32> to vector<2x64xbf16>
    %c832 = arith.constant 832 : index
    %c0_36 = arith.constant 0 : index
    %78 = vector.load %arg5[%c832, %c0_36] : memref<4096x128xbf16, #tpu.memory_space<vmem>>, vector<64x128xbf16>
    %cst_37 = arith.constant dense<0.000000e+00> : vector<2x128xf32>
    %79 = tpu.matmul %77, %78, %cst_37 {dimension_numbers = #tpu.dot_dimension_numbers<[1], [0], [0], [1], [0, 0, 1, 1], [], []>} : vector<2x64xbf16>, vector<64x128xbf16>, vector<2x128xf32> -> vector<2x128xf32>
    %80 = arith.addf %75, %79 : vector<2x128xf32>
    %81 = vector.extract_strided_slice %9 {offsets = [28, 0], sizes = [2, 64], strides = [1, 1]} : vector<128x64xf32> to vector<2x64xf32>
    %82 = arith.truncf %81 : vector<2x64xf32> to vector<2x64xbf16>
    %c896 = arith.constant 896 : index
    %c0_38 = arith.constant 0 : index
    %83 = vector.load %arg5[%c896, %c0_38] : memref<4096x128xbf16, #tpu.memory_space<vmem>>, vector<64x128xbf16>
    %cst_39 = arith.constant dense<0.000000e+00> : vector<2x128xf32>
    %84 = tpu.matmul %82, %83, %cst_39 {dimension_numbers = #tpu.dot_dimension_numbers<[1], [0], [0], [1], [0, 0, 1, 1], [], []>} : vector<2x64xbf16>, vector<64x128xbf16>, vector<2x128xf32> -> vector<2x128xf32>
    %85 = arith.addf %80, %84 : vector<2x128xf32>
    %86 = vector.extract_strided_slice %9 {offsets = [30, 0], sizes = [2, 64], strides = [1, 1]} : vector<128x64xf32> to vector<2x64xf32>
    %87 = arith.truncf %86 : vector<2x64xf32> to vector<2x64xbf16>
    %c960 = arith.constant 960 : index
    %c0_40 = arith.constant 0 : index
    %88 = vector.load %arg5[%c960, %c0_40] : memref<4096x128xbf16, #tpu.memory_space<vmem>>, vector<64x128xbf16>
    %cst_41 = arith.constant dense<0.000000e+00> : vector<2x128xf32>
    %89 = tpu.matmul %87, %88, %cst_41 {dimension_numbers = #tpu.dot_dimension_numbers<[1], [0], [0], [1], [0, 0, 1, 1], [], []>} : vector<2x64xbf16>, vector<64x128xbf16>, vector<2x128xf32> -> vector<2x128xf32>
    %90 = arith.addf %85, %89 : vector<2x128xf32>
    %91 = vector.extract_strided_slice %9 {offsets = [32, 0], sizes = [2, 64], strides = [1, 1]} : vector<128x64xf32> to vector<2x64xf32>
    %92 = arith.truncf %91 : vector<2x64xf32> to vector<2x64xbf16>
    %c1024 = arith.constant 1024 : index
    %c0_42 = arith.constant 0 : index
    %93 = vector.load %arg5[%c1024, %c0_42] : memref<4096x128xbf16, #tpu.memory_space<vmem>>, vector<64x128xbf16>
    %cst_43 = arith.constant dense<0.000000e+00> : vector<2x128xf32>
    %94 = tpu.matmul %92, %93, %cst_43 {dimension_numbers = #tpu.dot_dimension_numbers<[1], [0], [0], [1], [0, 0, 1, 1], [], []>} : vector<2x64xbf16>, vector<64x128xbf16>, vector<2x128xf32> -> vector<2x128xf32>
    %95 = arith.addf %90, %94 : vector<2x128xf32>
    %96 = vector.extract_strided_slice %9 {offsets = [34, 0], sizes = [2, 64], strides = [1, 1]} : vector<128x64xf32> to vector<2x64xf32>
    %97 = arith.truncf %96 : vector<2x64xf32> to vector<2x64xbf16>
    %c1088 = arith.constant 1088 : index
    %c0_44 = arith.constant 0 : index
    %98 = vector.load %arg5[%c1088, %c0_44] : memref<4096x128xbf16, #tpu.memory_space<vmem>>, vector<64x128xbf16>
    %cst_45 = arith.constant dense<0.000000e+00> : vector<2x128xf32>
    %99 = tpu.matmul %97, %98, %cst_45 {dimension_numbers = #tpu.dot_dimension_numbers<[1], [0], [0], [1], [0, 0, 1, 1], [], []>} : vector<2x64xbf16>, vector<64x128xbf16>, vector<2x128xf32> -> vector<2x128xf32>
    %100 = arith.addf %95, %99 : vector<2x128xf32>
    %101 = vector.extract_strided_slice %9 {offsets = [36, 0], sizes = [2, 64], strides = [1, 1]} : vector<128x64xf32> to vector<2x64xf32>
    %102 = arith.truncf %101 : vector<2x64xf32> to vector<2x64xbf16>
    %c1152 = arith.constant 1152 : index
    %c0_46 = arith.constant 0 : index
    %103 = vector.load %arg5[%c1152, %c0_46] : memref<4096x128xbf16, #tpu.memory_space<vmem>>, vector<64x128xbf16>
    %cst_47 = arith.constant dense<0.000000e+00> : vector<2x128xf32>
    %104 = tpu.matmul %102, %103, %cst_47 {dimension_numbers = #tpu.dot_dimension_numbers<[1], [0], [0], [1], [0, 0, 1, 1], [], []>} : vector<2x64xbf16>, vector<64x128xbf16>, vector<2x128xf32> -> vector<2x128xf32>
    %105 = arith.addf %100, %104 : vector<2x128xf32>
    %106 = vector.extract_strided_slice %9 {offsets = [38, 0], sizes = [2, 64], strides = [1, 1]} : vector<128x64xf32> to vector<2x64xf32>
    %107 = arith.truncf %106 : vector<2x64xf32> to vector<2x64xbf16>
    %c1216 = arith.constant 1216 : index
    %c0_48 = arith.constant 0 : index
    %108 = vector.load %arg5[%c1216, %c0_48] : memref<4096x128xbf16, #tpu.memory_space<vmem>>, vector<64x128xbf16>
    %cst_49 = arith.constant dense<0.000000e+00> : vector<2x128xf32>
    %109 = tpu.matmul %107, %108, %cst_49 {dimension_numbers = #tpu.dot_dimension_numbers<[1], [0], [0], [1], [0, 0, 1, 1], [], []>} : vector<2x64xbf16>, vector<64x128xbf16>, vector<2x128xf32> -> vector<2x128xf32>
    %110 = arith.addf %105, %109 : vector<2x128xf32>
    %111 = vector.extract_strided_slice %9 {offsets = [40, 0], sizes = [2, 64], strides = [1, 1]} : vector<128x64xf32> to vector<2x64xf32>
    %112 = arith.truncf %111 : vector<2x64xf32> to vector<2x64xbf16>
    %c1280 = arith.constant 1280 : index
    %c0_50 = arith.constant 0 : index
    %113 = vector.load %arg5[%c1280, %c0_50] : memref<4096x128xbf16, #tpu.memory_space<vmem>>, vector<64x128xbf16>
    %cst_51 = arith.constant dense<0.000000e+00> : vector<2x128xf32>
    %114 = tpu.matmul %112, %113, %cst_51 {dimension_numbers = #tpu.dot_dimension_numbers<[1], [0], [0], [1], [0, 0, 1, 1], [], []>} : vector<2x64xbf16>, vector<64x128xbf16>, vector<2x128xf32> -> vector<2x128xf32>
    %115 = arith.addf %110, %114 : vector<2x128xf32>
    %116 = vector.extract_strided_slice %9 {offsets = [42, 0], sizes = [2, 64], strides = [1, 1]} : vector<128x64xf32> to vector<2x64xf32>
    %117 = arith.truncf %116 : vector<2x64xf32> to vector<2x64xbf16>
    %c1344 = arith.constant 1344 : index
    %c0_52 = arith.constant 0 : index
    %118 = vector.load %arg5[%c1344, %c0_52] : memref<4096x128xbf16, #tpu.memory_space<vmem>>, vector<64x128xbf16>
    %cst_53 = arith.constant dense<0.000000e+00> : vector<2x128xf32>
    %119 = tpu.matmul %117, %118, %cst_53 {dimension_numbers = #tpu.dot_dimension_numbers<[1], [0], [0], [1], [0, 0, 1, 1], [], []>} : vector<2x64xbf16>, vector<64x128xbf16>, vector<2x128xf32> -> vector<2x128xf32>
    %120 = arith.addf %115, %119 : vector<2x128xf32>
    %121 = vector.extract_strided_slice %9 {offsets = [44, 0], sizes = [2, 64], strides = [1, 1]} : vector<128x64xf32> to vector<2x64xf32>
    %122 = arith.truncf %121 : vector<2x64xf32> to vector<2x64xbf16>
    %c1408 = arith.constant 1408 : index
    %c0_54 = arith.constant 0 : index
    %123 = vector.load %arg5[%c1408, %c0_54] : memref<4096x128xbf16, #tpu.memory_space<vmem>>, vector<64x128xbf16>
    %cst_55 = arith.constant dense<0.000000e+00> : vector<2x128xf32>
    %124 = tpu.matmul %122, %123, %cst_55 {dimension_numbers = #tpu.dot_dimension_numbers<[1], [0], [0], [1], [0, 0, 1, 1], [], []>} : vector<2x64xbf16>, vector<64x128xbf16>, vector<2x128xf32> -> vector<2x128xf32>
    %125 = arith.addf %120, %124 : vector<2x128xf32>
    %126 = vector.extract_strided_slice %9 {offsets = [46, 0], sizes = [2, 64], strides = [1, 1]} : vector<128x64xf32> to vector<2x64xf32>
    %127 = arith.truncf %126 : vector<2x64xf32> to vector<2x64xbf16>
    %c1472 = arith.constant 1472 : index
    %c0_56 = arith.constant 0 : index
    %128 = vector.load %arg5[%c1472, %c0_56] : memref<4096x128xbf16, #tpu.memory_space<vmem>>, vector<64x128xbf16>
    %cst_57 = arith.constant dense<0.000000e+00> : vector<2x128xf32>
    %129 = tpu.matmul %127, %128, %cst_57 {dimension_numbers = #tpu.dot_dimension_numbers<[1], [0], [0], [1], [0, 0, 1, 1], [], []>} : vector<2x64xbf16>, vector<64x128xbf16>, vector<2x128xf32> -> vector<2x128xf32>
    %130 = arith.addf %125, %129 : vector<2x128xf32>
    %131 = vector.extract_strided_slice %9 {offsets = [48, 0], sizes = [2, 64], strides = [1, 1]} : vector<128x64xf32> to vector<2x64xf32>
    %132 = arith.truncf %131 : vector<2x64xf32> to vector<2x64xbf16>
    %c1536 = arith.constant 1536 : index
    %c0_58 = arith.constant 0 : index
    %133 = vector.load %arg5[%c1536, %c0_58] : memref<4096x128xbf16, #tpu.memory_space<vmem>>, vector<64x128xbf16>
    %cst_59 = arith.constant dense<0.000000e+00> : vector<2x128xf32>
    %134 = tpu.matmul %132, %133, %cst_59 {dimension_numbers = #tpu.dot_dimension_numbers<[1], [0], [0], [1], [0, 0, 1, 1], [], []>} : vector<2x64xbf16>, vector<64x128xbf16>, vector<2x128xf32> -> vector<2x128xf32>
    %135 = arith.addf %130, %134 : vector<2x128xf32>
    %136 = vector.extract_strided_slice %9 {offsets = [50, 0], sizes = [2, 64], strides = [1, 1]} : vector<128x64xf32> to vector<2x64xf32>
    %137 = arith.truncf %136 : vector<2x64xf32> to vector<2x64xbf16>
    %c1600 = arith.constant 1600 : index
    %c0_60 = arith.constant 0 : index
    %138 = vector.load %arg5[%c1600, %c0_60] : memref<4096x128xbf16, #tpu.memory_space<vmem>>, vector<64x128xbf16>
    %cst_61 = arith.constant dense<0.000000e+00> : vector<2x128xf32>
    %139 = tpu.matmul %137, %138, %cst_61 {dimension_numbers = #tpu.dot_dimension_numbers<[1], [0], [0], [1], [0, 0, 1, 1], [], []>} : vector<2x64xbf16>, vector<64x128xbf16>, vector<2x128xf32> -> vector<2x128xf32>
    %140 = arith.addf %135, %139 : vector<2x128xf32>
    %141 = vector.extract_strided_slice %9 {offsets = [52, 0], sizes = [2, 64], strides = [1, 1]} : vector<128x64xf32> to vector<2x64xf32>
    %142 = arith.truncf %141 : vector<2x64xf32> to vector<2x64xbf16>
    %c1664 = arith.constant 1664 : index
    %c0_62 = arith.constant 0 : index
    %143 = vector.load %arg5[%c1664, %c0_62] : memref<4096x128xbf16, #tpu.memory_space<vmem>>, vector<64x128xbf16>
    %cst_63 = arith.constant dense<0.000000e+00> : vector<2x128xf32>
    %144 = tpu.matmul %142, %143, %cst_63 {dimension_numbers = #tpu.dot_dimension_numbers<[1], [0], [0], [1], [0, 0, 1, 1], [], []>} : vector<2x64xbf16>, vector<64x128xbf16>, vector<2x128xf32> -> vector<2x128xf32>
    %145 = arith.addf %140, %144 : vector<2x128xf32>
    %146 = vector.extract_strided_slice %9 {offsets = [54, 0], sizes = [2, 64], strides = [1, 1]} : vector<128x64xf32> to vector<2x64xf32>
    %147 = arith.truncf %146 : vector<2x64xf32> to vector<2x64xbf16>
    %c1728 = arith.constant 1728 : index
    %c0_64 = arith.constant 0 : index
    %148 = vector.load %arg5[%c1728, %c0_64] : memref<4096x128xbf16, #tpu.memory_space<vmem>>, vector<64x128xbf16>
    %cst_65 = arith.constant dense<0.000000e+00> : vector<2x128xf32>
    %149 = tpu.matmul %147, %148, %cst_65 {dimension_numbers = #tpu.dot_dimension_numbers<[1], [0], [0], [1], [0, 0, 1, 1], [], []>} : vector<2x64xbf16>, vector<64x128xbf16>, vector<2x128xf32> -> vector<2x128xf32>
    %150 = arith.addf %145, %149 : vector<2x128xf32>
    %151 = vector.extract_strided_slice %9 {offsets = [56, 0], sizes = [2, 64], strides = [1, 1]} : vector<128x64xf32> to vector<2x64xf32>
    %152 = arith.truncf %151 : vector<2x64xf32> to vector<2x64xbf16>
    %c1792 = arith.constant 1792 : index
    %c0_66 = arith.constant 0 : index
    %153 = vector.load %arg5[%c1792, %c0_66] : memref<4096x128xbf16, #tpu.memory_space<vmem>>, vector<64x128xbf16>
    %cst_67 = arith.constant dense<0.000000e+00> : vector<2x128xf32>
    %154 = tpu.matmul %152, %153, %cst_67 {dimension_numbers = #tpu.dot_dimension_numbers<[1], [0], [0], [1], [0, 0, 1, 1], [], []>} : vector<2x64xbf16>, vector<64x128xbf16>, vector<2x128xf32> -> vector<2x128xf32>
    %155 = arith.addf %150, %154 : vector<2x128xf32>
    %156 = vector.extract_strided_slice %9 {offsets = [58, 0], sizes = [2, 64], strides = [1, 1]} : vector<128x64xf32> to vector<2x64xf32>
    %157 = arith.truncf %156 : vector<2x64xf32> to vector<2x64xbf16>
    %c1856 = arith.constant 1856 : index
    %c0_68 = arith.constant 0 : index
    %158 = vector.load %arg5[%c1856, %c0_68] : memref<4096x128xbf16, #tpu.memory_space<vmem>>, vector<64x128xbf16>
    %cst_69 = arith.constant dense<0.000000e+00> : vector<2x128xf32>
    %159 = tpu.matmul %157, %158, %cst_69 {dimension_numbers = #tpu.dot_dimension_numbers<[1], [0], [0], [1], [0, 0, 1, 1], [], []>} : vector<2x64xbf16>, vector<64x128xbf16>, vector<2x128xf32> -> vector<2x128xf32>
    %160 = arith.addf %155, %159 : vector<2x128xf32>
    %161 = vector.extract_strided_slice %9 {offsets = [60, 0], sizes = [2, 64], strides = [1, 1]} : vector<128x64xf32> to vector<2x64xf32>
    %162 = arith.truncf %161 : vector<2x64xf32> to vector<2x64xbf16>
    %c1920 = arith.constant 1920 : index
    %c0_70 = arith.constant 0 : index
    %163 = vector.load %arg5[%c1920, %c0_70] : memref<4096x128xbf16, #tpu.memory_space<vmem>>, vector<64x128xbf16>
    %cst_71 = arith.constant dense<0.000000e+00> : vector<2x128xf32>
    %164 = tpu.matmul %162, %163, %cst_71 {dimension_numbers = #tpu.dot_dimension_numbers<[1], [0], [0], [1], [0, 0, 1, 1], [], []>} : vector<2x64xbf16>, vector<64x128xbf16>, vector<2x128xf32> -> vector<2x128xf32>
    %165 = arith.addf %160, %164 : vector<2x128xf32>
    %166 = vector.extract_strided_slice %9 {offsets = [62, 0], sizes = [2, 64], strides = [1, 1]} : vector<128x64xf32> to vector<2x64xf32>
    %167 = arith.truncf %166 : vector<2x64xf32> to vector<2x64xbf16>
    %c1984 = arith.constant 1984 : index
    %c0_72 = arith.constant 0 : index
    %168 = vector.load %arg5[%c1984, %c0_72] : memref<4096x128xbf16, #tpu.memory_space<vmem>>, vector<64x128xbf16>
    %cst_73 = arith.constant dense<0.000000e+00> : vector<2x128xf32>
    %169 = tpu.matmul %167, %168, %cst_73 {dimension_numbers = #tpu.dot_dimension_numbers<[1], [0], [0], [1], [0, 0, 1, 1], [], []>} : vector<2x64xbf16>, vector<64x128xbf16>, vector<2x128xf32> -> vector<2x128xf32>
    %170 = arith.addf %165, %169 : vector<2x128xf32>
    %171 = vector.extract_strided_slice %9 {offsets = [64, 0], sizes = [2, 64], strides = [1, 1]} : vector<128x64xf32> to vector<2x64xf32>
    %172 = arith.truncf %171 : vector<2x64xf32> to vector<2x64xbf16>
    %c2048 = arith.constant 2048 : index
    %c0_74 = arith.constant 0 : index
    %173 = vector.load %arg5[%c2048, %c0_74] : memref<4096x128xbf16, #tpu.memory_space<vmem>>, vector<64x128xbf16>
    %cst_75 = arith.constant dense<0.000000e+00> : vector<2x128xf32>
    %174 = tpu.matmul %172, %173, %cst_75 {dimension_numbers = #tpu.dot_dimension_numbers<[1], [0], [0], [1], [0, 0, 1, 1], [], []>} : vector<2x64xbf16>, vector<64x128xbf16>, vector<2x128xf32> -> vector<2x128xf32>
    %175 = arith.addf %170, %174 : vector<2x128xf32>
    %176 = vector.extract_strided_slice %9 {offsets = [66, 0], sizes = [2, 64], strides = [1, 1]} : vector<128x64xf32> to vector<2x64xf32>
    %177 = arith.truncf %176 : vector<2x64xf32> to vector<2x64xbf16>
    %c2112 = arith.constant 2112 : index
    %c0_76 = arith.constant 0 : index
    %178 = vector.load %arg5[%c2112, %c0_76] : memref<4096x128xbf16, #tpu.memory_space<vmem>>, vector<64x128xbf16>
    %cst_77 = arith.constant dense<0.000000e+00> : vector<2x128xf32>
    %179 = tpu.matmul %177, %178, %cst_77 {dimension_numbers = #tpu.dot_dimension_numbers<[1], [0], [0], [1], [0, 0, 1, 1], [], []>} : vector<2x64xbf16>, vector<64x128xbf16>, vector<2x128xf32> -> vector<2x128xf32>
    %180 = arith.addf %175, %179 : vector<2x128xf32>
    %181 = vector.extract_strided_slice %9 {offsets = [68, 0], sizes = [2, 64], strides = [1, 1]} : vector<128x64xf32> to vector<2x64xf32>
    %182 = arith.truncf %181 : vector<2x64xf32> to vector<2x64xbf16>
    %c2176 = arith.constant 2176 : index
    %c0_78 = arith.constant 0 : index
    %183 = vector.load %arg5[%c2176, %c0_78] : memref<4096x128xbf16, #tpu.memory_space<vmem>>, vector<64x128xbf16>
    %cst_79 = arith.constant dense<0.000000e+00> : vector<2x128xf32>
    %184 = tpu.matmul %182, %183, %cst_79 {dimension_numbers = #tpu.dot_dimension_numbers<[1], [0], [0], [1], [0, 0, 1, 1], [], []>} : vector<2x64xbf16>, vector<64x128xbf16>, vector<2x128xf32> -> vector<2x128xf32>
    %185 = arith.addf %180, %184 : vector<2x128xf32>
    %186 = vector.extract_strided_slice %9 {offsets = [70, 0], sizes = [2, 64], strides = [1, 1]} : vector<128x64xf32> to vector<2x64xf32>
    %187 = arith.truncf %186 : vector<2x64xf32> to vector<2x64xbf16>
    %c2240 = arith.constant 2240 : index
    %c0_80 = arith.constant 0 : index
    %188 = vector.load %arg5[%c2240, %c0_80] : memref<4096x128xbf16, #tpu.memory_space<vmem>>, vector<64x128xbf16>
    %cst_81 = arith.constant dense<0.000000e+00> : vector<2x128xf32>
    %189 = tpu.matmul %187, %188, %cst_81 {dimension_numbers = #tpu.dot_dimension_numbers<[1], [0], [0], [1], [0, 0, 1, 1], [], []>} : vector<2x64xbf16>, vector<64x128xbf16>, vector<2x128xf32> -> vector<2x128xf32>
    %190 = arith.addf %185, %189 : vector<2x128xf32>
    %191 = vector.extract_strided_slice %9 {offsets = [72, 0], sizes = [2, 64], strides = [1, 1]} : vector<128x64xf32> to vector<2x64xf32>
    %192 = arith.truncf %191 : vector<2x64xf32> to vector<2x64xbf16>
    %c2304 = arith.constant 2304 : index
    %c0_82 = arith.constant 0 : index
    %193 = vector.load %arg5[%c2304, %c0_82] : memref<4096x128xbf16, #tpu.memory_space<vmem>>, vector<64x128xbf16>
    %cst_83 = arith.constant dense<0.000000e+00> : vector<2x128xf32>
    %194 = tpu.matmul %192, %193, %cst_83 {dimension_numbers = #tpu.dot_dimension_numbers<[1], [0], [0], [1], [0, 0, 1, 1], [], []>} : vector<2x64xbf16>, vector<64x128xbf16>, vector<2x128xf32> -> vector<2x128xf32>
    %195 = arith.addf %190, %194 : vector<2x128xf32>
    %196 = vector.extract_strided_slice %9 {offsets = [74, 0], sizes = [2, 64], strides = [1, 1]} : vector<128x64xf32> to vector<2x64xf32>
    %197 = arith.truncf %196 : vector<2x64xf32> to vector<2x64xbf16>
    %c2368 = arith.constant 2368 : index
    %c0_84 = arith.constant 0 : index
    %198 = vector.load %arg5[%c2368, %c0_84] : memref<4096x128xbf16, #tpu.memory_space<vmem>>, vector<64x128xbf16>
    %cst_85 = arith.constant dense<0.000000e+00> : vector<2x128xf32>
    %199 = tpu.matmul %197, %198, %cst_85 {dimension_numbers = #tpu.dot_dimension_numbers<[1], [0], [0], [1], [0, 0, 1, 1], [], []>} : vector<2x64xbf16>, vector<64x128xbf16>, vector<2x128xf32> -> vector<2x128xf32>
    %200 = arith.addf %195, %199 : vector<2x128xf32>
    %201 = vector.extract_strided_slice %9 {offsets = [76, 0], sizes = [2, 64], strides = [1, 1]} : vector<128x64xf32> to vector<2x64xf32>
    %202 = arith.truncf %201 : vector<2x64xf32> to vector<2x64xbf16>
    %c2432 = arith.constant 2432 : index
    %c0_86 = arith.constant 0 : index
    %203 = vector.load %arg5[%c2432, %c0_86] : memref<4096x128xbf16, #tpu.memory_space<vmem>>, vector<64x128xbf16>
    %cst_87 = arith.constant dense<0.000000e+00> : vector<2x128xf32>
    %204 = tpu.matmul %202, %203, %cst_87 {dimension_numbers = #tpu.dot_dimension_numbers<[1], [0], [0], [1], [0, 0, 1, 1], [], []>} : vector<2x64xbf16>, vector<64x128xbf16>, vector<2x128xf32> -> vector<2x128xf32>
    %205 = arith.addf %200, %204 : vector<2x128xf32>
    %206 = vector.extract_strided_slice %9 {offsets = [78, 0], sizes = [2, 64], strides = [1, 1]} : vector<128x64xf32> to vector<2x64xf32>
    %207 = arith.truncf %206 : vector<2x64xf32> to vector<2x64xbf16>
    %c2496 = arith.constant 2496 : index
    %c0_88 = arith.constant 0 : index
    %208 = vector.load %arg5[%c2496, %c0_88] : memref<4096x128xbf16, #tpu.memory_space<vmem>>, vector<64x128xbf16>
    %cst_89 = arith.constant dense<0.000000e+00> : vector<2x128xf32>
    %209 = tpu.matmul %207, %208, %cst_89 {dimension_numbers = #tpu.dot_dimension_numbers<[1], [0], [0], [1], [0, 0, 1, 1], [], []>} : vector<2x64xbf16>, vector<64x128xbf16>, vector<2x128xf32> -> vector<2x128xf32>
    %210 = arith.addf %205, %209 : vector<2x128xf32>
    %211 = vector.extract_strided_slice %9 {offsets = [80, 0], sizes = [2, 64], strides = [1, 1]} : vector<128x64xf32> to vector<2x64xf32>
    %212 = arith.truncf %211 : vector<2x64xf32> to vector<2x64xbf16>
    %c2560 = arith.constant 2560 : index
    %c0_90 = arith.constant 0 : index
    %213 = vector.load %arg5[%c2560, %c0_90] : memref<4096x128xbf16, #tpu.memory_space<vmem>>, vector<64x128xbf16>
    %cst_91 = arith.constant dense<0.000000e+00> : vector<2x128xf32>
    %214 = tpu.matmul %212, %213, %cst_91 {dimension_numbers = #tpu.dot_dimension_numbers<[1], [0], [0], [1], [0, 0, 1, 1], [], []>} : vector<2x64xbf16>, vector<64x128xbf16>, vector<2x128xf32> -> vector<2x128xf32>
    %215 = arith.addf %210, %214 : vector<2x128xf32>
    %216 = vector.extract_strided_slice %9 {offsets = [82, 0], sizes = [2, 64], strides = [1, 1]} : vector<128x64xf32> to vector<2x64xf32>
    %217 = arith.truncf %216 : vector<2x64xf32> to vector<2x64xbf16>
    %c2624 = arith.constant 2624 : index
    %c0_92 = arith.constant 0 : index
    %218 = vector.load %arg5[%c2624, %c0_92] : memref<4096x128xbf16, #tpu.memory_space<vmem>>, vector<64x128xbf16>
    %cst_93 = arith.constant dense<0.000000e+00> : vector<2x128xf32>
    %219 = tpu.matmul %217, %218, %cst_93 {dimension_numbers = #tpu.dot_dimension_numbers<[1], [0], [0], [1], [0, 0, 1, 1], [], []>} : vector<2x64xbf16>, vector<64x128xbf16>, vector<2x128xf32> -> vector<2x128xf32>
    %220 = arith.addf %215, %219 : vector<2x128xf32>
    %221 = vector.extract_strided_slice %9 {offsets = [84, 0], sizes = [2, 64], strides = [1, 1]} : vector<128x64xf32> to vector<2x64xf32>
    %222 = arith.truncf %221 : vector<2x64xf32> to vector<2x64xbf16>
    %c2688 = arith.constant 2688 : index
    %c0_94 = arith.constant 0 : index
    %223 = vector.load %arg5[%c2688, %c0_94] : memref<4096x128xbf16, #tpu.memory_space<vmem>>, vector<64x128xbf16>
    %cst_95 = arith.constant dense<0.000000e+00> : vector<2x128xf32>
    %224 = tpu.matmul %222, %223, %cst_95 {dimension_numbers = #tpu.dot_dimension_numbers<[1], [0], [0], [1], [0, 0, 1, 1], [], []>} : vector<2x64xbf16>, vector<64x128xbf16>, vector<2x128xf32> -> vector<2x128xf32>
    %225 = arith.addf %220, %224 : vector<2x128xf32>
    %226 = vector.extract_strided_slice %9 {offsets = [86, 0], sizes = [2, 64], strides = [1, 1]} : vector<128x64xf32> to vector<2x64xf32>
    %227 = arith.truncf %226 : vector<2x64xf32> to vector<2x64xbf16>
    %c2752 = arith.constant 2752 : index
    %c0_96 = arith.constant 0 : index
    %228 = vector.load %arg5[%c2752, %c0_96] : memref<4096x128xbf16, #tpu.memory_space<vmem>>, vector<64x128xbf16>
    %cst_97 = arith.constant dense<0.000000e+00> : vector<2x128xf32>
    %229 = tpu.matmul %227, %228, %cst_97 {dimension_numbers = #tpu.dot_dimension_numbers<[1], [0], [0], [1], [0, 0, 1, 1], [], []>} : vector<2x64xbf16>, vector<64x128xbf16>, vector<2x128xf32> -> vector<2x128xf32>
    %230 = arith.addf %225, %229 : vector<2x128xf32>
    %231 = vector.extract_strided_slice %9 {offsets = [88, 0], sizes = [2, 64], strides = [1, 1]} : vector<128x64xf32> to vector<2x64xf32>
    %232 = arith.truncf %231 : vector<2x64xf32> to vector<2x64xbf16>
    %c2816 = arith.constant 2816 : index
    %c0_98 = arith.constant 0 : index
    %233 = vector.load %arg5[%c2816, %c0_98] : memref<4096x128xbf16, #tpu.memory_space<vmem>>, vector<64x128xbf16>
    %cst_99 = arith.constant dense<0.000000e+00> : vector<2x128xf32>
    %234 = tpu.matmul %232, %233, %cst_99 {dimension_numbers = #tpu.dot_dimension_numbers<[1], [0], [0], [1], [0, 0, 1, 1], [], []>} : vector<2x64xbf16>, vector<64x128xbf16>, vector<2x128xf32> -> vector<2x128xf32>
    %235 = arith.addf %230, %234 : vector<2x128xf32>
    %236 = vector.extract_strided_slice %9 {offsets = [90, 0], sizes = [2, 64], strides = [1, 1]} : vector<128x64xf32> to vector<2x64xf32>
    %237 = arith.truncf %236 : vector<2x64xf32> to vector<2x64xbf16>
    %c2880 = arith.constant 2880 : index
    %c0_100 = arith.constant 0 : index
    %238 = vector.load %arg5[%c2880, %c0_100] : memref<4096x128xbf16, #tpu.memory_space<vmem>>, vector<64x128xbf16>
    %cst_101 = arith.constant dense<0.000000e+00> : vector<2x128xf32>
    %239 = tpu.matmul %237, %238, %cst_101 {dimension_numbers = #tpu.dot_dimension_numbers<[1], [0], [0], [1], [0, 0, 1, 1], [], []>} : vector<2x64xbf16>, vector<64x128xbf16>, vector<2x128xf32> -> vector<2x128xf32>
    %240 = arith.addf %235, %239 : vector<2x128xf32>
    %241 = vector.extract_strided_slice %9 {offsets = [92, 0], sizes = [2, 64], strides = [1, 1]} : vector<128x64xf32> to vector<2x64xf32>
    %242 = arith.truncf %241 : vector<2x64xf32> to vector<2x64xbf16>
    %c2944 = arith.constant 2944 : index
    %c0_102 = arith.constant 0 : index
    %243 = vector.load %arg5[%c2944, %c0_102] : memref<4096x128xbf16, #tpu.memory_space<vmem>>, vector<64x128xbf16>
    %cst_103 = arith.constant dense<0.000000e+00> : vector<2x128xf32>
    %244 = tpu.matmul %242, %243, %cst_103 {dimension_numbers = #tpu.dot_dimension_numbers<[1], [0], [0], [1], [0, 0, 1, 1], [], []>} : vector<2x64xbf16>, vector<64x128xbf16>, vector<2x128xf32> -> vector<2x128xf32>
    %245 = arith.addf %240, %244 : vector<2x128xf32>
    %246 = vector.extract_strided_slice %9 {offsets = [94, 0], sizes = [2, 64], strides = [1, 1]} : vector<128x64xf32> to vector<2x64xf32>
    %247 = arith.truncf %246 : vector<2x64xf32> to vector<2x64xbf16>
    %c3008 = arith.constant 3008 : index
    %c0_104 = arith.constant 0 : index
    %248 = vector.load %arg5[%c3008, %c0_104] : memref<4096x128xbf16, #tpu.memory_space<vmem>>, vector<64x128xbf16>
    %cst_105 = arith.constant dense<0.000000e+00> : vector<2x128xf32>
    %249 = tpu.matmul %247, %248, %cst_105 {dimension_numbers = #tpu.dot_dimension_numbers<[1], [0], [0], [1], [0, 0, 1, 1], [], []>} : vector<2x64xbf16>, vector<64x128xbf16>, vector<2x128xf32> -> vector<2x128xf32>
    %250 = arith.addf %245, %249 : vector<2x128xf32>
    %251 = vector.extract_strided_slice %9 {offsets = [96, 0], sizes = [2, 64], strides = [1, 1]} : vector<128x64xf32> to vector<2x64xf32>
    %252 = arith.truncf %251 : vector<2x64xf32> to vector<2x64xbf16>
    %c3072 = arith.constant 3072 : index
    %c0_106 = arith.constant 0 : index
    %253 = vector.load %arg5[%c3072, %c0_106] : memref<4096x128xbf16, #tpu.memory_space<vmem>>, vector<64x128xbf16>
    %cst_107 = arith.constant dense<0.000000e+00> : vector<2x128xf32>
    %254 = tpu.matmul %252, %253, %cst_107 {dimension_numbers = #tpu.dot_dimension_numbers<[1], [0], [0], [1], [0, 0, 1, 1], [], []>} : vector<2x64xbf16>, vector<64x128xbf16>, vector<2x128xf32> -> vector<2x128xf32>
    %255 = arith.addf %250, %254 : vector<2x128xf32>
    %256 = vector.extract_strided_slice %9 {offsets = [98, 0], sizes = [2, 64], strides = [1, 1]} : vector<128x64xf32> to vector<2x64xf32>
    %257 = arith.truncf %256 : vector<2x64xf32> to vector<2x64xbf16>
    %c3136 = arith.constant 3136 : index
    %c0_108 = arith.constant 0 : index
    %258 = vector.load %arg5[%c3136, %c0_108] : memref<4096x128xbf16, #tpu.memory_space<vmem>>, vector<64x128xbf16>
    %cst_109 = arith.constant dense<0.000000e+00> : vector<2x128xf32>
    %259 = tpu.matmul %257, %258, %cst_109 {dimension_numbers = #tpu.dot_dimension_numbers<[1], [0], [0], [1], [0, 0, 1, 1], [], []>} : vector<2x64xbf16>, vector<64x128xbf16>, vector<2x128xf32> -> vector<2x128xf32>
    %260 = arith.addf %255, %259 : vector<2x128xf32>
    %261 = vector.extract_strided_slice %9 {offsets = [100, 0], sizes = [2, 64], strides = [1, 1]} : vector<128x64xf32> to vector<2x64xf32>
    %262 = arith.truncf %261 : vector<2x64xf32> to vector<2x64xbf16>
    %c3200 = arith.constant 3200 : index
    %c0_110 = arith.constant 0 : index
    %263 = vector.load %arg5[%c3200, %c0_110] : memref<4096x128xbf16, #tpu.memory_space<vmem>>, vector<64x128xbf16>
    %cst_111 = arith.constant dense<0.000000e+00> : vector<2x128xf32>
    %264 = tpu.matmul %262, %263, %cst_111 {dimension_numbers = #tpu.dot_dimension_numbers<[1], [0], [0], [1], [0, 0, 1, 1], [], []>} : vector<2x64xbf16>, vector<64x128xbf16>, vector<2x128xf32> -> vector<2x128xf32>
    %265 = arith.addf %260, %264 : vector<2x128xf32>
    %266 = vector.extract_strided_slice %9 {offsets = [102, 0], sizes = [2, 64], strides = [1, 1]} : vector<128x64xf32> to vector<2x64xf32>
    %267 = arith.truncf %266 : vector<2x64xf32> to vector<2x64xbf16>
    %c3264 = arith.constant 3264 : index
    %c0_112 = arith.constant 0 : index
    %268 = vector.load %arg5[%c3264, %c0_112] : memref<4096x128xbf16, #tpu.memory_space<vmem>>, vector<64x128xbf16>
    %cst_113 = arith.constant dense<0.000000e+00> : vector<2x128xf32>
    %269 = tpu.matmul %267, %268, %cst_113 {dimension_numbers = #tpu.dot_dimension_numbers<[1], [0], [0], [1], [0, 0, 1, 1], [], []>} : vector<2x64xbf16>, vector<64x128xbf16>, vector<2x128xf32> -> vector<2x128xf32>
    %270 = arith.addf %265, %269 : vector<2x128xf32>
    %271 = vector.extract_strided_slice %9 {offsets = [104, 0], sizes = [2, 64], strides = [1, 1]} : vector<128x64xf32> to vector<2x64xf32>
    %272 = arith.truncf %271 : vector<2x64xf32> to vector<2x64xbf16>
    %c3328 = arith.constant 3328 : index
    %c0_114 = arith.constant 0 : index
    %273 = vector.load %arg5[%c3328, %c0_114] : memref<4096x128xbf16, #tpu.memory_space<vmem>>, vector<64x128xbf16>
    %cst_115 = arith.constant dense<0.000000e+00> : vector<2x128xf32>
    %274 = tpu.matmul %272, %273, %cst_115 {dimension_numbers = #tpu.dot_dimension_numbers<[1], [0], [0], [1], [0, 0, 1, 1], [], []>} : vector<2x64xbf16>, vector<64x128xbf16>, vector<2x128xf32> -> vector<2x128xf32>
    %275 = arith.addf %270, %274 : vector<2x128xf32>
    %276 = vector.extract_strided_slice %9 {offsets = [106, 0], sizes = [2, 64], strides = [1, 1]} : vector<128x64xf32> to vector<2x64xf32>
    %277 = arith.truncf %276 : vector<2x64xf32> to vector<2x64xbf16>
    %c3392 = arith.constant 3392 : index
    %c0_116 = arith.constant 0 : index
    %278 = vector.load %arg5[%c3392, %c0_116] : memref<4096x128xbf16, #tpu.memory_space<vmem>>, vector<64x128xbf16>
    %cst_117 = arith.constant dense<0.000000e+00> : vector<2x128xf32>
    %279 = tpu.matmul %277, %278, %cst_117 {dimension_numbers = #tpu.dot_dimension_numbers<[1], [0], [0], [1], [0, 0, 1, 1], [], []>} : vector<2x64xbf16>, vector<64x128xbf16>, vector<2x128xf32> -> vector<2x128xf32>
    %280 = arith.addf %275, %279 : vector<2x128xf32>
    %281 = vector.extract_strided_slice %9 {offsets = [108, 0], sizes = [2, 64], strides = [1, 1]} : vector<128x64xf32> to vector<2x64xf32>
    %282 = arith.truncf %281 : vector<2x64xf32> to vector<2x64xbf16>
    %c3456 = arith.constant 3456 : index
    %c0_118 = arith.constant 0 : index
    %283 = vector.load %arg5[%c3456, %c0_118] : memref<4096x128xbf16, #tpu.memory_space<vmem>>, vector<64x128xbf16>
    %cst_119 = arith.constant dense<0.000000e+00> : vector<2x128xf32>
    %284 = tpu.matmul %282, %283, %cst_119 {dimension_numbers = #tpu.dot_dimension_numbers<[1], [0], [0], [1], [0, 0, 1, 1], [], []>} : vector<2x64xbf16>, vector<64x128xbf16>, vector<2x128xf32> -> vector<2x128xf32>
    %285 = arith.addf %280, %284 : vector<2x128xf32>
    %286 = vector.extract_strided_slice %9 {offsets = [110, 0], sizes = [2, 64], strides = [1, 1]} : vector<128x64xf32> to vector<2x64xf32>
    %287 = arith.truncf %286 : vector<2x64xf32> to vector<2x64xbf16>
    %c3520 = arith.constant 3520 : index
    %c0_120 = arith.constant 0 : index
    %288 = vector.load %arg5[%c3520, %c0_120] : memref<4096x128xbf16, #tpu.memory_space<vmem>>, vector<64x128xbf16>
    %cst_121 = arith.constant dense<0.000000e+00> : vector<2x128xf32>
    %289 = tpu.matmul %287, %288, %cst_121 {dimension_numbers = #tpu.dot_dimension_numbers<[1], [0], [0], [1], [0, 0, 1, 1], [], []>} : vector<2x64xbf16>, vector<64x128xbf16>, vector<2x128xf32> -> vector<2x128xf32>
    %290 = arith.addf %285, %289 : vector<2x128xf32>
    %291 = vector.extract_strided_slice %9 {offsets = [112, 0], sizes = [2, 64], strides = [1, 1]} : vector<128x64xf32> to vector<2x64xf32>
    %292 = arith.truncf %291 : vector<2x64xf32> to vector<2x64xbf16>
    %c3584 = arith.constant 3584 : index
    %c0_122 = arith.constant 0 : index
    %293 = vector.load %arg5[%c3584, %c0_122] : memref<4096x128xbf16, #tpu.memory_space<vmem>>, vector<64x128xbf16>
    %cst_123 = arith.constant dense<0.000000e+00> : vector<2x128xf32>
    %294 = tpu.matmul %292, %293, %cst_123 {dimension_numbers = #tpu.dot_dimension_numbers<[1], [0], [0], [1], [0, 0, 1, 1], [], []>} : vector<2x64xbf16>, vector<64x128xbf16>, vector<2x128xf32> -> vector<2x128xf32>
    %295 = arith.addf %290, %294 : vector<2x128xf32>
    %296 = vector.extract_strided_slice %9 {offsets = [114, 0], sizes = [2, 64], strides = [1, 1]} : vector<128x64xf32> to vector<2x64xf32>
    %297 = arith.truncf %296 : vector<2x64xf32> to vector<2x64xbf16>
    %c3648 = arith.constant 3648 : index
    %c0_124 = arith.constant 0 : index
    %298 = vector.load %arg5[%c3648, %c0_124] : memref<4096x128xbf16, #tpu.memory_space<vmem>>, vector<64x128xbf16>
    %cst_125 = arith.constant dense<0.000000e+00> : vector<2x128xf32>
    %299 = tpu.matmul %297, %298, %cst_125 {dimension_numbers = #tpu.dot_dimension_numbers<[1], [0], [0], [1], [0, 0, 1, 1], [], []>} : vector<2x64xbf16>, vector<64x128xbf16>, vector<2x128xf32> -> vector<2x128xf32>
    %300 = arith.addf %295, %299 : vector<2x128xf32>
    %301 = vector.extract_strided_slice %9 {offsets = [116, 0], sizes = [2, 64], strides = [1, 1]} : vector<128x64xf32> to vector<2x64xf32>
    %302 = arith.truncf %301 : vector<2x64xf32> to vector<2x64xbf16>
    %c3712 = arith.constant 3712 : index
    %c0_126 = arith.constant 0 : index
    %303 = vector.load %arg5[%c3712, %c0_126] : memref<4096x128xbf16, #tpu.memory_space<vmem>>, vector<64x128xbf16>
    %cst_127 = arith.constant dense<0.000000e+00> : vector<2x128xf32>
    %304 = tpu.matmul %302, %303, %cst_127 {dimension_numbers = #tpu.dot_dimension_numbers<[1], [0], [0], [1], [0, 0, 1, 1], [], []>} : vector<2x64xbf16>, vector<64x128xbf16>, vector<2x128xf32> -> vector<2x128xf32>
    %305 = arith.addf %300, %304 : vector<2x128xf32>
    %306 = vector.extract_strided_slice %9 {offsets = [118, 0], sizes = [2, 64], strides = [1, 1]} : vector<128x64xf32> to vector<2x64xf32>
    %307 = arith.truncf %306 : vector<2x64xf32> to vector<2x64xbf16>
    %c3776 = arith.constant 3776 : index
    %c0_128 = arith.constant 0 : index
    %308 = vector.load %arg5[%c3776, %c0_128] : memref<4096x128xbf16, #tpu.memory_space<vmem>>, vector<64x128xbf16>
    %cst_129 = arith.constant dense<0.000000e+00> : vector<2x128xf32>
    %309 = tpu.matmul %307, %308, %cst_129 {dimension_numbers = #tpu.dot_dimension_numbers<[1], [0], [0], [1], [0, 0, 1, 1], [], []>} : vector<2x64xbf16>, vector<64x128xbf16>, vector<2x128xf32> -> vector<2x128xf32>
    %310 = arith.addf %305, %309 : vector<2x128xf32>
    %311 = vector.extract_strided_slice %9 {offsets = [120, 0], sizes = [2, 64], strides = [1, 1]} : vector<128x64xf32> to vector<2x64xf32>
    %312 = arith.truncf %311 : vector<2x64xf32> to vector<2x64xbf16>
    %c3840 = arith.constant 3840 : index
    %c0_130 = arith.constant 0 : index
    %313 = vector.load %arg5[%c3840, %c0_130] : memref<4096x128xbf16, #tpu.memory_space<vmem>>, vector<64x128xbf16>
    %cst_131 = arith.constant dense<0.000000e+00> : vector<2x128xf32>
    %314 = tpu.matmul %312, %313, %cst_131 {dimension_numbers = #tpu.dot_dimension_numbers<[1], [0], [0], [1], [0, 0, 1, 1], [], []>} : vector<2x64xbf16>, vector<64x128xbf16>, vector<2x128xf32> -> vector<2x128xf32>
    %315 = arith.addf %310, %314 : vector<2x128xf32>
    %316 = vector.extract_strided_slice %9 {offsets = [122, 0], sizes = [2, 64], strides = [1, 1]} : vector<128x64xf32> to vector<2x64xf32>
    %317 = arith.truncf %316 : vector<2x64xf32> to vector<2x64xbf16>
    %c3904 = arith.constant 3904 : index
    %c0_132 = arith.constant 0 : index
    %318 = vector.load %arg5[%c3904, %c0_132] : memref<4096x128xbf16, #tpu.memory_space<vmem>>, vector<64x128xbf16>
    %cst_133 = arith.constant dense<0.000000e+00> : vector<2x128xf32>
    %319 = tpu.matmul %317, %318, %cst_133 {dimension_numbers = #tpu.dot_dimension_numbers<[1], [0], [0], [1], [0, 0, 1, 1], [], []>} : vector<2x64xbf16>, vector<64x128xbf16>, vector<2x128xf32> -> vector<2x128xf32>
    %320 = arith.addf %315, %319 : vector<2x128xf32>
    %321 = vector.extract_strided_slice %9 {offsets = [124, 0], sizes = [2, 64], strides = [1, 1]} : vector<128x64xf32> to vector<2x64xf32>
    %322 = arith.truncf %321 : vector<2x64xf32> to vector<2x64xbf16>
    %c3968 = arith.constant 3968 : index
    %c0_134 = arith.constant 0 : index
    %323 = vector.load %arg5[%c3968, %c0_134] : memref<4096x128xbf16, #tpu.memory_space<vmem>>, vector<64x128xbf16>
    %cst_135 = arith.constant dense<0.000000e+00> : vector<2x128xf32>
    %324 = tpu.matmul %322, %323, %cst_135 {dimension_numbers = #tpu.dot_dimension_numbers<[1], [0], [0], [1], [0, 0, 1, 1], [], []>} : vector<2x64xbf16>, vector<64x128xbf16>, vector<2x128xf32> -> vector<2x128xf32>
    %325 = arith.addf %320, %324 : vector<2x128xf32>
    %326 = vector.extract_strided_slice %9 {offsets = [126, 0], sizes = [2, 64], strides = [1, 1]} : vector<128x64xf32> to vector<2x64xf32>
    %327 = arith.truncf %326 : vector<2x64xf32> to vector<2x64xbf16>
    %c4032 = arith.constant 4032 : index
    %c0_136 = arith.constant 0 : index
    %328 = vector.load %arg5[%c4032, %c0_136] : memref<4096x128xbf16, #tpu.memory_space<vmem>>, vector<64x128xbf16>
    %cst_137 = arith.constant dense<0.000000e+00> : vector<2x128xf32>
    %329 = tpu.matmul %327, %328, %cst_137 {dimension_numbers = #tpu.dot_dimension_numbers<[1], [0], [0], [1], [0, 0, 1, 1], [], []>} : vector<2x64xbf16>, vector<64x128xbf16>, vector<2x128xf32> -> vector<2x128xf32>
    %330 = arith.addf %325, %329 : vector<2x128xf32>
    %c0_138 = arith.constant 0 : index
    %c0_139 = arith.constant 0 : index
    %331 = vector.load %arg6[%c0_138, %c0_139] : memref<1x128xf32, #tpu.memory_space<vmem>>, vector<1x128xf32>
    %332 = vector.broadcast %331 : vector<1x128xf32> to vector<2x128xf32>
    %333 = arith.addf %330, %332 : vector<2x128xf32>
    %cst_140 = arith.constant 0.000000e+00 : f32
    %334 = vector.broadcast %cst_140 : f32 to vector<2x128xf32>
    %335 = arith.cmpf oge, %333, %334 : vector<2x128xf32>
    %cst_141 = arith.constant 0.00999999977 : f32
    %336 = vector.broadcast %cst_141 : f32 to vector<2x128xf32>
    %337 = arith.mulf %336, %333 : vector<2x128xf32>
    %338 = arith.select %335, %333, %337 : vector<2x128xi1>, vector<2x128xf32>
    %c0_142 = arith.constant 0 : index
    %c0_143 = arith.constant 0 : index
    %339 = vector.load %arg7[%c0_142, %c0_143] : memref<128x10xf32, #tpu.memory_space<vmem>>, vector<128x10xf32>
    %cst_144 = arith.constant dense<0.000000e+00> : vector<2x10xf32>
    %340 = tpu.matmul %338, %339, %cst_144 {dimension_numbers = #tpu.dot_dimension_numbers<[1], [0], [0], [1], [0, 0, 1, 1], [], []>} : vector<2x128xf32>, vector<128x10xf32>, vector<2x10xf32> -> vector<2x10xf32>
    %c0_145 = arith.constant 0 : index
    %c0_146 = arith.constant 0 : index
    %341 = vector.load %arg8[%c0_145, %c0_146] : memref<1x10xf32, #tpu.memory_space<vmem>>, vector<1x10xf32>
    %342 = vector.broadcast %341 : vector<1x10xf32> to vector<2x10xf32>
    %343 = arith.addf %340, %342 : vector<2x10xf32>
    %cst_147 = arith.constant dense<0xFF800000> : vector<2xf32>
    %344 = vector.multi_reduction <maximumf>, %343, %cst_147 [1] : vector<2x10xf32> to vector<2xf32>
    %345 = vector.shape_cast %344 : vector<2xf32> to vector<2x1xf32>
    %346 = vector.broadcast %345 : vector<2x1xf32> to vector<2x10xf32>
    %347 = arith.subf %343, %346 : vector<2x10xf32>
    %348 = math.exp %347 : vector<2x10xf32>
    %cst_148 = arith.constant dense<0.000000e+00> : vector<2xf32>
    %349 = vector.multi_reduction <add>, %348, %cst_148 [1] : vector<2x10xf32> to vector<2xf32>
    %350 = vector.shape_cast %349 : vector<2xf32> to vector<2x1xf32>
    %351 = math.log %350 : vector<2x1xf32>
    %352 = arith.addf %345, %351 : vector<2x1xf32>
    %353 = tpu.iota {dimensions = array<i32: 0>} : vector<2x10xi32>
    %354 = tpu.iota {dimensions = array<i32: 1>} : vector<2x10xi32>
    %c0_i32 = arith.constant 0 : i32
    %355 = vector.broadcast %c0_i32 : i32 to vector<2x10xi32>
    %c0_i32_149 = arith.constant 0 : i32
    %356 = vector.broadcast %c0_i32_149 : i32 to vector<2x10xi32>
    %357 = arith.cmpi eq, %353, %356 : vector<2x10xi32>
    %c0_150 = arith.constant 0 : index
    %358 = memref.load %arg1[%c0_150] : memref<2xi32, #tpu.memory_space<smem>>
    %359 = vector.broadcast %358 : i32 to vector<2x10xi32>
    %360 = arith.select %357, %359, %355 : vector<2x10xi1>, vector<2x10xi32>
    %c1_i32 = arith.constant 1 : i32
    %361 = vector.broadcast %c1_i32 : i32 to vector<2x10xi32>
    %362 = arith.cmpi eq, %353, %361 : vector<2x10xi32>
    %c1 = arith.constant 1 : index
    %363 = memref.load %arg1[%c1] : memref<2xi32, #tpu.memory_space<smem>>
    %364 = vector.broadcast %363 : i32 to vector<2x10xi32>
    %365 = arith.select %362, %364, %360 : vector<2x10xi1>, vector<2x10xi32>
    %366 = arith.cmpi eq, %354, %365 : vector<2x10xi32>
    %cst_151 = arith.constant 0.000000e+00 : f32
    %367 = vector.broadcast %cst_151 : f32 to vector<2x10xf32>
    %368 = arith.select %366, %343, %367 : vector<2x10xi1>, vector<2x10xf32>
    %cst_152 = arith.constant dense<0.000000e+00> : vector<2xf32>
    %369 = vector.multi_reduction <add>, %368, %cst_152 [1] : vector<2x10xf32> to vector<2xf32>
    %370 = vector.shape_cast %369 : vector<2xf32> to vector<2x1xf32>
    %371 = arith.subf %352, %370 : vector<2x1xf32>
    %cst_153 = arith.constant dense<0.000000e+00> : vector<1xf32>
    %372 = vector.multi_reduction <add>, %371, %cst_153 [0] : vector<2x1xf32> to vector<1xf32>
    %373 = vector.shape_cast %372 : vector<1xf32> to vector<1x1xf32>
    %cst_154 = arith.constant 5.000000e-01 : f32
    %374 = vector.broadcast %cst_154 : f32 to vector<1x1xf32>
    %375 = arith.mulf %373, %374 : vector<1x1xf32>
    %c0_155 = arith.constant 0 : index
    %c0_156 = arith.constant 0 : index
    %376 = vector.load %arg9[%c0_155, %c0_156] : memref<1x1xf32, #tpu.memory_space<vmem>>, vector<1x1xf32>
    tpu.vector_store %arg9[%c0_155, %c0_156], %375 {strides = array<i32>} : memref<1x1xf32, #tpu.memory_space<vmem>>, vector<1x1xf32>,
    return
  }
  func.func @transform_0(%arg0: i32, %arg1: memref<2xi32, #tpu.memory_space<smem>>) -> (i32, i32) {
    %c0_i32 = arith.constant 0 : i32
    %c0_i32_0 = arith.constant 0 : i32
    %c0_i32_1 = arith.constant 0 : i32
    return %c0_i32, %c0_i32_0 : i32, i32
  }
  func.func @transform_1(%arg0: i32, %arg1: memref<2xi32, #tpu.memory_space<smem>>) -> (i32, i32) {
    %c0_i32 = arith.constant 0 : i32
    %c0_i32_0 = arith.constant 0 : i32
    %c0_i32_1 = arith.constant 0 : i32
    return %c0_i32, %c0_i32_0 : i32, i32
  }
  func.func @transform_2(%arg0: i32, %arg1: memref<2xi32, #tpu.memory_space<smem>>) -> (i32, i32) {
    %c0_i32 = arith.constant 0 : i32
    %c0_i32_0 = arith.constant 0 : i32
    %c0_i32_1 = arith.constant 0 : i32
    return %c0_i32, %c0_i32_0 : i32, i32
  }
  func.func @transform_3(%arg0: i32, %arg1: memref<2xi32, #tpu.memory_space<smem>>) -> (i32, i32) {
    %c0_i32 = arith.constant 0 : i32
    %c0_i32_0 = arith.constant 0 : i32
    %c0_i32_1 = arith.constant 0 : i32
    return %c0_i32, %c0_i32_0 : i32, i32
  }
  func.func @transform_4(%arg0: i32, %arg1: memref<2xi32, #tpu.memory_space<smem>>) -> (i32, i32) {
    %c0_i32 = arith.constant 0 : i32
    %c0_i32_0 = arith.constant 0 : i32
    %c0_i32_1 = arith.constant 0 : i32
    return %c0_i32, %c0_i32_0 : i32, i32
  }
  func.func @transform_5(%arg0: i32, %arg1: memref<2xi32, #tpu.memory_space<smem>>) -> (i32, i32) {
    %c0_i32 = arith.constant 0 : i32
    %c0_i32_0 = arith.constant 0 : i32
    %c0_i32_1 = arith.constant 0 : i32
    return %c0_i32, %c0_i32_0 : i32, i32
  }
  func.func @transform_6(%arg0: i32, %arg1: memref<2xi32, #tpu.memory_space<smem>>) -> (i32, i32) {
    %c0_i32 = arith.constant 0 : i32
    %c0_i32_0 = arith.constant 0 : i32
    %c0_i32_1 = arith.constant 0 : i32
    return %c0_i32, %c0_i32_0 : i32, i32
  }
  func.func @transform_7(%arg0: i32, %arg1: memref<2xi32, #tpu.memory_space<smem>>) -> (i32, i32) {
    %c0_i32 = arith.constant 0 : i32
    %c0_i32_0 = arith.constant 0 : i32
    %c0_i32_1 = arith.constant 0 : i32
    return %c0_i32, %c0_i32_0 : i32, i32
  }
}

</mosaic_0001>

<bundles_post_ra>
// kernel: lenet3d_forward.1
= control target key start
LH: loop header
LB: loop body
LE: loop exit
PB: predicated region body
PF: predicated region fallthrough
CT: control target
= control target key end

     0   :  { %s9354_s0 = inlined_call_operand.vmem [shape: s32[2], index: 0, kind: input, shape index: {}]   ;;  %s9355_s1 = inlined_call_operand.vmem [shape: bf16[128,192], index: 1, kind: input, shape index: {}]   ;;  %s9356_s2 = inlined_call_operand.vmem [shape: bf16[192,256], index: 2, kind: input, shape index: {}]   ;;  %s9357_s3 = inlined_call_operand.vmem [shape: bf16[256,64], index: 3, kind: input, shape index: {}]   ;;  %s9358_s4 = inlined_call_operand.vmem [shape: bf16[4096,128], index: 4, kind: input, shape index: {}]   ;;  %s9359_s5 = inlined_call_operand.vmem [shape: f32[1,128], index: 5, kind: input, shape index: {}]   ;;  %s9360_s6 = inlined_call_operand.vmem [shape: f32[128,10], index: 6, kind: input, shape index: {}]   ;;  %s9361_s7 = inlined_call_operand.vmem [shape: f32[1,10], index: 7, kind: input, shape index: {}]   ;;  %s9362_s8 = inlined_call_operand.hbm [shape: f32[1,1], index: 8, kind: output, shape index: {}]  }
   0x1   :  { %s13_s29 = sshll.u32 %s9354_s0, 4  ;;  %s14_s29 = int_to_ptr.vmem [resolvable:$true] %s13_s29 }
   0x2   :  { %s7752_s30 = scalar_lea.vmem %s14_s29, 16  ;;  %p7757_p1 = scmp.lt.s32.totalorder %s14_s29, %s14_s29 }
   0x3   :  { %p7753_p0 = scmp.ne.s32.totalorder %s14_s29, %s7752_s30  ;;  %p7758_p2 = scmp.lt.s32.totalorder %s7752_s30, %s7752_s30 }
   0x5   :  { %p7759_p3 = por %p7758_p2, %p7757_p1 }
   0x7   :  { %p7760_p4 = pnand %p7759_p3, %p7753_p0 }
   0x9   :  { %7763 = shalt.err (!%p7760_p4)  }
   0xa   :  { %s7790_s9 = smov [#allocation3]  }
   0xb   :  { %16 = dma.vmem_to_smem %s14_s29, 16, %s7790_s9, [#allocation2] }
   0xc   :  { %7786 = dma.done.wait [#allocation2], 16 }
   0xd   :  { %7787 = vsyncadd [#allocation2], 4294967280 }
   0xe   :  { %18 = sfence }
   0xf   :  { %v7416_v0 = vld [vmem:[%s9356_s2 + $0x4] ss:$8 sps:$4 sm:$0xff]   ;;  %v7418_v1 = vld [vmem:[%s9356_s2] ss:$8 sps:$4 sm:$0xff]   ;;  %v7419_v2 = vld [vmem:[%s9356_s2 + $0x14] ss:$8 sps:$4 sm:$0xff]  }
  0x10   :  { %292 = vmatprep.subr.bf16.mxu0 %v7416_v0  ;;  %v7421_v3 = vld [vmem:[%s9356_s2 + $0x10] ss:$8 sps:$4 sm:$0xff]   ;;  %v7422_v4 = vld [vmem:[%s9356_s2 + $0x24] ss:$8 sps:$4 sm:$0xff]   ;;  %v7424_v5 = vld [vmem:[%s9356_s2 + $0x20] ss:$8 sps:$4 sm:$0xff]  }
  0x11   :  { %293 = vmatpush1.bf16.msra.mxu0 %v7418_v1  ;;  %v7425_v6 = vld [vmem:[%s9356_s2 + $0x34] ss:$8 sps:$4 sm:$0xff]   ;;  %v7427_v7 = vld [vmem:[%s9356_s2 + $0x30] ss:$8 sps:$4 sm:$0xff]   ;;  %v7428_v8 = vld [vmem:[%s9356_s2 + $0x44] ss:$8 sps:$4 sm:$0xff]  }
  0x12   :  { %294 = vmatprep.subr.bf16.mxu0 %v7419_v2  ;;  %v7430_v9 = vld [vmem:[%s9356_s2 + $0x40] ss:$8 sps:$4 sm:$0xff]   ;;  %v7431_v10 = vld [vmem:[%s9356_s2 + $0x54] ss:$8 sps:$4 sm:$0xff]   ;;  %vm267_vm0 = vcmask 523264   ;;  %v7791_v57 = vmov 0.0  }
  0x13   :  { %v7454_v11 = vld [vmem:[%s9355_s1 + $0x4] ss:$8 sps:$4 sm:$0xff]   ;;  %v7433_v12 = vld [vmem:[%s9356_s2 + $0x50] ss:$8 sps:$4 sm:$0xff]   ;;  %v7436_v14 = vld [vmem:[%s9356_s2 + $0x60] ss:$8 sps:$4 sm:$0xff]  }
  0x14   :  { %5836 = vmatprep.mubr.msk.bf16.mxu0 %vm267_vm0, %v7454_v11  ;;  %v7434_v13 = vld [vmem:[%s9356_s2 + $0x64] ss:$8 sps:$4 sm:$0xff]   ;;  %v7437_v16 = vld [vmem:[%s9356_s2 + $0x74] ss:$8 sps:$4 sm:$0xff]   ;;  %v7439_v17 = vld [vmem:[%s9356_s2 + $0x70] ss:$8 sps:$4 sm:$0xff]  }
  0x15   :  { %295 = vmatpush1.bf16.msra.mxu0 %v7421_v3  ;;  %v7467_v15 = vld [vmem:[%s9357_s3 + $0x40] sm:$0xff]   ;;  %v7472_v20 = vld [vmem:[%s9357_s3 + $0x48] sm:$0xff]   ;;  %v7474_v22 = vld [vmem:[%s9357_s3 + $0x50] sm:$0xff]  }
  0x16   :  { %296 = vmatprep.subr.bf16.mxu0 %v7422_v4  ;;  %6183 = vmatprep.subr.bf16.mxu1 %v7467_v15  ;;  %v7470_v18 = vld [vmem:[%s9357_s3] sm:$0xff]   ;;  %v7473_v21 = vld [vmem:[%s9357_s3 + $0x8] sm:$0xff]   ;;  %v7443_v24 = vld [vmem:[%s9356_s2 + $0x94] ss:$8 sps:$4 sm:$0xff]  }
  0x17   :  { %v7440_v19 = vld [vmem:[%s9356_s2 + $0x84] ss:$8 sps:$4 sm:$0xff]   ;;  %6184 = vmatpush3.bf16.msra.mxu1 %v7470_v18  ;;  %v7442_v23 = vld [vmem:[%s9356_s2 + $0x80] ss:$8 sps:$4 sm:$0xff]   ;;  %v7477_v25 = vld [vmem:[%s9357_s3 + $0x10] sm:$0xff]  }
  0x18   :  { %6185 = vmatprep.subr.bf16.mxu1 %v7472_v20  ;;  %v7479_v26 = vld [vmem:[%s9357_s3 + $0x58] sm:$0xff]   ;;  %v7446_v29 = vld [vmem:[%s9356_s2 + $0xa4] ss:$8 sps:$4 sm:$0xff]   ;;  %v7448_v31 = vld [vmem:[%s9356_s2 + $0xa0] ss:$8 sps:$4 sm:$0xff]  }
  0x19   :  { %297 = vmatpush1.bf16.msra.mxu0 %v7424_v5  ;;  %v7445_v27 = vld [vmem:[%s9356_s2 + $0x90] ss:$8 sps:$4 sm:$0xff]   ;;  %v7481_v30 = vld [vmem:[%s9357_s3 + $0x60] sm:$0xff]   ;;  %v7449_v33 = vld [vmem:[%s9356_s2 + $0xb4] ss:$8 sps:$4 sm:$0xff]  }
  0x1a   :  { %298 = vmatprep.subr.bf16.mxu0 %v7425_v6  ;;  %v7480_v28 = vld [vmem:[%s9357_s3 + $0x18] sm:$0xff]   ;;  %v7484_v32 = vld [vmem:[%s9357_s3 + $0x20] sm:$0xff]   ;;  %v7486_v34 = vld [vmem:[%s9357_s3 + $0x68] sm:$0xff]  }
  0x1b   :  { %6186 = vmatpush3.bf16.msra.mxu1 %v7473_v21  ;;  %v7451_v35 = vld [vmem:[%s9356_s2 + $0xb0] ss:$8 sps:$4 sm:$0xff]   ;;  %v7487_v36 = vld [vmem:[%s9357_s3 + $0x28] sm:$0xff]   ;;  %v7455_v38 = vld [vmem:[%s9355_s1 + $0x14] ss:$8 sps:$4 sm:$0xff]  }
  0x1c   :  { %6187 = vmatprep.subr.bf16.mxu1 %v7474_v22  ;;  %v7452_v37 = vld [vmem:[%s9355_s1] ss:$8 sps:$4 sm:$0xff]   ;;  %v7457_v39 = vld [vmem:[%s9355_s1 + $0x10] ss:$8 sps:$4 sm:$0xff]   ;;  %v7458_v40 = vld [vmem:[%s9355_s1 + $0x24] ss:$8 sps:$4 sm:$0xff]  }
  0x1d   :  { %299 = vmatpush1.bf16.msra.mxu0 %v7427_v7  ;;  %v7460_v41 = vld [vmem:[%s9355_s1 + $0x20] ss:$8 sps:$4 sm:$0xff]   ;;  %v7461_v42 = vld [vmem:[%s9355_s1 + $0x34] ss:$8 sps:$4 sm:$0xff]   ;;  %v7463_v43 = vld [vmem:[%s9355_s1 + $0x30] ss:$8 sps:$4 sm:$0xff]  }
  0x1e   :  { %300 = vmatprep.subr.bf16.mxu0 %v7428_v8  ;;  %v7464_v44 = vld [vmem:[%s9355_s1 + $0x44] ss:$8 sps:$4 sm:$0xff]   ;;  %v7466_v45 = vld [vmem:[%s9355_s1 + $0x40] ss:$8 sps:$4 sm:$0xff]   ;;  %v7468_v46 = vld [vmem:[%s9355_s1 + $0x54] ss:$8 sps:$4 sm:$0xff]  }
  0x1f   :  { %6188 = vmatpush3.bf16.msra.mxu1 %v7477_v25  ;;  %v7471_v47 = vld [vmem:[%s9355_s1 + $0x50] ss:$8 sps:$4 sm:$0xff]   ;;  %v7475_v48 = vld [vmem:[%s9355_s1 + $0x64] ss:$8 sps:$4 sm:$0xff]   ;;  %v7478_v49 = vld [vmem:[%s9355_s1 + $0x60] ss:$8 sps:$4 sm:$0xff]  }
  0x20   :  { %6189 = vmatprep.subr.bf16.mxu1 %v7479_v26  ;;  %v7482_v50 = vld [vmem:[%s9355_s1 + $0x74] ss:$8 sps:$4 sm:$0xff]   ;;  %v7485_v51 = vld [vmem:[%s9355_s1 + $0x70] ss:$8 sps:$4 sm:$0xff]   ;;  %v7493_v56 = vld [vmem:[%s9358_s4] sm:$0xff]  }
  0x21   :  { %301 = vmatpush1.bf16.msra.mxu0 %v7430_v9  ;;  %v7488_v52 = vld [vmem:[%s9357_s3 + $0x70] sm:$0xff]   ;;  %v7490_v54 = vld [vmem:[%s9357_s3 + $0x78] sm:$0xff]   ;;  %v7495_v58 = vld [vmem:[%s9358_s4 + $0x8] sm:$0xff]  }
  0x22   :  { %302 = vmatprep.subr.bf16.mxu0 %v7431_v10  ;;  %v7489_v53 = vld [vmem:[%s9357_s3 + $0x30] sm:$0xff]   ;;  %v7491_v55 = vld [vmem:[%s9357_s3 + $0x38] sm:$0xff]  }
  0x23   :  { %6190 = vmatpush3.bf16.msra.mxu1 %v7480_v28  ;;  %v7497_v59 = vld [vmem:[%s9358_s4 + $0x10] sm:$0xff]   ;;  %v7499_v60 = vld [vmem:[%s9358_s4 + $0x18] sm:$0xff]  }
  0x24   :  { %6191 = vmatprep.subr.bf16.mxu1 %v7481_v30 }
  0x25   :  { %303 = vmatpush1.bf16.msra.mxu0 %v7433_v12 }
  0x26   :  { %304 = vmatprep.subr.bf16.mxu0 %v7434_v13 }
  0x27   :  { %6192 = vmatpush3.bf16.msra.mxu1 %v7484_v32 }
  0x28   :  { %6193 = vmatprep.subr.bf16.mxu1 %v7486_v34 }
  0x29   :  { %305 = vmatpush1.bf16.msra.mxu0 %v7436_v14 }
  0x2a   :  { %306 = vmatprep.subr.bf16.mxu0 %v7437_v16 }
  0x2b   :  { %6194 = vmatpush3.bf16.msra.mxu1 %v7487_v36 }
  0x2c   :  { %6195 = vmatprep.subr.bf16.mxu1 %v7488_v52 }
  0x2d   :  { %307 = vmatpush1.bf16.msra.mxu0 %v7439_v17 }
  0x2e   :  { %308 = vmatprep.subr.bf16.mxu0 %v7440_v19 }
  0x2f   :  { %6196 = vmatpush3.bf16.msra.mxu1 %v7489_v53 }
  0x30   :  { %6197 = vmatprep.subr.bf16.mxu1 %v7490_v54 }
  0x31   :  { %309 = vmatpush1.bf16.msra.mxu0 %v7442_v23 }
  0x32   :  { %310 = vmatprep.subr.bf16.mxu0 %v7443_v24 }
  0x33   :  { %6198 = vmatpush3.bf16.msra.mxu1 %v7491_v55 }
  0x34   :  { %6584 = vmatprep.subr.bf16.mxu1 %v7791_v57 }
  0x35   :  { %311 = vmatpush1.bf16.msra.mxu0 %v7445_v27 }
  0x36   :  { %312 = vmatprep.subr.bf16.mxu0 %v7446_v29 }
  0x39   :  { %313 = vmatpush1.bf16.msra.mxu0 %v7448_v31 }
  0x3a   :  { %314 = vmatprep.subr.bf16.mxu0 %v7449_v33 }
  0x3d   :  { %315 = vmatpush1.bf16.msra.mxu0 %v7451_v35 }
  0x3e   :  { %6596 = vmatprep.subr.bf16.mxu0 %v7791_v57 }
  0x40   :  { %325 = vmatmul.mubr.bf16.vlgmr.msra.gmra.mrb[0].mxu0 %v7452_v37 }
  0x41   :  { %5837 = vmatprep.mubr.msk.bf16.mxu0 %vm267_vm0, %v7455_v38  ;;  %6597 = vmatpush3.bf16.msra.mxu0 %v7493_v56 }
  0x42   :  { %6598 = vmatprep.subr.bf16.mxu0 %v7791_v57 }
  0x45   :  { %6599 = vmatpush3.bf16.msra.mxu0 %v7495_v58 }
  0x46   :  { %6600 = vmatprep.subr.bf16.mxu0 %v7791_v57 }
  0x48   :  { %335 = vmatmul.mubr.bf16.gmra.mrb[4].mxu0 %v7457_v39 }
  0x49   :  { %5838 = vmatprep.mubr.msk.bf16.mxu0 %vm267_vm0, %v7458_v40  ;;  %6601 = vmatpush3.bf16.msra.mxu0 %v7497_v59 }
  0x4a   :  { %6602 = vmatprep.subr.bf16.mxu0 %v7791_v57 }
  0x4d   :  { %6603 = vmatpush3.bf16.msra.mxu0 %v7499_v60 }
  0x4e   :  { %6620 = vmatprep.subr.bf16.mxu0 %v7791_v57 }
  0x50   :  { %345 = vmatmul.mubr.bf16.gmra.mrb[8].mxu0 %v7460_v41 }
  0x51   :  { %5839 = vmatprep.mubr.msk.bf16.mxu0 %vm267_vm0, %v7461_v42 }
  0x58   :  { %355 = vmatmul.mubr.bf16.gmra.mrb[12].mxu0 %v7463_v43 }
  0x59   :  { %5840 = vmatprep.mubr.msk.bf16.mxu0 %vm267_vm0, %v7464_v44 }
  0x60   :  { %365 = vmatmul.mubr.bf16.gmra.mrb[16].mxu0 %v7466_v45 }
  0x61   :  { %5841 = vmatprep.mubr.msk.bf16.mxu0 %vm267_vm0, %v7468_v46 }
  0x68   :  { %375 = vmatmul.mubr.bf16.gmra.mrb[20].mxu0 %v7471_v47 }
  0x69   :  { %5842 = vmatprep.mubr.msk.bf16.mxu0 %vm267_vm0, %v7475_v48 }
  0x70   :  { %385 = vmatmul.mubr.bf16.gmra.mrb[24].mxu0 %v7478_v49 }
  0x71   :  { %5843 = vmatprep.mubr.msk.bf16.mxu0 %vm267_vm0, %v7482_v50 }
  0x78   :  { %395 = vmatmul.mubr.bf16.gmra.mrb[28].mxu0 %v7485_v51 }
  0x79   :  { %19 = vsyncpa [#allocation5], 0  ;;  %v7492_v7 = vld [vmem:[%s9358_s4 + $0x20] sm:$0xff]   ;;  %v7494_v13 = vld [vmem:[%s9358_s4 + $0x28] sm:$0xff]   ;;  %vm7792_vm1 = vmmov 0   ;;  %s5758_s24 = sld [smem:[#allocation3]] }
  0x7a   :  { %v7496_v19 = vld [vmem:[%s9358_s4 + $0x30] sm:$0xff]   ;;  %v7498_v25 = vld [vmem:[%s9358_s4 + $0x38] sm:$0xff]   ;;  %6604 = vmatprep.mubr.msk.bf16.mxu0 %vm7792_vm1, %v7791_v57  ;;  %s6182_s25 = sld [smem:[#allocation3 + $0x1]]  ;;  %vm5740_vm5 = vcmask 74752   ;;  %vm5771_vm7 = vcmask 1041408   ;;  %vm5780_vm8 = vcmask 0  }
 0x113   :  { %v326_v61 = vpop.f32.mrb[0].mxu0 }
 0x114   :  { %v328_v62 = vpop.f32.mrb[1].mxu0  ;;  %v405_v0 = vmax.f32 %v326_v61, 0.0 }
 0x115   :  { %v330_v63 = vpop.f32.mrb[2].mxu0  ;;  %v406_v3 = vmax.f32 %v328_v62, 0.0 }
 0x116   :  { %v407_v1 = vmax.f32 %v330_v63, 0.0  ;;  %v332_v2 = vpop.f32.mrb[3].mxu0 }
 0x117   :  { %v408_v4 = vmax.f32 %v332_v2, 0.0 }
 0x118   :  { %v437_v5 = vpack.c.bf16 %v407_v1, %v405_v0 }
 0x119   :  { %v438_v6 = vpack.c.bf16 %v408_v4, %v406_v3 }
 0x11b   :  { %613 = vmatprep.mubr.bf16.mxu1 %v438_v6  ;;  %v336_v8 = vpop.f32.mrb[4].mxu0 }
 0x11c   :  { %614 = vmatmul.mubr.bf16.vlgmr.msra.gmra.mrb[0].mxu1 %v437_v5  ;;  %v409_v9 = vmax.f32 %v336_v8, 0.0  ;;  %v338_v10 = vpop.f32.mrb[5].mxu0 }
 0x11d   :  { %v410_v11 = vmax.f32 %v338_v10, 0.0  ;;  %v340_v12 = vpop.f32.mrb[6].mxu0  ;;  %6585 = vmatpush3.bf16.msra.mxu1 %v7492_v7 }
 0x11e   :  { %v411_v14 = vmax.f32 %v340_v12, 0.0  ;;  %v342_v15 = vpop.f32.mrb[7].mxu0  ;;  %6586 = vmatprep.subr.bf16.mxu1 %v7791_v57 }
 0x11f   :  { %v412_v16 = vmax.f32 %v342_v15, 0.0 }
 0x120   :  { %v439_v17 = vpack.c.bf16 %v411_v14, %v409_v9 }
 0x121   :  { %v440_v18 = vpack.c.bf16 %v412_v16, %v410_v11  ;;  %6587 = vmatpush3.bf16.msra.mxu1 %v7494_v13 }
 0x122   :  { %6588 = vmatprep.subr.bf16.mxu1 %v7791_v57 }
 0x123   :  { %621 = vmatprep.mubr.bf16.mxu1 %v440_v18  ;;  %v346_v20 = vpop.f32.mrb[8].mxu0 }
 0x124   :  { %622 = vmatmul.mubr.bf16.gmra.mrb[4].mxu1 %v439_v17  ;;  %v413_v21 = vmax.f32 %v346_v20, 0.0  ;;  %v348_v22 = vpop.f32.mrb[9].mxu0 }
 0x125   :  { %v414_v23 = vmax.f32 %v348_v22, 0.0  ;;  %v350_v24 = vpop.f32.mrb[10].mxu0  ;;  %6589 = vmatpush3.bf16.msra.mxu1 %v7496_v19 }
 0x126   :  { %v415_v26 = vmax.f32 %v350_v24, 0.0  ;;  %v352_v27 = vpop.f32.mrb[11].mxu0  ;;  %6590 = vmatprep.subr.bf16.mxu1 %v7791_v57 }
 0x127   :  { %v416_v28 = vmax.f32 %v352_v27, 0.0  ;;  %v7501_v27 = vld [vmem:[%s9358_s4 + $0x40] sm:$0xff]  }
 0x128   :  { %v441_v29 = vpack.c.bf16 %v415_v26, %v413_v21 }
 0x129   :  { %v442_v30 = vpack.c.bf16 %v416_v28, %v414_v23  ;;  %6591 = vmatpush3.bf16.msra.mxu1 %v7498_v25  ;;  %v7500_v25 = vld [vmem:[%s9358_s4 + $0x60] sm:$0xff]  }
 0x12a   :  { %6608 = vmatprep.subr.bf16.mxu1 %v7791_v57 }
 0x12b   :  { %629 = vmatprep.mubr.bf16.mxu1 %v442_v30  ;;  %v356_v31 = vpop.f32.mrb[12].mxu0  ;;  %v7502_v30 = vld [vmem:[%s9358_s4 + $0x68] sm:$0xff]  }
 0x12c   :  { %630 = vmatmul.mubr.bf16.gmra.mrb[8].mxu1 %v441_v29  ;;  %v417_v32 = vmax.f32 %v356_v31, 0.0  ;;  %v358_v33 = vpop.f32.mrb[13].mxu0 }
 0x12d   :  { %v418_v34 = vmax.f32 %v358_v33, 0.0  ;;  %v360_v35 = vpop.f32.mrb[14].mxu0 }
 0x12e   :  { %v419_v36 = vmax.f32 %v360_v35, 0.0  ;;  %v362_v37 = vpop.f32.mrb[15].mxu0 }
 0x12f   :  { %v420_v38 = vmax.f32 %v362_v37, 0.0  ;;  %v7504_v37 = vld [vmem:[%s9358_s4 + $0x70] sm:$0xff]  }
 0x130   :  { %v443_v39 = vpack.c.bf16 %v419_v36, %v417_v32 }
 0x131   :  { %v444_v40 = vpack.c.bf16 %v420_v38, %v418_v34  ;;  %v7503_v34 = vld [vmem:[%s9358_s4 + $0x48] sm:$0xff]   ;;  %v7505_v38 = vld [vmem:[%s9358_s4 + $0x50] sm:$0xff]  }
 0x133   :  { %v366_v41 = vpop.f32.mrb[16].mxu0  ;;  %637 = vmatprep.mubr.bf16.mxu1 %v444_v40  ;;  %v7506_v40 = vld [vmem:[%s9358_s4 + $0x78] sm:$0xff]  }
 0x134   :  { %v421_v42 = vmax.f32 %v366_v41, 0.0  ;;  %v368_v43 = vpop.f32.mrb[17].mxu0  ;;  %638 = vmatmul.mubr.bf16.gmra.mrb[12].mxu1 %v443_v39 }
 0x135   :  { %v422_v44 = vmax.f32 %v368_v43, 0.0  ;;  %v370_v45 = vpop.f32.mrb[18].mxu0 }
 0x136   :  { %v423_v46 = vmax.f32 %v370_v45, 0.0  ;;  %v372_v47 = vpop.f32.mrb[19].mxu0 }
 0x137   :  { %v424_v48 = vmax.f32 %v372_v47, 0.0  ;;  %v7508_v47 = vld [vmem:[%s9358_s4 + $0xa0] sm:$0xff]  }
 0x138   :  { %v445_v49 = vpack.c.bf16 %v423_v46, %v421_v42 }
 0x139   :  { %v446_v50 = vpack.c.bf16 %v424_v48, %v422_v44  ;;  %v7507_v44 = vld [vmem:[%s9358_s4 + $0x58] sm:$0xff]  }
 0x13b   :  { %v376_v51 = vpop.f32.mrb[20].mxu0  ;;  %645 = vmatprep.mubr.bf16.mxu1 %v446_v50 }
 0x13c   :  { %v425_v52 = vmax.f32 %v376_v51, 0.0  ;;  %v378_v53 = vpop.f32.mrb[21].mxu0  ;;  %646 = vmatmul.mubr.bf16.gmra.mrb[16].mxu1 %v445_v49  ;;  %v7509_v49 = vld [vmem:[%s9358_s4 + $0x80] sm:$0xff]   ;;  %v7510_v51 = vld [vmem:[%s9358_s4 + $0xa8] sm:$0xff]  }
 0x13d   :  { %v426_v54 = vmax.f32 %v378_v53, 0.0  ;;  %v380_v55 = vpop.f32.mrb[22].mxu0  ;;  %v7512_v53 = vld [vmem:[%s9358_s4 + $0xb0] sm:$0xff]  }
 0x13e   :  { %v427_v56 = vmax.f32 %v380_v55, 0.0  ;;  %v382_v58 = vpop.f32.mrb[23].mxu0  ;;  %v7513_v55 = vld [vmem:[%s9358_s4 + $0x90] sm:$0xff]  }
 0x13f   :  { %v428_v59 = vmax.f32 %v382_v58, 0.0 }
 0x140   :  { %v447_v60 = vpack.c.bf16 %v427_v56, %v425_v52  ;;  %v7511_v52 = vld [vmem:[%s9358_s4 + $0x88] sm:$0xff]   ;;  %v7514_v56 = vld [vmem:[%s9358_s4 + $0xb8] sm:$0xff]  }
 0x141   :  { %v448_v61 = vpack.c.bf16 %v428_v59, %v426_v54  ;;  %v7515_v59 = vld [vmem:[%s9358_s4 + $0x98] sm:$0xff]  }
 0x143   :  { %v386_v62 = vpop.f32.mrb[24].mxu0  ;;  %653 = vmatprep.mubr.bf16.mxu1 %v448_v61 }
 0x144   :  { %v429_v63 = vmax.f32 %v386_v62, 0.0  ;;  %v388_v0 = vpop.f32.mrb[25].mxu0  ;;  %654 = vmatmul.mubr.bf16.gmra.mrb[20].mxu1 %v447_v60  ;;  %v7516_v60 = vld [vmem:[%s9358_s4 + $0xe0] sm:$0xff]  }
 0x145   :  { %v430_v1 = vmax.f32 %v388_v0, 0.0  ;;  %v390_v2 = vpop.f32.mrb[26].mxu0  ;;  %v7517_v62 = vld [vmem:[%s9358_s4 + $0xc0] sm:$0xff]   ;;  %v7519_v0 = vld [vmem:[%s9358_s4 + $0xc8] sm:$0xff]  }
 0x146   :  { %v431_v3 = vmax.f32 %v390_v2, 0.0  ;;  %v392_v4 = vpop.f32.mrb[27].mxu0 }
 0x147   :  { %v432_v5 = vmax.f32 %v392_v4, 0.0 }
 0x148   :  { %v449_v6 = vpack.c.bf16 %v431_v3, %v429_v63  ;;  %v7518_v63 = vld [vmem:[%s9358_s4 + $0xe8] sm:$0xff]   ;;  %v7521_v3 = vld [vmem:[%s9358_s4 + $0xd0] sm:$0xff]  }
 0x149   :  { %v450_v7 = vpack.c.bf16 %v432_v5, %v430_v1  ;;  %v7520_v1 = vld [vmem:[%s9358_s4 + $0xf0] sm:$0xff]  }
 0x14b   :  { %v396_v8 = vpop.f32.mrb[28].mxu0  ;;  %661 = vmatprep.mubr.bf16.mxu1 %v450_v7  ;;  %v7522_v7 = vld [vmem:[%s9358_s4 + $0xf8] sm:$0xff]  }
 0x14c   :  { %v433_v9 = vmax.f32 %v396_v8, 0.0  ;;  %v398_v10 = vpop.f32.mrb[29].mxu0  ;;  %662 = vmatmul.mubr.bf16.gmra.mrb[24].mxu1 %v449_v6 }
 0x14d   :  { %v434_v11 = vmax.f32 %v398_v10, 0.0  ;;  %v400_v12 = vpop.f32.mrb[30].mxu0  ;;  %v7523_v10 = vld [vmem:[%s9358_s4 + $0xd8] sm:$0xff]  }
 0x14e   :  { %v435_v13 = vmax.f32 %v400_v12, 0.0  ;;  %v402_v14 = vpop.f32.mrb[31].mxu0 }
 0x14f   :  { %v436_v15 = vmax.f32 %v402_v14, 0.0  ;;  %v7525_v14 = vld [vmem:[%s9358_s4 + $0x100] sm:$0xff]  }
 0x150   :  { %v451_v16 = vpack.c.bf16 %v435_v13, %v433_v9 }
 0x151   :  { %v452_v17 = vpack.c.bf16 %v436_v15, %v434_v11  ;;  %v7524_v11 = vld [vmem:[%s9358_s4 + $0x120] sm:$0xff]  }
 0x153   :  { %669 = vmatprep.mubr.bf16.mxu1 %v452_v17 }
 0x154   :  { %670 = vmatmul.mubr.bf16.gmra.mrb[28].mxu1 %v451_v16 }
 0x155   :  { %6592 = vmatprep.mubr.msk.bf16.mxu1 %vm7792_vm1, %v7791_v57 }
 0x1ef   :  { %v6199_v18 = vpop.f32.mrb[0].mxu1 }
 0x1f0   :  { %v6200_v19 = vpop.f32.mrb[1].mxu1 }
 0x1f1   :  { %v6201_v20 = vadd.f32 %v6200_v19, %v6199_v18  ;;  %v6202_v21 = vpop.f32.mrb[2].mxu1  ;;  %v7526_v19 = vld [vmem:[%s9358_s4 + $0x128] sm:$0xff]  }
 0x1f2   :  { %v6203_v22 = vpop.f32.mrb[3].mxu1 }
 0x1f3   :  { %v678_v23 = vmax.f32 %v6201_v20, 0.0  ;;  %v8057_v24 = vadd.f32 %v6203_v22, %v6202_v21  ;;  %v7527_v22 = vld [vmem:[%s9358_s4 + $0x108] sm:$0xff]  }
 0x1f5   :  { %v694_v26 = vpack.c.bf16 %v678_v23, %v678_v23  ;;  %v679_v54 = vmax.f32 %v8057_v24, 0.0  ;;  %v7528_v24 = vld [vmem:[%s9358_s4 + $0x130] sm:$0xff]  }
 0x1f7   :  { %v712_v28 = vrot.slane %v694_v26, 1  ;;  %6605 = vmatmul.mubr.msk.bf16.vlgmr.msra.gmra.mrb[32].mxu0 %vm267_vm0, %v694_v26  ;;  %v6205_v29 = vpop.f32.mrb[4].mxu1  ;;  %v932_v48 = vrot.slane %v694_v26, 3  ;;  %v855_v50 = vrot.slane %v694_v26, 2  ;;  %v1001_v58 = vpack.c.bf16 %v679_v54, %v679_v54  ;;  %v7529_v26 = vld [vmem:[%s9358_s4 + $0x110] sm:$0xff]  }
 0x1f8   :  { %6621 = vmatpush3.bf16.msra.mxu0 %v7500_v25  ;;  %6628 = vmatprep.mubr.msk.bf16.mxu0 %vm7792_vm1, %v7791_v57  ;;  %v6206_v31 = vpop.f32.mrb[5].mxu1 }
 0x1f9   :  { %6593 = vmatmul.mubr.msk.bf16.vlgmr.msra.gmra.mrb[32].mxu1 %vm267_vm0, %v712_v28  ;;  %6622 = vmatprep.subr.bf16.mxu0 %v7791_v57  ;;  %v8073_v32 = vadd.f32 %v6206_v31, %v6205_v29  ;;  %v6208_v33 = vpop.f32.mrb[6].mxu1  ;;  %v1087_v61 = vrot.slane %v1001_v58, 1  ;;  %v1241_v13 = vrot.slane %v1001_v58, 3  ;;  %v1164_v16 = vrot.slane %v1001_v58, 2  ;;  %v7530_v31 = vld [vmem:[%s9358_s4 + $0x138] sm:$0xff]  }
 0x1fa   :  { %6609 = vmatpush3.bf16.msra.mxu1 %v7501_v27  ;;  %6616 = vmatprep.mubr.msk.bf16.mxu1 %vm7792_vm1, %v7791_v57  ;;  %v6209_v35 = vpop.f32.mrb[7].mxu1 }
 0x1fb   :  { %6610 = vmatprep.subr.bf16.mxu1 %v7791_v57  ;;  %v8081_v36 = vadd.f32 %v6209_v35, %v6208_v33  ;;  %v680_v23 = vmax.f32 %v8073_v32, 0.0 }
 0x1fc   :  { %6623 = vmatpush3.bf16.msra.mxu0 %v7502_v30 }
 0x1fd   :  { %6624 = vmatprep.subr.bf16.mxu0 %v7791_v57  ;;  %v8218_v28 = vpack.c.bf16 %v680_v23, %v680_v23 }
 0x1fe   :  { %6611 = vmatpush3.bf16.msra.mxu1 %v7503_v34  ;;  %v7531_v34 = vld [vmem:[%s9358_s4 + $0x118] sm:$0xff]  }
 0x1ff   :  { %6612 = vmatprep.subr.bf16.mxu1 %v7791_v57  ;;  %v6211_v39 = vpop.f32.mrb[8].mxu1  ;;  %v1396_v35 = vrot.slane %v8218_v28, 1 }
 0x200   :  { %6625 = vmatpush3.bf16.msra.mxu0 %v7504_v37  ;;  %v6212_v41 = vpop.f32.mrb[9].mxu1  ;;  %v7532_v37 = vld [vmem:[%s9358_s4 + $0x160] sm:$0xff]  }
 0x201   :  { %6626 = vmatprep.subr.bf16.mxu0 %v7791_v57  ;;  %v8095_v42 = vadd.f32 %v6212_v41, %v6211_v39  ;;  %v6214_v43 = vpop.f32.mrb[10].mxu1  ;;  %v7533_v39 = vld [vmem:[%s9358_s4 + $0x140] sm:$0xff]  }
 0x202   :  { %6613 = vmatpush3.bf16.msra.mxu1 %v7505_v38  ;;  %v6215_v45 = vpop.f32.mrb[11].mxu1 }
 0x203   :  { %6614 = vmatprep.subr.bf16.mxu1 %v7791_v57  ;;  %v8101_v46 = vadd.f32 %v6215_v45, %v6214_v43 }
 0x204   :  { %6627 = vmatpush3.bf16.msra.mxu0 %v7506_v40 }
 0x205   :  { %6644 = vmatprep.subr.bf16.mxu0 %v7791_v57 }
 0x206   :  { %6615 = vmatpush3.bf16.msra.mxu1 %v7507_v44  ;;  %v7534_v44 = vld [vmem:[%s9358_s4 + $0x168] sm:$0xff]  }
 0x207   :  { %6629 = vmatmul.mubr.msk.bf16.vlgmr.msra.gmra.mrb[36].mxu0 %vm267_vm0, %v932_v48  ;;  %6632 = vmatprep.subr.bf16.mxu1 %v7791_v57  ;;  %v6217_v2 = vpop.f32.mrb[12].mxu1  ;;  %v7535_v48 = vld [vmem:[%s9358_s4 + $0x148] sm:$0xff]  }
 0x208   :  { %6645 = vmatpush3.bf16.msra.mxu0 %v7508_v47  ;;  %6652 = vmatprep.mubr.msk.bf16.mxu0 %vm7792_vm1, %v7791_v57  ;;  %v6218_v4 = vpop.f32.mrb[13].mxu1 }
 0x209   :  { %6617 = vmatmul.mubr.msk.bf16.vlgmr.msra.gmra.mrb[36].mxu1 %vm267_vm0, %v855_v50  ;;  %6646 = vmatprep.subr.bf16.mxu0 %v7791_v57  ;;  %v8172_v5 = vadd.f32 %v6218_v4, %v6217_v2  ;;  %v6220_v6 = vpop.f32.mrb[14].mxu1  ;;  %v7544_v2 = vld [vmem:[%s9358_s4 + $0x1b0] sm:$0xff]  }
 0x20a   :  { %6633 = vmatpush3.bf16.msra.mxu1 %v7509_v49  ;;  %6640 = vmatprep.mubr.msk.bf16.mxu1 %vm7792_vm1, %v7791_v57  ;;  %v6221_v8 = vpop.f32.mrb[15].mxu1  ;;  %v7536_v49 = vld [vmem:[%s9358_s4 + $0x170] sm:$0xff]  }
 0x20b   :  { %6634 = vmatprep.subr.bf16.mxu1 %v7791_v57  ;;  %v8178_v9 = vadd.f32 %v6221_v8, %v6220_v6  ;;  %v7545_v4 = vld [vmem:[%s9358_s4 + $0x190] sm:$0xff]   ;;  %v7546_v6 = vld [vmem:[%s9358_s4 + $0x1b8] sm:$0xff]   ;;  %v7548_v8 = vld [vmem:[%s9358_s4 + $0x1e0] sm:$0xff]  }
 0x20c   :  { %6647 = vmatpush3.bf16.msra.mxu0 %v7510_v51  ;;  %v7537_v51 = vld [vmem:[%s9358_s4 + $0x150] sm:$0xff]  }
 0x20d   :  { %6648 = vmatprep.subr.bf16.mxu0 %v7791_v57 }
 0x20e   :  { %6635 = vmatpush3.bf16.msra.mxu1 %v7511_v52 }
 0x20f   :  { %6636 = vmatprep.subr.bf16.mxu1 %v7791_v57  ;;  %v6223_v12 = vpop.f32.mrb[16].mxu1 }
 0x210   :  { %6649 = vmatpush3.bf16.msra.mxu0 %v7512_v53  ;;  %v6224_v15 = vpop.f32.mrb[17].mxu1 }
 0x211   :  { %6650 = vmatprep.subr.bf16.mxu0 %v7791_v57  ;;  %v8193_v17 = vadd.f32 %v6224_v15, %v6223_v12  ;;  %v6226_v18 = vpop.f32.mrb[18].mxu1  ;;  %v7550_v12 = vld [vmem:[%s9358_s4 + $0x1e8] sm:$0xff]   ;;  %v7553_v15 = vld [vmem:[%s9358_s4 + $0x1d0] sm:$0xff]  }
 0x212   :  { %6637 = vmatpush3.bf16.msra.mxu1 %v7513_v55  ;;  %v6227_v20 = vpop.f32.mrb[19].mxu1  ;;  %v7538_v55 = vld [vmem:[%s9358_s4 + $0x178] sm:$0xff]  }
 0x213   :  { %6638 = vmatprep.subr.bf16.mxu1 %v7791_v57  ;;  %v8202_v21 = vadd.f32 %v6227_v20, %v6226_v18  ;;  %v7555_v18 = vld [vmem:[%s9358_s4 + $0x1d8] sm:$0xff]  }
 0x214   :  { %6651 = vmatpush3.bf16.msra.mxu0 %v7514_v56 }
 0x215   :  { %6668 = vmatprep.subr.bf16.mxu0 %v7791_v57 }
 0x216   :  { %6639 = vmatpush3.bf16.msra.mxu1 %v7515_v59  ;;  %v7539_v59 = vld [vmem:[%s9358_s4 + $0x158] sm:$0xff]  }
 0x217   :  { %6653 = vmatmul.mubr.msk.bf16.vlgmr.msra.gmra.mrb[40].mxu0 %vm267_vm0, %v1087_v61  ;;  %6656 = vmatprep.subr.bf16.mxu1 %v7791_v57  ;;  %v6229_v25 = vpop.f32.mrb[20].mxu1  ;;  %v1550_v61 = vrot.slane %v8218_v28, 3 }
 0x218   :  { %6669 = vmatpush3.bf16.msra.mxu0 %v7516_v60  ;;  %6676 = vmatprep.mubr.msk.bf16.mxu0 %vm7792_vm1, %v7791_v57  ;;  %v6230_v27 = vpop.f32.mrb[21].mxu1  ;;  %v7540_v60 = vld [vmem:[%s9358_s4 + $0x1a0] sm:$0xff]  }
 0x219   :  { %6641 = vmatmul.mubr.msk.bf16.vlgmr.msra.gmra.mrb[40].mxu1 %vm267_vm0, %v1001_v58  ;;  %6670 = vmatprep.subr.bf16.mxu0 %v7791_v57  ;;  %v8221_v29 = vadd.f32 %v6230_v27, %v6229_v25  ;;  %v6232_v30 = vpop.f32.mrb[22].mxu1  ;;  %v7559_v25 = vld [vmem:[%s9358_s4 + $0x208] sm:$0xff]   ;;  %v7560_v27 = vld [vmem:[%s9358_s4 + $0x230] sm:$0xff]  }
 0x21a   :  { %6657 = vmatpush3.bf16.msra.mxu1 %v7517_v62  ;;  %6664 = vmatprep.mubr.msk.bf16.mxu1 %vm7792_vm1, %v7791_v57  ;;  %v6233_v32 = vpop.f32.mrb[23].mxu1  ;;  %v7541_v62 = vld [vmem:[%s9358_s4 + $0x180] sm:$0xff]  }
 0x21b   :  { %6658 = vmatprep.subr.bf16.mxu1 %v7791_v57  ;;  %v8227_v33 = vadd.f32 %v6233_v32, %v6232_v30 }
 0x21c   :  { %6671 = vmatpush3.bf16.msra.mxu0 %v7518_v63  ;;  %v1473_v63 = vrot.slane %v8218_v28, 2 }
 0x21d   :  { %6672 = vmatprep.subr.bf16.mxu0 %v7791_v57 }
 0x21e   :  { %6659 = vmatpush3.bf16.msra.mxu1 %v7519_v0  ;;  %v7542_v0 = vld [vmem:[%s9358_s4 + $0x1a8] sm:$0xff]  }
 0x21f   :  { %6660 = vmatprep.subr.bf16.mxu1 %v7791_v57  ;;  %v6235_v38 = vpop.f32.mrb[24].mxu1 }
 0x220   :  { %6673 = vmatpush3.bf16.msra.mxu0 %v7520_v1  ;;  %v6236_v40 = vpop.f32.mrb[25].mxu1  ;;  %v7543_v1 = vld [vmem:[%s9358_s4 + $0x188] sm:$0xff]  }
 0x221   :  { %6674 = vmatprep.subr.bf16.mxu0 %v7791_v57  ;;  %v8243_v41 = vadd.f32 %v6236_v40, %v6235_v38  ;;  %v6238_v43 = vpop.f32.mrb[26].mxu1  ;;  %v7567_v38 = vld [vmem:[%s9358_s4 + $0x248] sm:$0xff]   ;;  %v7569_v40 = vld [vmem:[%s9358_s4 + $0x250] sm:$0xff]  }
 0x222   :  { %6661 = vmatpush3.bf16.msra.mxu1 %v7521_v3  ;;  %v6239_v45 = vpop.f32.mrb[27].mxu1  ;;  %v681_v3 = vmax.f32 %v8081_v36, 0.0  ;;  %v7547_v36 = vld [vmem:[%s9358_s4 + $0x198] sm:$0xff]  }
 0x223   :  { %6662 = vmatprep.subr.bf16.mxu1 %v7791_v57  ;;  %v8253_v47 = vadd.f32 %v6239_v45, %v6238_v43  ;;  %v7570_v43 = vld [vmem:[%s9358_s4 + $0x278] sm:$0xff]   ;;  %v7572_v45 = vld [vmem:[%s9358_s4 + $0x2a0] sm:$0xff]  }
 0x224   :  { %6675 = vmatpush3.bf16.msra.mxu0 %v7522_v7  ;;  %v1619_v7 = vpack.c.bf16 %v681_v3, %v681_v3  ;;  %v7585_v3 = vld [vmem:[%s9358_s4 + $0x2d0] sm:$0xff]  }
 0x225   :  { %6692 = vmatprep.subr.bf16.mxu0 %v7791_v57 }
 0x226   :  { %6663 = vmatpush3.bf16.msra.mxu1 %v7523_v10  ;;  %v1705_v10 = vrot.slane %v1619_v7, 1  ;;  %v1859_v20 = vrot.slane %v1619_v7, 3  ;;  %v1782_v23 = vrot.slane %v1619_v7, 2 }
 0x227   :  { %6677 = vmatmul.mubr.msk.bf16.vlgmr.msra.gmra.mrb[44].mxu0 %vm267_vm0, %v1241_v13  ;;  %6680 = vmatprep.subr.bf16.mxu1 %v7791_v57  ;;  %v6241_v50 = vpop.f32.mrb[28].mxu1  ;;  %v7551_v13 = vld [vmem:[%s9358_s4 + $0x1c8] sm:$0xff]  }
 0x228   :  { %6693 = vmatpush3.bf16.msra.mxu0 %v7524_v11  ;;  %6700 = vmatprep.mubr.msk.bf16.mxu0 %vm7792_vm1, %v7791_v57  ;;  %v6242_v52 = vpop.f32.mrb[29].mxu1  ;;  %v7549_v11 = vld [vmem:[%s9358_s4 + $0x1c0] sm:$0xff]  }
 0x229   :  { %6665 = vmatmul.mubr.msk.bf16.vlgmr.msra.gmra.mrb[44].mxu1 %vm267_vm0, %v1164_v16  ;;  %6694 = vmatprep.subr.bf16.mxu0 %v7791_v57  ;;  %v8269_v53 = vadd.f32 %v6242_v52, %v6241_v50  ;;  %v6244_v54 = vpop.f32.mrb[30].mxu1  ;;  %v7554_v16 = vld [vmem:[%s9358_s4 + $0x1f8] sm:$0xff]   ;;  %v7575_v52 = vld [vmem:[%s9358_s4 + $0x288] sm:$0xff]  }
 0x22a   :  { %6681 = vmatpush3.bf16.msra.mxu1 %v7525_v14  ;;  %6688 = vmatprep.mubr.msk.bf16.mxu1 %vm7792_vm1, %v7791_v57  ;;  %v6245_v56 = vpop.f32.mrb[31].mxu1  ;;  %v7552_v14 = vld [vmem:[%s9358_s4 + $0x1f0] sm:$0xff]  }
 0x22b   :  { %6682 = vmatprep.subr.bf16.mxu1 %v7791_v57  ;;  %v8275_v58 = vadd.f32 %v6245_v56, %v6244_v54  ;;  %v7576_v54 = vld [vmem:[%s9358_s4 + $0x2b0] sm:$0xff]  }
 0x22c   :  { %6695 = vmatpush3.bf16.msra.mxu0 %v7526_v19  ;;  %v7556_v19 = vld [vmem:[%s9358_s4 + $0x220] sm:$0xff]   ;;  %v7577_v56 = vld [vmem:[%s9358_s4 + $0x290] sm:$0xff]  }
 0x22d   :  { %6696 = vmatprep.subr.bf16.mxu0 %v7791_v57 }
 0x22e   :  { %6683 = vmatpush3.bf16.msra.mxu1 %v7527_v22  ;;  %v7557_v22 = vld [vmem:[%s9358_s4 + $0x200] sm:$0xff]  }
 0x22f   :  { %6684 = vmatprep.subr.bf16.mxu1 %v7791_v57 }
 0x230   :  { %6697 = vmatpush3.bf16.msra.mxu0 %v7528_v24  ;;  %v7558_v24 = vld [vmem:[%s9358_s4 + $0x228] sm:$0xff]  }
 0x231   :  { %6698 = vmatprep.subr.bf16.mxu0 %v7791_v57 }
 0x232   :  { %6685 = vmatpush3.bf16.msra.mxu1 %v7529_v26  ;;  %v682_v26 = vmax.f32 %v8095_v42, 0.0  ;;  %v7562_v42 = vld [vmem:[%s9358_s4 + $0x238] sm:$0xff]  }
 0x233   :  { %6686 = vmatprep.subr.bf16.mxu1 %v7791_v57 }
 0x234   :  { %6699 = vmatpush3.bf16.msra.mxu0 %v7530_v31  ;;  %v1928_v30 = vpack.c.bf16 %v682_v26, %v682_v26  ;;  %v7563_v31 = vld [vmem:[%s9358_s4 + $0x218] sm:$0xff]   ;;  %v7601_v26 = vld [vmem:[%s9358_s4 + $0x350] sm:$0xff]  }
 0x235   :  { %6716 = vmatprep.subr.bf16.mxu0 %v7791_v57 }
 0x236   :  { %6687 = vmatpush3.bf16.msra.mxu1 %v7531_v34  ;;  %v2014_v32 = vrot.slane %v1928_v30, 1  ;;  %v7564_v34 = vld [vmem:[%s9358_s4 + $0x260] sm:$0xff]   ;;  %v2091_v50 = vrot.slane %v1928_v30, 2 }
 0x237   :  { %6701 = vmatmul.mubr.msk.bf16.vlgmr.msra.gmra.mrb[48].mxu0 %vm267_vm0, %v1396_v35  ;;  %6704 = vmatprep.subr.bf16.mxu1 %v7791_v57  ;;  %v7565_v35 = vld [vmem:[%s9358_s4 + $0x240] sm:$0xff]  }
 0x238   :  { %6717 = vmatpush3.bf16.msra.mxu0 %v7532_v37  ;;  %6724 = vmatprep.mubr.msk.bf16.mxu0 %vm7792_vm1, %v7791_v57  ;;  %v7566_v37 = vld [vmem:[%s9358_s4 + $0x268] sm:$0xff]  }
 0x239   :  { %6689 = vmatmul.mubr.msk.bf16.vlgmr.msra.gmra.mrb[48].mxu1 %vm267_vm0, %v8218_v28  ;;  %6718 = vmatprep.subr.bf16.mxu0 %v7791_v57  ;;  %v7561_v28 = vld [vmem:[%s9358_s4 + $0x210] sm:$0xff]  }
 0x23a   :  { %6705 = vmatpush3.bf16.msra.mxu1 %v7533_v39  ;;  %6712 = vmatprep.mubr.msk.bf16.mxu1 %vm7792_vm1, %v7791_v57  ;;  %v7568_v39 = vld [vmem:[%s9358_s4 + $0x270] sm:$0xff]  }
 0x23b   :  { %6706 = vmatprep.subr.bf16.mxu1 %v7791_v57 }
 0x23c   :  { %6719 = vmatpush3.bf16.msra.mxu0 %v7534_v44  ;;  %v7571_v44 = vld [vmem:[%s9358_s4 + $0x258] sm:$0xff]  }
 0x23d   :  { %6720 = vmatprep.subr.bf16.mxu0 %v7791_v57 }
 0x23e   :  { %6707 = vmatpush3.bf16.msra.mxu1 %v7535_v48  ;;  %v2168_v48 = vrot.slane %v1928_v30, 3 }
 0x23f   :  { %6708 = vmatprep.subr.bf16.mxu1 %v7791_v57 }
 0x240   :  { %6721 = vmatpush3.bf16.msra.mxu0 %v7536_v49  ;;  %v7573_v49 = vld [vmem:[%s9358_s4 + $0x280] sm:$0xff]  }
 0x241   :  { %6722 = vmatprep.subr.bf16.mxu0 %v7791_v57 }
 0x242   :  { %6709 = vmatpush3.bf16.msra.mxu1 %v7537_v51  ;;  %v7574_v51 = vld [vmem:[%s9358_s4 + $0x2a8] sm:$0xff]  }
 0x243   :  { %6710 = vmatprep.subr.bf16.mxu1 %v7791_v57 }
 0x244   :  { %6723 = vmatpush3.bf16.msra.mxu0 %v7538_v55  ;;  %v683_v55 = vmax.f32 %v8101_v46, 0.0  ;;  %v7579_v46 = vld [vmem:[%s9358_s4 + $0x298] sm:$0xff]  }
 0x245   :  { %6740 = vmatprep.subr.bf16.mxu0 %v7791_v57 }
 0x246   :  { %6711 = vmatpush3.bf16.msra.mxu1 %v7539_v59  ;;  %v7578_v59 = vld [vmem:[%s9358_s4 + $0x2b8] sm:$0xff]  }
 0x247   :  { %6725 = vmatmul.mubr.msk.bf16.vlgmr.msra.gmra.mrb[52].mxu0 %vm267_vm0, %v1550_v61  ;;  %6728 = vmatprep.subr.bf16.mxu1 %v7791_v57  ;;  %v7580_v61 = vld [vmem:[%s9358_s4 + $0x2e0] sm:$0xff]  }
 0x248   :  { %6741 = vmatpush3.bf16.msra.mxu0 %v7540_v60  ;;  %6748 = vmatprep.mubr.msk.bf16.mxu0 %vm7792_vm1, %v7791_v57  ;;  %v2237_v60 = vpack.c.bf16 %v683_v55, %v683_v55  ;;  %v7611_v55 = vld [vmem:[%s9358_s4 + $0x398] sm:$0xff]  }
 0x249   :  { %6713 = vmatmul.mubr.msk.bf16.vlgmr.msra.gmra.mrb[52].mxu1 %vm267_vm0, %v1473_v63  ;;  %6742 = vmatprep.subr.bf16.mxu0 %v7791_v57  ;;  %v7581_v63 = vld [vmem:[%s9358_s4 + $0x2c0] sm:$0xff]  }
 0x24a   :  { %6729 = vmatpush3.bf16.msra.mxu1 %v7541_v62  ;;  %6736 = vmatprep.mubr.msk.bf16.mxu1 %vm7792_vm1, %v7791_v57  ;;  %v2323_v62 = vrot.slane %v2237_v60, 1 }
 0x24b   :  { %6730 = vmatprep.subr.bf16.mxu1 %v7791_v57 }
 0x24c   :  { %6743 = vmatpush3.bf16.msra.mxu0 %v7542_v0  ;;  %v7582_v0 = vld [vmem:[%s9358_s4 + $0x2e8] sm:$0xff]  }
 0x24d   :  { %6744 = vmatprep.subr.bf16.mxu0 %v7791_v57 }
 0x24e   :  { %6731 = vmatpush3.bf16.msra.mxu1 %v7543_v1  ;;  %v7583_v1 = vld [vmem:[%s9358_s4 + $0x2c8] sm:$0xff]  }
 0x24f   :  { %6732 = vmatprep.subr.bf16.mxu1 %v7791_v57 }
 0x250   :  { %6745 = vmatpush3.bf16.msra.mxu0 %v7544_v2  ;;  %v7584_v2 = vld [vmem:[%s9358_s4 + $0x2f0] sm:$0xff]  }
 0x251   :  { %6746 = vmatprep.subr.bf16.mxu0 %v7791_v57 }
 0x252   :  { %6733 = vmatpush3.bf16.msra.mxu1 %v7545_v4  ;;  %v7586_v4 = vld [vmem:[%s9358_s4 + $0x2f8] sm:$0xff]  }
 0x253   :  { %6734 = vmatprep.subr.bf16.mxu1 %v7791_v57 }
 0x254   :  { %6747 = vmatpush3.bf16.msra.mxu0 %v7546_v6  ;;  %v7587_v6 = vld [vmem:[%s9358_s4 + $0x2d8] sm:$0xff]  }
 0x255   :  { %6764 = vmatprep.subr.bf16.mxu0 %v7791_v57 }
 0x256   :  { %6735 = vmatpush3.bf16.msra.mxu1 %v7547_v36  ;;  %v2477_v36 = vrot.slane %v2237_v60, 3 }
 0x257   :  { %6749 = vmatmul.mubr.msk.bf16.vlgmr.msra.gmra.mrb[56].mxu0 %vm267_vm0, %v1705_v10  ;;  %6752 = vmatprep.subr.bf16.mxu1 %v7791_v57  ;;  %v2400_v10 = vrot.slane %v2237_v60, 2 }
 0x258   :  { %6765 = vmatpush3.bf16.msra.mxu0 %v7548_v8  ;;  %6772 = vmatprep.mubr.msk.bf16.mxu0 %vm7792_vm1, %v7791_v57  ;;  %v7589_v8 = vld [vmem:[%s9358_s4 + $0x300] sm:$0xff]  }
 0x259   :  { %6737 = vmatmul.mubr.msk.bf16.vlgmr.msra.gmra.mrb[56].mxu1 %vm267_vm0, %v1619_v7  ;;  %6766 = vmatprep.subr.bf16.mxu0 %v7791_v57  ;;  %v7588_v7 = vld [vmem:[%s9358_s4 + $0x320] sm:$0xff]  }
 0x25a   :  { %6753 = vmatpush3.bf16.msra.mxu1 %v7549_v11  ;;  %6760 = vmatprep.mubr.msk.bf16.mxu1 %vm7792_vm1, %v7791_v57  ;;  %v7590_v11 = vld [vmem:[%s9358_s4 + $0x328] sm:$0xff]  }
 0x25b   :  { %6754 = vmatprep.subr.bf16.mxu1 %v7791_v57 }
 0x25c   :  { %6767 = vmatpush3.bf16.msra.mxu0 %v7550_v12  ;;  %v7591_v12 = vld [vmem:[%s9358_s4 + $0x308] sm:$0xff]  }
 0x25d   :  { %6768 = vmatprep.subr.bf16.mxu0 %v7791_v57 }
 0x25e   :  { %6755 = vmatpush3.bf16.msra.mxu1 %v7551_v13  ;;  %v7592_v13 = vld [vmem:[%s9358_s4 + $0x330] sm:$0xff]  }
 0x25f   :  { %6756 = vmatprep.subr.bf16.mxu1 %v7791_v57 }
 0x260   :  { %6769 = vmatpush3.bf16.msra.mxu0 %v7552_v14  ;;  %v684_v14 = vmax.f32 %v8172_v5, 0.0  ;;  %v7595_v5 = vld [vmem:[%s9358_s4 + $0x318] sm:$0xff]  }
 0x261   :  { %6770 = vmatprep.subr.bf16.mxu0 %v7791_v57 }
 0x262   :  { %6757 = vmatpush3.bf16.msra.mxu1 %v7553_v15  ;;  %v7593_v15 = vld [vmem:[%s9358_s4 + $0x310] sm:$0xff]  }
 0x263   :  { %6758 = vmatprep.subr.bf16.mxu1 %v7791_v57 }
 0x264   :  { %6771 = vmatpush3.bf16.msra.mxu0 %v7554_v16  ;;  %v7594_v16 = vld [vmem:[%s9358_s4 + $0x338] sm:$0xff]  }
 0x265   :  { %6788 = vmatprep.subr.bf16.mxu0 %v7791_v57 }
 0x266   :  { %6759 = vmatpush3.bf16.msra.mxu1 %v7555_v18  ;;  %v2546_v18 = vpack.c.bf16 %v684_v14, %v684_v14 }
 0x267   :  { %6773 = vmatmul.mubr.msk.bf16.vlgmr.msra.gmra.mrb[60].mxu0 %vm267_vm0, %v1859_v20  ;;  %6776 = vmatprep.subr.bf16.mxu1 %v7791_v57 }
 0x268   :  { %6789 = vmatpush3.bf16.msra.mxu0 %v7556_v19  ;;  %6796 = vmatprep.mubr.msk.bf16.mxu0 %vm7792_vm1, %v7791_v57  ;;  %v7596_v19 = vld [vmem:[%s9358_s4 + $0x360] sm:$0xff]   ;;  %v2632_v20 = vrot.slane %v2546_v18, 1 }
 0x269   :  { %6761 = vmatmul.mubr.msk.bf16.vlgmr.msra.gmra.mrb[60].mxu1 %vm267_vm0, %v1782_v23  ;;  %6790 = vmatprep.subr.bf16.mxu0 %v7791_v57  ;;  %v7598_v23 = vld [vmem:[%s9358_s4 + $0x368] sm:$0xff]  }
 0x26a   :  { %6777 = vmatpush3.bf16.msra.mxu1 %v7557_v22  ;;  %6784 = vmatprep.mubr.msk.bf16.mxu1 %vm7792_vm1, %v7791_v57  ;;  %v7597_v22 = vld [vmem:[%s9358_s4 + $0x340] sm:$0xff]  }
 0x26b   :  { %6778 = vmatprep.subr.bf16.mxu1 %v7791_v57 }
 0x26c   :  { %6791 = vmatpush3.bf16.msra.mxu0 %v7558_v24  ;;  %v7599_v24 = vld [vmem:[%s9358_s4 + $0x348] sm:$0xff]  }
 0x26d   :  { %6792 = vmatprep.subr.bf16.mxu0 %v7791_v57 }
 0x26e   :  { %6779 = vmatpush3.bf16.msra.mxu1 %v7559_v25  ;;  %v7600_v25 = vld [vmem:[%s9358_s4 + $0x370] sm:$0xff]  }
 0x26f   :  { %6780 = vmatprep.subr.bf16.mxu1 %v7791_v57 }
 0x270   :  { %6793 = vmatpush3.bf16.msra.mxu0 %v7560_v27  ;;  %v7602_v27 = vld [vmem:[%s9358_s4 + $0x378] sm:$0xff]  }
 0x271   :  { %6794 = vmatprep.subr.bf16.mxu0 %v7791_v57 }
 0x272   :  { %6781 = vmatpush3.bf16.msra.mxu1 %v7561_v28  ;;  %v7603_v28 = vld [vmem:[%s9358_s4 + $0x358] sm:$0xff]  }
 0x273   :  { %6782 = vmatprep.subr.bf16.mxu1 %v7791_v57 }
 0x274   :  { %6795 = vmatpush3.bf16.msra.mxu0 %v7562_v42  ;;  %v2786_v42 = vrot.slane %v2546_v18, 3 }
 0x275   :  { %6812 = vmatprep.subr.bf16.mxu0 %v7791_v57 }
 0x276   :  { %6783 = vmatpush3.bf16.msra.mxu1 %v7563_v31  ;;  %v7605_v31 = vld [vmem:[%s9358_s4 + $0x380] sm:$0xff]  }
 0x277   :  { %6797 = vmatmul.mubr.msk.bf16.vlgmr.msra.gmra.mrb[64].mxu0 %vm267_vm0, %v2014_v32  ;;  %6800 = vmatprep.subr.bf16.mxu1 %v7791_v57  ;;  %v2709_v32 = vrot.slane %v2546_v18, 2 }
 0x278   :  { %6813 = vmatpush3.bf16.msra.mxu0 %v7564_v34  ;;  %6820 = vmatprep.mubr.msk.bf16.mxu0 %vm7792_vm1, %v7791_v57  ;;  %v7606_v34 = vld [vmem:[%s9358_s4 + $0x3a8] sm:$0xff]  }
 0x279   :  { %6785 = vmatmul.mubr.msk.bf16.vlgmr.msra.gmra.mrb[64].mxu1 %vm267_vm0, %v1928_v30  ;;  %6814 = vmatprep.subr.bf16.mxu0 %v7791_v57  ;;  %v7604_v30 = vld [vmem:[%s9358_s4 + $0x3a0] sm:$0xff]  }
 0x27a   :  { %6801 = vmatpush3.bf16.msra.mxu1 %v7565_v35  ;;  %6808 = vmatprep.mubr.msk.bf16.mxu1 %vm7792_vm1, %v7791_v57 }
 0x27b   :  { %6802 = vmatprep.subr.bf16.mxu1 %v7791_v57 }
 0x27c   :  { %6815 = vmatpush3.bf16.msra.mxu0 %v7566_v37  ;;  %v7607_v37 = vld [vmem:[%s9358_s4 + $0x388] sm:$0xff]  }
 0x27d   :  { %6816 = vmatprep.subr.bf16.mxu0 %v7791_v57 }
 0x27e   :  { %6803 = vmatpush3.bf16.msra.mxu1 %v7567_v38 }
 0x27f   :  { %6804 = vmatprep.subr.bf16.mxu1 %v7791_v57 }
 0x280   :  { %6817 = vmatpush3.bf16.msra.mxu0 %v7568_v39 }
 0x281   :  { %6818 = vmatprep.subr.bf16.mxu0 %v7791_v57 }
 0x282   :  { %6805 = vmatpush3.bf16.msra.mxu1 %v7569_v40 }
 0x283   :  { %6806 = vmatprep.subr.bf16.mxu1 %v7791_v57 }
 0x284   :  { %6819 = vmatpush3.bf16.msra.mxu0 %v7570_v43  ;;  %v7608_v43 = vld [vmem:[%s9358_s4 + $0x3b0] sm:$0xff]  }
 0x285   :  { %6836 = vmatprep.subr.bf16.mxu0 %v7791_v57 }
 0x286   :  { %6807 = vmatpush3.bf16.msra.mxu1 %v7571_v44  ;;  %v685_v44 = vmax.f32 %v8178_v9, 0.0 }
 0x287   :  { %6821 = vmatmul.mubr.msk.bf16.vlgmr.msra.gmra.mrb[68].mxu0 %vm267_vm0, %v2168_v48  ;;  %6824 = vmatprep.subr.bf16.mxu1 %v7791_v57 }
 0x288   :  { %6837 = vmatpush3.bf16.msra.mxu0 %v7572_v45  ;;  %6844 = vmatprep.mubr.msk.bf16.mxu0 %vm7792_vm1, %v7791_v57  ;;  %v2855_v9 = vpack.c.bf16 %v685_v44, %v685_v44  ;;  %v7631_v44 = vld [vmem:[%s9358_s4 + $0x448] sm:$0xff]  }
 0x289   :  { %6809 = vmatmul.mubr.msk.bf16.vlgmr.msra.gmra.mrb[68].mxu1 %vm267_vm0, %v2091_v50  ;;  %6838 = vmatprep.subr.bf16.mxu0 %v7791_v57 }
 0x28a   :  { %6825 = vmatpush3.bf16.msra.mxu1 %v7573_v49  ;;  %6832 = vmatprep.mubr.msk.bf16.mxu1 %vm7792_vm1, %v7791_v57  ;;  %v3095_v14 = vrot.slane %v2855_v9, 3 }
 0x28b   :  { %6826 = vmatprep.subr.bf16.mxu1 %v7791_v57 }
 0x28c   :  { %6839 = vmatpush3.bf16.msra.mxu0 %v7574_v51  ;;  %v7609_v51 = vld [vmem:[%s9358_s4 + $0x390] sm:$0xff]  }
 0x28d   :  { %6840 = vmatprep.subr.bf16.mxu0 %v7791_v57 }
 0x28e   :  { %6827 = vmatpush3.bf16.msra.mxu1 %v7575_v52 }
 0x28f   :  { %6828 = vmatprep.subr.bf16.mxu1 %v7791_v57 }
 0x290   :  { %6841 = vmatpush3.bf16.msra.mxu0 %v7576_v54  ;;  %v7610_v54 = vld [vmem:[%s9358_s4 + $0x3b8] sm:$0xff]  }
 0x291   :  { %6842 = vmatprep.subr.bf16.mxu0 %v7791_v57 }
 0x292   :  { %6829 = vmatpush3.bf16.msra.mxu1 %v7577_v56  ;;  %v7612_v56 = vld [vmem:[%s9358_s4 + $0x3e0] sm:$0xff]  }
 0x293   :  { %6830 = vmatprep.subr.bf16.mxu1 %v7791_v57 }
 0x294   :  { %6843 = vmatpush3.bf16.msra.mxu0 %v7578_v59  ;;  %v2941_v59 = vrot.slane %v2855_v9, 1 }
 0x295   :  { %6860 = vmatprep.subr.bf16.mxu0 %v7791_v57 }
 0x296   :  { %6831 = vmatpush3.bf16.msra.mxu1 %v7579_v46  ;;  %v7614_v46 = vld [vmem:[%s9358_s4 + $0x3e8] sm:$0xff]  }
 0x297   :  { %6845 = vmatmul.mubr.msk.bf16.vlgmr.msra.gmra.mrb[72].mxu0 %vm267_vm0, %v2323_v62  ;;  %6848 = vmatprep.subr.bf16.mxu1 %v7791_v57  ;;  %v7615_v62 = vld [vmem:[%s9358_s4 + $0x3c8] sm:$0xff]  }
 0x298   :  { %6861 = vmatpush3.bf16.msra.mxu0 %v7580_v61  ;;  %6868 = vmatprep.mubr.msk.bf16.mxu0 %vm7792_vm1, %v7791_v57 }
 0x299   :  { %6833 = vmatmul.mubr.msk.bf16.vlgmr.msra.gmra.mrb[72].mxu1 %vm267_vm0, %v2237_v60  ;;  %6862 = vmatprep.subr.bf16.mxu0 %v7791_v57  ;;  %v7613_v60 = vld [vmem:[%s9358_s4 + $0x3c0] sm:$0xff]  }
 0x29a   :  { %6849 = vmatpush3.bf16.msra.mxu1 %v7581_v63  ;;  %6856 = vmatprep.mubr.msk.bf16.mxu1 %vm7792_vm1, %v7791_v57 }
 0x29b   :  { %6850 = vmatprep.subr.bf16.mxu1 %v7791_v57 }
 0x29c   :  { %6863 = vmatpush3.bf16.msra.mxu0 %v7582_v0 }
 0x29d   :  { %6864 = vmatprep.subr.bf16.mxu0 %v7791_v57 }
 0x29e   :  { %6851 = vmatpush3.bf16.msra.mxu1 %v7583_v1 }
 0x29f   :  { %6852 = vmatprep.subr.bf16.mxu1 %v7791_v57 }
 0x2a0   :  { %6865 = vmatpush3.bf16.msra.mxu0 %v7584_v2  ;;  %v7616_v2 = vld [vmem:[%s9358_s4 + $0x3f0] sm:$0xff]  }
 0x2a1   :  { %6866 = vmatprep.subr.bf16.mxu0 %v7791_v57 }
 0x2a2   :  { %6853 = vmatpush3.bf16.msra.mxu1 %v7585_v3 }
 0x2a3   :  { %6854 = vmatprep.subr.bf16.mxu1 %v7791_v57 }
 0x2a4   :  { %6867 = vmatpush3.bf16.msra.mxu0 %v7586_v4 }
 0x2a5   :  { %6884 = vmatprep.subr.bf16.mxu0 %v7791_v57 }
 0x2a6   :  { %6855 = vmatpush3.bf16.msra.mxu1 %v7587_v6 }
 0x2a7   :  { %6869 = vmatmul.mubr.msk.bf16.vlgmr.msra.gmra.mrb[76].mxu0 %vm267_vm0, %v2477_v36  ;;  %6872 = vmatprep.subr.bf16.mxu1 %v7791_v57  ;;  %v7617_v36 = vld [vmem:[%s9358_s4 + $0x3d0] sm:$0xff]  }
 0x2a8   :  { %6885 = vmatpush3.bf16.msra.mxu0 %v7588_v7  ;;  %6892 = vmatprep.mubr.msk.bf16.mxu0 %vm7792_vm1, %v7791_v57 }
 0x2a9   :  { %6857 = vmatmul.mubr.msk.bf16.vlgmr.msra.gmra.mrb[76].mxu1 %vm267_vm0, %v2400_v10  ;;  %6886 = vmatprep.subr.bf16.mxu0 %v7791_v57 }
 0x2aa   :  { %6873 = vmatpush3.bf16.msra.mxu1 %v7589_v8  ;;  %6880 = vmatprep.mubr.msk.bf16.mxu1 %vm7792_vm1, %v7791_v57 }
 0x2ab   :  { %6874 = vmatprep.subr.bf16.mxu1 %v7791_v57 }
 0x2ac   :  { %6887 = vmatpush3.bf16.msra.mxu0 %v7590_v11  ;;  %v7618_v11 = vld [vmem:[%s9358_s4 + $0x3f8] sm:$0xff]  }
 0x2ad   :  { %6888 = vmatprep.subr.bf16.mxu0 %v7791_v57 }
 0x2ae   :  { %6875 = vmatpush3.bf16.msra.mxu1 %v7591_v12  ;;  %v7619_v12 = vld [vmem:[%s9358_s4 + $0x3d8] sm:$0xff]  }
 0x2af   :  { %6876 = vmatprep.subr.bf16.mxu1 %v7791_v57 }
 0x2b0   :  { %6889 = vmatpush3.bf16.msra.mxu0 %v7592_v13  ;;  %v7620_v13 = vld [vmem:[%s9358_s4 + $0x420] sm:$0xff]  }
 0x2b1   :  { %6890 = vmatprep.subr.bf16.mxu0 %v7791_v57 }
 0x2b2   :  { %6877 = vmatpush3.bf16.msra.mxu1 %v7593_v15  ;;  %v7621_v15 = vld [vmem:[%s9358_s4 + $0x400] sm:$0xff]  }
 0x2b3   :  { %6878 = vmatprep.subr.bf16.mxu1 %v7791_v57 }
 0x2b4   :  { %6891 = vmatpush3.bf16.msra.mxu0 %v7594_v16  ;;  %v3018_v16 = vrot.slane %v2855_v9, 2 }
 0x2b5   :  { %6908 = vmatprep.subr.bf16.mxu0 %v7791_v57 }
 0x2b6   :  { %6879 = vmatpush3.bf16.msra.mxu1 %v7595_v5 }
 0x2b7   :  { %6893 = vmatmul.mubr.msk.bf16.vlgmr.msra.gmra.mrb[80].mxu0 %vm267_vm0, %v2632_v20  ;;  %6896 = vmatprep.subr.bf16.mxu1 %v7791_v57 }
 0x2b8   :  { %6909 = vmatpush3.bf16.msra.mxu0 %v7596_v19  ;;  %6916 = vmatprep.mubr.msk.bf16.mxu0 %vm7792_vm1, %v7791_v57  ;;  %v7623_v19 = vld [vmem:[%s9358_s4 + $0x408] sm:$0xff]  }
 0x2b9   :  { %6881 = vmatmul.mubr.msk.bf16.vlgmr.msra.gmra.mrb[80].mxu1 %vm267_vm0, %v2546_v18  ;;  %6910 = vmatprep.subr.bf16.mxu0 %v7791_v57  ;;  %v7622_v18 = vld [vmem:[%s9358_s4 + $0x428] sm:$0xff]  }
 0x2ba   :  { %6897 = vmatpush3.bf16.msra.mxu1 %v7597_v22  ;;  %6904 = vmatprep.mubr.msk.bf16.mxu1 %vm7792_vm1, %v7791_v57 }
 0x2bb   :  { %6898 = vmatprep.subr.bf16.mxu1 %v7791_v57 }
 0x2bc   :  { %6911 = vmatpush3.bf16.msra.mxu0 %v7598_v23 }
 0x2bd   :  { %6912 = vmatprep.subr.bf16.mxu0 %v7791_v57 }
 0x2be   :  { %6899 = vmatpush3.bf16.msra.mxu1 %v7599_v24  ;;  %v7624_v24 = vld [vmem:[%s9358_s4 + $0x430] sm:$0xff]  }
 0x2bf   :  { %6900 = vmatprep.subr.bf16.mxu1 %v7791_v57 }
 0x2c0   :  { %6913 = vmatpush3.bf16.msra.mxu0 %v7600_v25  ;;  %v686_v25 = vmax.f32 %v8193_v17, 0.0  ;;  %v7626_v17 = vld [vmem:[%s9358_s4 + $0x438] sm:$0xff]  }
 0x2c1   :  { %6914 = vmatprep.subr.bf16.mxu0 %v7791_v57 }
 0x2c2   :  { %6901 = vmatpush3.bf16.msra.mxu1 %v7601_v26 }
 0x2c3   :  { %6902 = vmatprep.subr.bf16.mxu1 %v7791_v57 }
 0x2c4   :  { %6915 = vmatpush3.bf16.msra.mxu0 %v7602_v27 }
 0x2c5   :  { %6932 = vmatprep.subr.bf16.mxu0 %v7791_v57 }
 0x2c6   :  { %6903 = vmatpush3.bf16.msra.mxu1 %v7603_v28 }
 0x2c7   :  { %6917 = vmatmul.mubr.msk.bf16.vlgmr.msra.gmra.mrb[84].mxu0 %vm267_vm0, %v2786_v42  ;;  %6920 = vmatprep.subr.bf16.mxu1 %v7791_v57  ;;  %v7625_v42 = vld [vmem:[%s9358_s4 + $0x410] sm:$0xff]  }
 0x2c8   :  { %6933 = vmatpush3.bf16.msra.mxu0 %v7604_v30  ;;  %6940 = vmatprep.mubr.msk.bf16.mxu0 %vm7792_vm1, %v7791_v57 }
 0x2c9   :  { %6905 = vmatmul.mubr.msk.bf16.vlgmr.msra.gmra.mrb[84].mxu1 %vm267_vm0, %v2709_v32  ;;  %6934 = vmatprep.subr.bf16.mxu0 %v7791_v57 }
 0x2ca   :  { %6921 = vmatpush3.bf16.msra.mxu1 %v7605_v31  ;;  %v841_v35 = vpop.f32.mrb[32].mxu0  ;;  %6928 = vmatprep.mubr.msk.bf16.mxu1 %vm7792_vm1, %v7791_v57 }
 0x2cb   :  { %v6606_v38 = vpop.f32.mrb[33].mxu0  ;;  %6922 = vmatprep.subr.bf16.mxu1 %v7791_v57 }
 0x2cc   :  { %6935 = vmatpush3.bf16.msra.mxu0 %v7606_v34  ;;  %v774_v39 = vpop.f32.mrb[32].mxu1  ;;  %v844_v40 = vpop.f32.mrb[34].mxu0  ;;  %v3164_v34 = vpack.c.bf16 %v686_v25, %v686_v25  ;;  %v7647_v25 = vld [vmem:[%s9358_s4 + $0x4c8] sm:$0xff]  }
 0x2cd   :  { %v842_v45 = vadd.f32 %v841_v35, %v774_v39  ;;  %v6594_v48 = vpop.f32.mrb[33].mxu1  ;;  %v6607_v49 = vpop.f32.mrb[35].mxu0  ;;  %6936 = vmatprep.subr.bf16.mxu0 %v7791_v57  ;;  %v7627_v35 = vld [vmem:[%s9358_s4 + $0x418] sm:$0xff]   ;;  %v7629_v39 = vld [vmem:[%s9358_s4 + $0x440] sm:$0xff]   ;;  %v7630_v40 = vld [vmem:[%s9358_s4 + $0x468] sm:$0xff]  }
 0x2ce   :  { %6923 = vmatpush3.bf16.msra.mxu1 %v7607_v37  ;;  %v777_v50 = vpop.f32.mrb[34].mxu1  ;;  %v7628_v37 = vld [vmem:[%s9358_s4 + $0x460] sm:$0xff]   ;;  %v3250_v38 = vrot.slane %v3164_v34, 1 }
 0x2cf   :  { %v6595_v52 = vpop.f32.mrb[35].mxu1  ;;  %6924 = vmatprep.subr.bf16.mxu1 %v7791_v57  ;;  %v7632_v50 = vld [vmem:[%s9358_s4 + $0x470] sm:$0xff]  }
 0x2d0   :  { %6937 = vmatpush3.bf16.msra.mxu0 %v7608_v43 }
 0x2d1   :  { %6938 = vmatprep.subr.bf16.mxu0 %v7791_v57 }
 0x2d2   :  { %6925 = vmatpush3.bf16.msra.mxu1 %v7609_v51 }
 0x2d3   :  { %6926 = vmatprep.subr.bf16.mxu1 %v7791_v57 }
 0x2d4   :  { %6939 = vmatpush3.bf16.msra.mxu0 %v7610_v54 }
 0x2d5   :  { %6956 = vmatprep.subr.bf16.mxu0 %v7791_v57 }
 0x2d6   :  { %6927 = vmatpush3.bf16.msra.mxu1 %v7611_v55  ;;  %v7633_v55 = vld [vmem:[%s9358_s4 + $0x450] sm:$0xff]  }
 0x2d7   :  { %6941 = vmatmul.mubr.msk.bf16.vlgmr.msra.gmra.mrb[88].mxu0 %vm267_vm0, %v2941_v59  ;;  %6944 = vmatprep.subr.bf16.mxu1 %v7791_v57 }
 0x2d8   :  { %6957 = vmatpush3.bf16.msra.mxu0 %v7612_v56  ;;  %6964 = vmatprep.mubr.msk.bf16.mxu0 %vm7792_vm1, %v7791_v57 }
 0x2d9   :  { %6929 = vmatmul.mubr.msk.bf16.vlgmr.msra.gmra.mrb[88].mxu1 %vm267_vm0, %v2855_v9  ;;  %6958 = vmatprep.subr.bf16.mxu0 %v7791_v57 }
 0x2da   :  { %v994_v61 = vpop.f32.mrb[36].mxu0  ;;  %6945 = vmatpush3.bf16.msra.mxu1 %v7613_v60  ;;  %6952 = vmatprep.mubr.msk.bf16.mxu1 %vm7792_vm1, %v7791_v57  ;;  %v7634_v60 = vld [vmem:[%s9358_s4 + $0x478] sm:$0xff]  }
 0x2db   :  { %v6630_v63 = vpop.f32.mrb[37].mxu0  ;;  %6946 = vmatprep.subr.bf16.mxu1 %v7791_v57 }
 0x2dc   :  { %v917_v0 = vpop.f32.mrb[36].mxu1  ;;  %v997_v1 = vpop.f32.mrb[38].mxu0  ;;  %6959 = vmatpush3.bf16.msra.mxu0 %v7614_v46  ;;  %v7635_v46 = vld [vmem:[%s9358_s4 + $0x458] sm:$0xff]   ;;  %v7637_v63 = vld [vmem:[%s9358_s4 + $0x480] sm:$0xff]  }
 0x2dd   :  { %v923_v3 = vadd.f32 %v917_v0, %v842_v45  ;;  %v6618_v4 = vpop.f32.mrb[37].mxu1  ;;  %v6631_v6 = vpop.f32.mrb[39].mxu0  ;;  %6960 = vmatprep.subr.bf16.mxu0 %v7791_v57  ;;  %v3327_v0 = vrot.slane %v3164_v34, 2  ;;  %v7638_v1 = vld [vmem:[%s9358_s4 + $0x4a8] sm:$0xff]  }
 0x2de   :  { %v920_v7 = vpop.f32.mrb[38].mxu1  ;;  %6947 = vmatpush3.bf16.msra.mxu1 %v7615_v62  ;;  %v3404_v62 = vrot.slane %v3164_v34, 3 }
 0x2df   :  { %v1000_v8 = vadd.f32 %v994_v61, %v923_v3  ;;  %v6619_v10 = vpop.f32.mrb[39].mxu1  ;;  %6948 = vmatprep.subr.bf16.mxu1 %v7791_v57  ;;  %v7636_v61 = vld [vmem:[%s9358_s4 + $0x4a0] sm:$0xff]   ;;  %v7639_v3 = vld [vmem:[%s9358_s4 + $0x488] sm:$0xff]  }
 0x2e0   :  { %6961 = vmatpush3.bf16.msra.mxu0 %v7616_v2 }
 0x2e1   :  { %6962 = vmatprep.subr.bf16.mxu0 %v7791_v57 }
 0x2e2   :  { %6949 = vmatpush3.bf16.msra.mxu1 %v7617_v36  ;;  %v7640_v36 = vld [vmem:[%s9358_s4 + $0x4b0] sm:$0xff]  }
 0x2e3   :  { %6950 = vmatprep.subr.bf16.mxu1 %v7791_v57 }
 0x2e4   :  { %6963 = vmatpush3.bf16.msra.mxu0 %v7618_v11 }
 0x2e5   :  { %6980 = vmatprep.subr.bf16.mxu0 %v7791_v57 }
 0x2e6   :  { %6951 = vmatpush3.bf16.msra.mxu1 %v7619_v12 }
 0x2e7   :  { %6965 = vmatmul.mubr.msk.bf16.vlgmr.msra.gmra.mrb[92].mxu0 %vm267_vm0, %v3095_v14  ;;  %6968 = vmatprep.subr.bf16.mxu1 %v7791_v57  ;;  %v7641_v14 = vld [vmem:[%s9358_s4 + $0x490] sm:$0xff]  }
 0x2e8   :  { %6981 = vmatpush3.bf16.msra.mxu0 %v7620_v13  ;;  %6988 = vmatprep.mubr.msk.bf16.mxu0 %vm7792_vm1, %v7791_v57 }
 0x2e9   :  { %6953 = vmatmul.mubr.msk.bf16.vlgmr.msra.gmra.mrb[92].mxu1 %vm267_vm0, %v3018_v16  ;;  %6982 = vmatprep.subr.bf16.mxu0 %v7791_v57 }
 0x2ea   :  { %v1149_v5 = vpop.f32.mrb[40].mxu0  ;;  %6969 = vmatpush3.bf16.msra.mxu1 %v7621_v15  ;;  %6976 = vmatprep.mubr.msk.bf16.mxu1 %vm7792_vm1, %v7791_v57 }
 0x2eb   :  { %v6654_v20 = vpop.f32.mrb[41].mxu0  ;;  %6970 = vmatprep.subr.bf16.mxu1 %v7791_v57 }
 0x2ec   :  { %v1071_v22 = vpop.f32.mrb[40].mxu1  ;;  %v1152_v23 = vpop.f32.mrb[42].mxu0  ;;  %6983 = vmatpush3.bf16.msra.mxu0 %v7622_v18 }
 0x2ed   :  { %v1077_v26 = vadd.f32 %v1071_v22, %v1000_v8  ;;  %v6642_v27 = vpop.f32.mrb[41].mxu1  ;;  %v6655_v28 = vpop.f32.mrb[43].mxu0  ;;  %6984 = vmatprep.subr.bf16.mxu0 %v7791_v57  ;;  %v687_v8 = vmax.f32 %v8202_v21, 0.0  ;;  %v7642_v21 = vld [vmem:[%s9358_s4 + $0x4b8] sm:$0xff]   ;;  %v7645_v22 = vld [vmem:[%s9358_s4 + $0x4c0] sm:$0xff]   ;;  %v7646_v23 = vld [vmem:[%s9358_s4 + $0x4e8] sm:$0xff]  }
 0x2ee   :  { %v1074_v30 = vpop.f32.mrb[42].mxu1  ;;  %6971 = vmatpush3.bf16.msra.mxu1 %v7623_v19  ;;  %v7644_v19 = vld [vmem:[%s9358_s4 + $0x4e0] sm:$0xff]  }
 0x2ef   :  { %v6643_v31 = vpop.f32.mrb[43].mxu1  ;;  %6972 = vmatprep.subr.bf16.mxu1 %v7791_v57  ;;  %v1155_v32 = vadd.f32 %v1149_v5, %v1077_v26  ;;  %v3473_v18 = vpack.c.bf16 %v687_v8, %v687_v8  ;;  %v7643_v5 = vld [vmem:[%s9358_s4 + $0x498] sm:$0xff]   ;;  %v7648_v30 = vld [vmem:[%s9358_s4 + $0x4f0] sm:$0xff]  }
 0x2f0   :  { %6985 = vmatpush3.bf16.msra.mxu0 %v7624_v24 }
 0x2f1   :  { %6986 = vmatprep.subr.bf16.mxu0 %v7791_v57  ;;  %v3559_v20 = vrot.slane %v3473_v18, 1 }
 0x2f2   :  { %6973 = vmatpush3.bf16.msra.mxu1 %v7625_v42 }
 0x2f3   :  { %6974 = vmatprep.subr.bf16.mxu1 %v7791_v57 }
 0x2f4   :  { %6987 = vmatpush3.bf16.msra.mxu0 %v7626_v17 }
 0x2f5   :  { %7004 = vmatprep.subr.bf16.mxu0 %v7791_v57 }
 0x2f6   :  { %6975 = vmatpush3.bf16.msra.mxu1 %v7627_v35 }
 0x2f7   :  { %6989 = vmatmul.mubr.msk.bf16.vlgmr.msra.gmra.mrb[96].mxu0 %vm267_vm0, %v3250_v38  ;;  %6992 = vmatprep.subr.bf16.mxu1 %v7791_v57  ;;  %v7650_v38 = vld [vmem:[%s9358_s4 + $0x4f8] sm:$0xff]  }
 0x2f8   :  { %7005 = vmatpush3.bf16.msra.mxu0 %v7628_v37  ;;  %7012 = vmatprep.mubr.msk.bf16.mxu0 %vm7792_vm1, %v7791_v57 }
 0x2f9   :  { %6977 = vmatmul.mubr.msk.bf16.vlgmr.msra.gmra.mrb[96].mxu1 %vm267_vm0, %v3164_v34  ;;  %7006 = vmatprep.subr.bf16.mxu0 %v7791_v57  ;;  %v7649_v34 = vld [vmem:[%s9358_s4 + $0x4d0] sm:$0xff]  }
 0x2fa   :  { %v1303_v43 = vpop.f32.mrb[44].mxu0  ;;  %6993 = vmatpush3.bf16.msra.mxu1 %v7629_v39  ;;  %7000 = vmatprep.mubr.msk.bf16.mxu1 %vm7792_vm1, %v7791_v57  ;;  %v7651_v39 = vld [vmem:[%s9358_s4 + $0x4d8] sm:$0xff]  }
 0x2fb   :  { %v6678_v45 = vpop.f32.mrb[45].mxu0  ;;  %6994 = vmatprep.subr.bf16.mxu1 %v7791_v57 }
 0x2fc   :  { %v1226_v48 = vpop.f32.mrb[44].mxu1  ;;  %v1306_v49 = vpop.f32.mrb[46].mxu0  ;;  %7007 = vmatpush3.bf16.msra.mxu0 %v7630_v40  ;;  %v7652_v40 = vld [vmem:[%s9358_s4 + $0x520] sm:$0xff]   ;;  %v3636_v45 = vrot.slane %v3473_v18, 2 }
 0x2fd   :  { %v1232_v51 = vadd.f32 %v1226_v48, %v1155_v32  ;;  %v6666_v52 = vpop.f32.mrb[45].mxu1  ;;  %v6679_v54 = vpop.f32.mrb[47].mxu0  ;;  %7008 = vmatprep.subr.bf16.mxu0 %v7791_v57  ;;  %v7654_v48 = vld [vmem:[%s9358_s4 + $0x528] sm:$0xff]  }
 0x2fe   :  { %v1229_v9 = vpop.f32.mrb[46].mxu1  ;;  %6995 = vmatpush3.bf16.msra.mxu1 %v7631_v44  ;;  %v7653_v44 = vld [vmem:[%s9358_s4 + $0x500] sm:$0xff]  }
 0x2ff   :  { %v6667_v56 = vpop.f32.mrb[47].mxu1  ;;  %6996 = vmatprep.subr.bf16.mxu1 %v7791_v57  ;;  %v1309_v59 = vadd.f32 %v1303_v43, %v1232_v51  ;;  %v3713_v43 = vrot.slane %v3473_v18, 3  ;;  %v7656_v9 = vld [vmem:[%s9358_s4 + $0x530] sm:$0xff]  }
 0x300   :  { %7009 = vmatpush3.bf16.msra.mxu0 %v7632_v50  ;;  %v7655_v50 = vld [vmem:[%s9358_s4 + $0x508] sm:$0xff]  }
 0x301   :  { %7010 = vmatprep.subr.bf16.mxu0 %v7791_v57 }
 0x302   :  { %6997 = vmatpush3.bf16.msra.mxu1 %v7633_v55  ;;  %v688_v55 = vmax.f32 %v8221_v29, 0.0  ;;  %v7658_v29 = vld [vmem:[%s9358_s4 + $0x538] sm:$0xff]  }
 0x303   :  { %6998 = vmatprep.subr.bf16.mxu1 %v7791_v57 }
 0x304   :  { %7011 = vmatpush3.bf16.msra.mxu0 %v7634_v60 }
 0x305   :  { %7028 = vmatprep.subr.bf16.mxu0 %v7791_v57 }
 0x306   :  { %6999 = vmatpush3.bf16.msra.mxu1 %v7635_v46 }
 0x307   :  { %7013 = vmatmul.mubr.msk.bf16.vlgmr.msra.gmra.mrb[100].mxu0 %vm267_vm0, %v3404_v62  ;;  %7016 = vmatprep.subr.bf16.mxu1 %v7791_v57 }
 0x308   :  { %7029 = vmatpush3.bf16.msra.mxu0 %v7636_v61  ;;  %7036 = vmatprep.mubr.msk.bf16.mxu0 %vm7792_vm1, %v7791_v57  ;;  %v7657_v61 = vld [vmem:[%s9358_s4 + $0x510] sm:$0xff]  }
 0x309   :  { %7001 = vmatmul.mubr.msk.bf16.vlgmr.msra.gmra.mrb[100].mxu1 %vm267_vm0, %v3327_v0  ;;  %7030 = vmatprep.subr.bf16.mxu0 %v7791_v57  ;;  %v3782_v0 = vpack.c.bf16 %v688_v55, %v688_v55 }
 0x30a   :  { %v1458_v2 = vpop.f32.mrb[48].mxu0  ;;  %7017 = vmatpush3.bf16.msra.mxu1 %v7637_v63  ;;  %7024 = vmatprep.mubr.msk.bf16.mxu1 %vm7792_vm1, %v7791_v57 }
 0x30b   :  { %v6702_v4 = vpop.f32.mrb[49].mxu0  ;;  %7018 = vmatprep.subr.bf16.mxu1 %v7791_v57 }
 0x30c   :  { %v1380_v6 = vpop.f32.mrb[48].mxu1  ;;  %v1461_v7 = vpop.f32.mrb[50].mxu0  ;;  %7031 = vmatpush3.bf16.msra.mxu0 %v7638_v1  ;;  %v7659_v1 = vld [vmem:[%s9358_s4 + $0x518] sm:$0xff]   ;;  %v7661_v4 = vld [vmem:[%s9358_s4 + $0x540] sm:$0xff]  }
 0x30d   :  { %v1386_v10 = vadd.f32 %v1380_v6, %v1309_v59  ;;  %v6690_v11 = vpop.f32.mrb[49].mxu1  ;;  %v6703_v12 = vpop.f32.mrb[51].mxu0  ;;  %7032 = vmatprep.subr.bf16.mxu0 %v7791_v57  ;;  %v7662_v6 = vld [vmem:[%s9358_s4 + $0x568] sm:$0xff]  }
 0x30e   :  { %v1383_v13 = vpop.f32.mrb[50].mxu1  ;;  %7019 = vmatpush3.bf16.msra.mxu1 %v7639_v3  ;;  %v3868_v3 = vrot.slane %v3782_v0, 1  ;;  %v7664_v12 = vld [vmem:[%s9358_s4 + $0x570] sm:$0xff]  }
 0x30f   :  { %v6691_v15 = vpop.f32.mrb[51].mxu1  ;;  %7020 = vmatprep.subr.bf16.mxu1 %v7791_v57  ;;  %v1464_v16 = vadd.f32 %v1458_v2, %v1386_v10  ;;  %v7660_v2 = vld [vmem:[%s9358_s4 + $0x560] sm:$0xff]  }
 0x310   :  { %7033 = vmatpush3.bf16.msra.mxu0 %v7640_v36  ;;  %v7663_v36 = vld [vmem:[%s9358_s4 + $0x548] sm:$0xff]  }
 0x311   :  { %7034 = vmatprep.subr.bf16.mxu0 %v7791_v57 }
 0x312   :  { %7021 = vmatpush3.bf16.msra.mxu1 %v7641_v14 }
 0x313   :  { %7022 = vmatprep.subr.bf16.mxu1 %v7791_v57 }
 0x314   :  { %7035 = vmatpush3.bf16.msra.mxu0 %v7642_v21  ;;  %v7665_v21 = vld [vmem:[%s9358_s4 + $0x550] sm:$0xff]  }
 0x315   :  { %7052 = vmatprep.subr.bf16.mxu0 %v7791_v57 }
 0x316   :  { %7023 = vmatpush3.bf16.msra.mxu1 %v7643_v5 }
 0x317   :  { %7037 = vmatmul.mubr.msk.bf16.vlgmr.msra.gmra.mrb[104].mxu0 %vm267_vm0, %v3559_v20  ;;  %7040 = vmatprep.subr.bf16.mxu1 %v7791_v57  ;;  %v7667_v20 = vld [vmem:[%s9358_s4 + $0x558] sm:$0xff]  }
 0x318   :  { %7053 = vmatpush3.bf16.msra.mxu0 %v7644_v19  ;;  %7060 = vmatprep.mubr.msk.bf16.mxu0 %vm7792_vm1, %v7791_v57  ;;  %v7666_v19 = vld [vmem:[%s9358_s4 + $0x578] sm:$0xff]  }
 0x319   :  { %7025 = vmatmul.mubr.msk.bf16.vlgmr.msra.gmra.mrb[104].mxu1 %vm267_vm0, %v3473_v18  ;;  %7054 = vmatprep.subr.bf16.mxu0 %v7791_v57 }
 0x31a   :  { %v1612_v24 = vpop.f32.mrb[52].mxu0  ;;  %7041 = vmatpush3.bf16.msra.mxu1 %v7645_v22  ;;  %7048 = vmatprep.mubr.msk.bf16.mxu1 %vm7792_vm1, %v7791_v57  ;;  %v7668_v22 = vld [vmem:[%s9358_s4 + $0x5a0] sm:$0xff]  }
 0x31b   :  { %v6726_v26 = vpop.f32.mrb[53].mxu0  ;;  %7042 = vmatprep.subr.bf16.mxu1 %v7791_v57 }
 0x31c   :  { %v1535_v27 = vpop.f32.mrb[52].mxu1  ;;  %v1615_v28 = vpop.f32.mrb[54].mxu0  ;;  %7055 = vmatpush3.bf16.msra.mxu0 %v7646_v23  ;;  %v4022_v23 = vrot.slane %v3782_v0, 3  ;;  %v7670_v26 = vld [vmem:[%s9358_s4 + $0x5a8] sm:$0xff]  }
 0x31d   :  { %v1541_v42 = vadd.f32 %v1535_v27, %v1464_v16  ;;  %v6714_v31 = vpop.f32.mrb[53].mxu1  ;;  %v6727_v32 = vpop.f32.mrb[55].mxu0  ;;  %7056 = vmatprep.subr.bf16.mxu0 %v7791_v57  ;;  %v7671_v28 = vld [vmem:[%s9358_s4 + $0x588] sm:$0xff]  }
 0x31e   :  { %v1538_v17 = vpop.f32.mrb[54].mxu1  ;;  %7043 = vmatpush3.bf16.msra.mxu1 %v7647_v25  ;;  %v3945_v25 = vrot.slane %v3782_v0, 2  ;;  %v7672_v32 = vld [vmem:[%s9358_s4 + $0x5b0] sm:$0xff]  }
 0x31f   :  { %v6715_v35 = vpop.f32.mrb[55].mxu1  ;;  %7044 = vmatprep.subr.bf16.mxu1 %v7791_v57  ;;  %v1618_v37 = vadd.f32 %v1612_v24, %v1541_v42  ;;  %v7669_v24 = vld [vmem:[%s9358_s4 + $0x580] sm:$0xff]   ;;  %v689_v17 = vmax.f32 %v8227_v33, 0.0  ;;  %v7674_v33 = vld [vmem:[%s9358_s4 + $0x5b8] sm:$0xff]  }
 0x320   :  { %7057 = vmatpush3.bf16.msra.mxu0 %v7648_v30 }
 0x321   :  { %7058 = vmatprep.subr.bf16.mxu0 %v7791_v57 }
 0x322   :  { %7045 = vmatpush3.bf16.msra.mxu1 %v7649_v34 }
 0x323   :  { %7046 = vmatprep.subr.bf16.mxu1 %v7791_v57 }
 0x324   :  { %7059 = vmatpush3.bf16.msra.mxu0 %v7650_v38 }
 0x325   :  { %7076 = vmatprep.subr.bf16.mxu0 %v7791_v57 }
 0x326   :  { %7047 = vmatpush3.bf16.msra.mxu1 %v7651_v39  ;;  %v7673_v39 = vld [vmem:[%s9358_s4 + $0x590] sm:$0xff]  }
 0x327   :  { %7061 = vmatmul.mubr.msk.bf16.vlgmr.msra.gmra.mrb[108].mxu0 %vm267_vm0, %v3713_v43  ;;  %7064 = vmatprep.subr.bf16.mxu1 %v7791_v57 }
 0x328   :  { %7077 = vmatpush3.bf16.msra.mxu0 %v7652_v40  ;;  %7084 = vmatprep.mubr.msk.bf16.mxu0 %vm7792_vm1, %v7791_v57 }
 0x329   :  { %7049 = vmatmul.mubr.msk.bf16.vlgmr.msra.gmra.mrb[108].mxu1 %vm267_vm0, %v3636_v45  ;;  %7078 = vmatprep.subr.bf16.mxu0 %v7791_v57  ;;  %v7675_v45 = vld [vmem:[%s9358_s4 + $0x598] sm:$0xff]  }
 0x32a   :  { %v1767_v49 = vpop.f32.mrb[56].mxu0  ;;  %7065 = vmatpush3.bf16.msra.mxu1 %v7653_v44  ;;  %7072 = vmatprep.mubr.msk.bf16.mxu1 %vm7792_vm1, %v7791_v57  ;;  %v4091_v44 = vpack.c.bf16 %v689_v17, %v689_v17 }
 0x32b   :  { %v6750_v51 = vpop.f32.mrb[57].mxu0  ;;  %7066 = vmatprep.subr.bf16.mxu1 %v7791_v57 }
 0x32c   :  { %v1689_v52 = vpop.f32.mrb[56].mxu1  ;;  %v1770_v54 = vpop.f32.mrb[58].mxu0  ;;  %7079 = vmatpush3.bf16.msra.mxu0 %v7654_v48  ;;  %v7676_v48 = vld [vmem:[%s9358_s4 + $0x5e0] sm:$0xff]   ;;  %v7678_v51 = vld [vmem:[%s9358_s4 + $0x5e8] sm:$0xff]  }
 0x32d   :  { %v1695_v56 = vadd.f32 %v1689_v52, %v1618_v37  ;;  %v6738_v59 = vpop.f32.mrb[57].mxu1  ;;  %v6751_v60 = vpop.f32.mrb[59].mxu0  ;;  %7080 = vmatprep.subr.bf16.mxu0 %v7791_v57  ;;  %v7679_v54 = vld [vmem:[%s9358_s4 + $0x5c8] sm:$0xff]  }
 0x32e   :  { %v1692_v46 = vpop.f32.mrb[58].mxu1  ;;  %7067 = vmatpush3.bf16.msra.mxu1 %v7655_v50  ;;  %v7677_v50 = vld [vmem:[%s9358_s4 + $0x5c0] sm:$0xff]   ;;  %v7680_v59 = vld [vmem:[%s9358_s4 + $0x5f0] sm:$0xff]  }
 0x32f   :  { %v6739_v62 = vpop.f32.mrb[59].mxu1  ;;  %7068 = vmatprep.subr.bf16.mxu1 %v7791_v57  ;;  %v1773_v63 = vadd.f32 %v1767_v49, %v1695_v56  ;;  %v4177_v49 = vrot.slane %v4091_v44, 1 }
 0x330   :  { %7081 = vmatpush3.bf16.msra.mxu0 %v7656_v9 }
 0x331   :  { %7082 = vmatprep.subr.bf16.mxu0 %v7791_v57 }
 0x332   :  { %7069 = vmatpush3.bf16.msra.mxu1 %v7657_v61 }
 0x333   :  { %7070 = vmatprep.subr.bf16.mxu1 %v7791_v57 }
 0x334   :  { %7083 = vmatpush3.bf16.msra.mxu0 %v7658_v29 }
 0x335   :  { %7100 = vmatprep.subr.bf16.mxu0 %v7791_v57 }
 0x336   :  { %7071 = vmatpush3.bf16.msra.mxu1 %v7659_v1  ;;  %v7682_v1 = vld [vmem:[%s9358_s4 + $0x5f8] sm:$0xff]  }
 0x337   :  { %7085 = vmatmul.mubr.msk.bf16.vlgmr.msra.gmra.mrb[112].mxu0 %vm267_vm0, %v3868_v3  ;;  %7088 = vmatprep.subr.bf16.mxu1 %v7791_v57  ;;  %v7684_v3 = vld [vmem:[%s9358_s4 + $0x620] sm:$0xff]  }
 0x338   :  { %7101 = vmatpush3.bf16.msra.mxu0 %v7660_v2  ;;  %7108 = vmatprep.mubr.msk.bf16.mxu0 %vm7792_vm1, %v7791_v57  ;;  %v7683_v2 = vld [vmem:[%s9358_s4 + $0x5d8] sm:$0xff]  }
 0x339   :  { %7073 = vmatmul.mubr.msk.bf16.vlgmr.msra.gmra.mrb[112].mxu1 %vm267_vm0, %v3782_v0  ;;  %7102 = vmatprep.subr.bf16.mxu0 %v7791_v57 }
 0x33a   :  { %v1921_v7 = vpop.f32.mrb[60].mxu0  ;;  %7089 = vmatpush3.bf16.msra.mxu1 %v7661_v4  ;;  %7096 = vmatprep.mubr.msk.bf16.mxu1 %vm7792_vm1, %v7791_v57  ;;  %v4331_v4 = vrot.slane %v4091_v44, 3 }
 0x33b   :  { %v6774_v8 = vpop.f32.mrb[61].mxu0  ;;  %7090 = vmatprep.subr.bf16.mxu1 %v7791_v57 }
 0x33c   :  { %v1844_v10 = vpop.f32.mrb[60].mxu1  ;;  %v1924_v11 = vpop.f32.mrb[62].mxu0  ;;  %7103 = vmatpush3.bf16.msra.mxu0 %v7662_v6  ;;  %v7685_v6 = vld [vmem:[%s9358_s4 + $0x600] sm:$0xff]  }
 0x33d   :  { %v1850_v13 = vadd.f32 %v1844_v10, %v1773_v63  ;;  %v6762_v14 = vpop.f32.mrb[61].mxu1  ;;  %v6775_v15 = vpop.f32.mrb[63].mxu0  ;;  %7104 = vmatprep.subr.bf16.mxu0 %v7791_v57  ;;  %v7681_v63 = vld [vmem:[%s9358_s4 + $0x5d0] sm:$0xff]   ;;  %v7687_v10 = vld [vmem:[%s9358_s4 + $0x608] sm:$0xff]  }
 0x33e   :  { %v1847_v16 = vpop.f32.mrb[62].mxu1  ;;  %7091 = vmatpush3.bf16.msra.mxu1 %v7663_v36  ;;  %v7686_v36 = vld [vmem:[%s9358_s4 + $0x628] sm:$0xff]   ;;  %v7688_v14 = vld [vmem:[%s9358_s4 + $0x630] sm:$0xff]   ;;  %v690_v15 = vmax.f32 %v8243_v41, 0.0  ;;  %v7690_v41 = vld [vmem:[%s9358_s4 + $0x638] sm:$0xff]  }
 0x33f   :  { %v6763_v18 = vpop.f32.mrb[63].mxu1  ;;  %7092 = vmatprep.subr.bf16.mxu1 %v7791_v57  ;;  %v1927_v5 = vadd.f32 %v1921_v7, %v1850_v13  ;;  %v4254_v7 = vrot.slane %v4091_v44, 2 }
 0x340   :  { %7105 = vmatpush3.bf16.msra.mxu0 %v7664_v12 }
 0x341   :  { %7106 = vmatprep.subr.bf16.mxu0 %v7791_v57 }
 0x342   :  { %7093 = vmatpush3.bf16.msra.mxu1 %v7665_v21 }
 0x343   :  { %7094 = vmatprep.subr.bf16.mxu1 %v7791_v57 }
 0x344   :  { %7107 = vmatpush3.bf16.msra.mxu0 %v7666_v19  ;;  %v7689_v19 = vld [vmem:[%s9358_s4 + $0x610] sm:$0xff]  }
 0x345   :  { %7124 = vmatprep.subr.bf16.mxu0 %v7791_v57 }
 0x346   :  { %7095 = vmatpush3.bf16.msra.mxu1 %v7667_v20 }
 0x347   :  { %7109 = vmatmul.mubr.msk.bf16.vlgmr.msra.gmra.mrb[116].mxu0 %vm267_vm0, %v4022_v23  ;;  %7112 = vmatprep.subr.bf16.mxu1 %v7791_v57  ;;  %v4400_v23 = vpack.c.bf16 %v690_v15, %v690_v15  ;;  %v7712_v15 = vld [vmem:[%s9358_s4 + $0x6f0] sm:$0xff]  }
 0x348   :  { %7125 = vmatpush3.bf16.msra.mxu0 %v7668_v22  ;;  %7132 = vmatprep.mubr.msk.bf16.mxu0 %vm7792_vm1, %v7791_v57 }
 0x349   :  { %7097 = vmatmul.mubr.msk.bf16.vlgmr.msra.gmra.mrb[116].mxu1 %vm267_vm0, %v3945_v25  ;;  %7126 = vmatprep.subr.bf16.mxu0 %v7791_v57  ;;  %v7692_v25 = vld [vmem:[%s9358_s4 + $0x660] sm:$0xff]  }
 0x34a   :  { %v2076_v27 = vpop.f32.mrb[64].mxu0  ;;  %7113 = vmatpush3.bf16.msra.mxu1 %v7669_v24  ;;  %7120 = vmatprep.mubr.msk.bf16.mxu1 %vm7792_vm1, %v7791_v57  ;;  %v7691_v24 = vld [vmem:[%s9358_s4 + $0x618] sm:$0xff]  }
 0x34b   :  { %v6798_v30 = vpop.f32.mrb[65].mxu0  ;;  %7114 = vmatprep.subr.bf16.mxu1 %v7791_v57 }
 0x34c   :  { %v1998_v42 = vpop.f32.mrb[64].mxu1  ;;  %v2079_v31 = vpop.f32.mrb[66].mxu0  ;;  %7127 = vmatpush3.bf16.msra.mxu0 %v7670_v26  ;;  %v4486_v26 = vrot.slane %v4400_v23, 1 }
 0x34d   :  { %v2004_v34 = vadd.f32 %v1998_v42, %v1927_v5  ;;  %v6786_v35 = vpop.f32.mrb[65].mxu1  ;;  %v6799_v37 = vpop.f32.mrb[67].mxu0  ;;  %7128 = vmatprep.subr.bf16.mxu0 %v7791_v57  ;;  %v7695_v42 = vld [vmem:[%s9358_s4 + $0x648] sm:$0xff]  }
 0x34e   :  { %v2001_v38 = vpop.f32.mrb[66].mxu1  ;;  %7115 = vmatpush3.bf16.msra.mxu1 %v7671_v28  ;;  %v7694_v28 = vld [vmem:[%s9358_s4 + $0x668] sm:$0xff]  }
 0x34f   :  { %v6787_v40 = vpop.f32.mrb[67].mxu1  ;;  %7116 = vmatprep.subr.bf16.mxu1 %v7791_v57  ;;  %v2082_v43 = vadd.f32 %v2076_v27, %v2004_v34  ;;  %v7693_v27 = vld [vmem:[%s9358_s4 + $0x640] sm:$0xff]   ;;  %v7696_v34 = vld [vmem:[%s9358_s4 + $0x670] sm:$0xff]  }
 0x350   :  { %7129 = vmatpush3.bf16.msra.mxu0 %v7672_v32  ;;  %v7697_v40 = vld [vmem:[%s9358_s4 + $0x650] sm:$0xff]  }
 0x351   :  { %7130 = vmatprep.subr.bf16.mxu0 %v7791_v57 }
 0x352   :  { %7117 = vmatpush3.bf16.msra.mxu1 %v7673_v39 }
 0x353   :  { %7118 = vmatprep.subr.bf16.mxu1 %v7791_v57 }
 0x354   :  { %7131 = vmatpush3.bf16.msra.mxu0 %v7674_v33 }
 0x355   :  { %7148 = vmatprep.subr.bf16.mxu0 %v7791_v57 }
 0x356   :  { %7119 = vmatpush3.bf16.msra.mxu1 %v7675_v45  ;;  %v7699_v45 = vld [vmem:[%s9358_s4 + $0x658] sm:$0xff]  }
 0x357   :  { %7133 = vmatmul.mubr.msk.bf16.vlgmr.msra.gmra.mrb[120].mxu0 %vm267_vm0, %v4177_v49  ;;  %7136 = vmatprep.subr.bf16.mxu1 %v7791_v57  ;;  %v4640_v49 = vrot.slane %v4400_v23, 3 }
 0x358   :  { %7149 = vmatpush3.bf16.msra.mxu0 %v7676_v48  ;;  %7156 = vmatprep.mubr.msk.bf16.mxu0 %vm7792_vm1, %v7791_v57  ;;  %v7700_v48 = vld [vmem:[%s9358_s4 + $0x6a0] sm:$0xff]  }
 0x359   :  { %7121 = vmatmul.mubr.msk.bf16.vlgmr.msra.gmra.mrb[120].mxu1 %vm267_vm0, %v4091_v44  ;;  %7150 = vmatprep.subr.bf16.mxu0 %v7791_v57  ;;  %v7698_v44 = vld [vmem:[%s9358_s4 + $0x678] sm:$0xff]  }
 0x35a   :  { %v2230_v52 = vpop.f32.mrb[68].mxu0  ;;  %7137 = vmatpush3.bf16.msra.mxu1 %v7677_v50  ;;  %7144 = vmatprep.mubr.msk.bf16.mxu1 %vm7792_vm1, %v7791_v57  ;;  %v7701_v50 = vld [vmem:[%s9358_s4 + $0x680] sm:$0xff]  }
 0x35b   :  { %v6822_v9 = vpop.f32.mrb[69].mxu0  ;;  %7138 = vmatprep.subr.bf16.mxu1 %v7791_v57 }
 0x35c   :  { %v2153_v55 = vpop.f32.mrb[68].mxu1  ;;  %v2233_v56 = vpop.f32.mrb[70].mxu0  ;;  %7151 = vmatpush3.bf16.msra.mxu0 %v7678_v51  ;;  %v4563_v51 = vrot.slane %v4400_v23, 2  ;;  %v7703_v9 = vld [vmem:[%s9358_s4 + $0x688] sm:$0xff]  }
 0x35d   :  { %v2159_v60 = vadd.f32 %v2153_v55, %v2082_v43  ;;  %v6810_v46 = vpop.f32.mrb[69].mxu1  ;;  %v6823_v61 = vpop.f32.mrb[71].mxu0  ;;  %7152 = vmatprep.subr.bf16.mxu0 %v7791_v57 }
 0x35e   :  { %v2156_v62 = vpop.f32.mrb[70].mxu1  ;;  %7139 = vmatpush3.bf16.msra.mxu1 %v7679_v54  ;;  %v691_v46 = vmax.f32 %v8253_v47, 0.0  ;;  %v7706_v47 = vld [vmem:[%s9358_s4 + $0x6b8] sm:$0xff]  }
 0x35f   :  { %v6811_v29 = vpop.f32.mrb[71].mxu1  ;;  %7140 = vmatprep.subr.bf16.mxu1 %v7791_v57  ;;  %v2236_v0 = vadd.f32 %v2230_v52, %v2159_v60  ;;  %v7702_v52 = vld [vmem:[%s9358_s4 + $0x6a8] sm:$0xff]   ;;  %v7704_v60 = vld [vmem:[%s9358_s4 + $0x6b0] sm:$0xff]  }
 0x360   :  { %7153 = vmatpush3.bf16.msra.mxu0 %v7680_v59 }
 0x361   :  { %7154 = vmatprep.subr.bf16.mxu0 %v7791_v57 }
 0x362   :  { %7141 = vmatpush3.bf16.msra.mxu1 %v7681_v63 }
 0x363   :  { %7142 = vmatprep.subr.bf16.mxu1 %v7791_v57 }
 0x364   :  { %7155 = vmatpush3.bf16.msra.mxu0 %v7682_v1 }
 0x365   :  { %7172 = vmatprep.subr.bf16.mxu0 %v7791_v57 }
 0x366   :  { %7143 = vmatpush3.bf16.msra.mxu1 %v7683_v2 }
 0x367   :  { %7157 = vmatmul.mubr.msk.bf16.vlgmr.msra.gmra.mrb[124].mxu0 %vm267_vm0, %v4331_v4  ;;  %7160 = vmatprep.subr.bf16.mxu1 %v7791_v57  ;;  %v7707_v4 = vld [vmem:[%s9358_s4 + $0x698] sm:$0xff]  }
 0x368   :  { %7173 = vmatpush3.bf16.msra.mxu0 %v7684_v3  ;;  %7180 = vmatprep.mubr.msk.bf16.mxu0 %vm7792_vm1, %v7791_v57  ;;  %v4709_v3 = vpack.c.bf16 %v691_v46, %v691_v46 }
 0x369   :  { %7145 = vmatmul.mubr.msk.bf16.vlgmr.msra.gmra.mrb[124].mxu1 %vm267_vm0, %v4254_v7  ;;  %7174 = vmatprep.subr.bf16.mxu0 %v7791_v57 }
 0x36a   :  { %v2385_v8 = vpop.f32.mrb[72].mxu0  ;;  %7161 = vmatpush3.bf16.msra.mxu1 %v7685_v6  ;;  %7168 = vmatprep.mubr.msk.bf16.mxu1 %vm7792_vm1, %v7791_v57  ;;  %v7708_v6 = vld [vmem:[%s9358_s4 + $0x6e0] sm:$0xff]   ;;  %v4795_v7 = vrot.slane %v4709_v3, 1 }
 0x36b   :  { %v6846_v11 = vpop.f32.mrb[73].mxu0  ;;  %7162 = vmatprep.subr.bf16.mxu1 %v7791_v57 }
 0x36c   :  { %v2307_v12 = vpop.f32.mrb[72].mxu1  ;;  %v2388_v13 = vpop.f32.mrb[74].mxu0  ;;  %7175 = vmatpush3.bf16.msra.mxu0 %v7686_v36  ;;  %v7709_v36 = vld [vmem:[%s9358_s4 + $0x6c0] sm:$0xff]   ;;  %v7711_v11 = vld [vmem:[%s9358_s4 + $0x6c8] sm:$0xff]  }
 0x36d   :  { %v2313_v16 = vadd.f32 %v2307_v12, %v2236_v0  ;;  %v6834_v21 = vpop.f32.mrb[73].mxu1  ;;  %v6847_v18 = vpop.f32.mrb[75].mxu0  ;;  %7176 = vmatprep.subr.bf16.mxu0 %v7791_v57  ;;  %v7705_v0 = vld [vmem:[%s9358_s4 + $0x690] sm:$0xff]  }
 0x36e   :  { %v2310_v5 = vpop.f32.mrb[74].mxu1  ;;  %7163 = vmatpush3.bf16.msra.mxu1 %v7687_v10 }
 0x36f   :  { %v6835_v20 = vpop.f32.mrb[75].mxu1  ;;  %7164 = vmatprep.subr.bf16.mxu1 %v7791_v57  ;;  %v2391_v22 = vadd.f32 %v2385_v8, %v2313_v16  ;;  %v7710_v8 = vld [vmem:[%s9358_s4 + $0x6e8] sm:$0xff]  }
 0x370   :  { %7177 = vmatpush3.bf16.msra.mxu0 %v7688_v14 }
 0x371   :  { %7178 = vmatprep.subr.bf16.mxu0 %v7791_v57 }
 0x372   :  { %7165 = vmatpush3.bf16.msra.mxu1 %v7689_v19  ;;  %v7713_v19 = vld [vmem:[%s9358_s4 + $0x6d0] sm:$0xff]  }
 0x373   :  { %7166 = vmatprep.subr.bf16.mxu1 %v7791_v57 }
 0x374   :  { %7179 = vmatpush3.bf16.msra.mxu0 %v7690_v41  ;;  %v7714_v41 = vld [vmem:[%s9358_s4 + $0x6f8] sm:$0xff]  }
 0x375   :  { %7196 = vmatprep.subr.bf16.mxu0 %v7791_v57 }
 0x376   :  { %7167 = vmatpush3.bf16.msra.mxu1 %v7691_v24  ;;  %v7716_v24 = vld [vmem:[%s9358_s4 + $0x720] sm:$0xff]  }
 0x377   :  { %7181 = vmatmul.mubr.msk.bf16.vlgmr.msra.gmra.mrb[128].mxu0 %vm267_vm0, %v4486_v26  ;;  %7184 = vmatprep.subr.bf16.mxu1 %v7791_v57  ;;  %v7717_v26 = vld [vmem:[%s9358_s4 + $0x700] sm:$0xff]  }
 0x378   :  { %7197 = vmatpush3.bf16.msra.mxu0 %v7692_v25  ;;  %7204 = vmatprep.mubr.msk.bf16.mxu0 %vm7792_vm1, %v7791_v57  ;;  %v4949_v25 = vrot.slane %v4709_v3, 3 }
 0x379   :  { %7169 = vmatmul.mubr.msk.bf16.vlgmr.msra.gmra.mrb[128].mxu1 %vm267_vm0, %v4400_v23  ;;  %7198 = vmatprep.subr.bf16.mxu0 %v7791_v57  ;;  %v7715_v23 = vld [vmem:[%s9358_s4 + $0x6d8] sm:$0xff]  }
 0x37a   :  { %v2539_v30 = vpop.f32.mrb[76].mxu0  ;;  %7185 = vmatpush3.bf16.msra.mxu1 %v7693_v27  ;;  %7192 = vmatprep.mubr.msk.bf16.mxu1 %vm7792_vm1, %v7791_v57  ;;  %v4872_v27 = vrot.slane %v4709_v3, 2 }
 0x37b   :  { %v6870_v31 = vpop.f32.mrb[77].mxu0  ;;  %7186 = vmatprep.subr.bf16.mxu1 %v7791_v57 }
 0x37c   :  { %v2462_v32 = vpop.f32.mrb[76].mxu1  ;;  %v2542_v17 = vpop.f32.mrb[78].mxu0  ;;  %7199 = vmatpush3.bf16.msra.mxu0 %v7694_v28  ;;  %v7718_v28 = vld [vmem:[%s9358_s4 + $0x728] sm:$0xff]  }
 0x37d   :  { %v2468_v35 = vadd.f32 %v2462_v32, %v2391_v22  ;;  %v6858_v37 = vpop.f32.mrb[77].mxu1  ;;  %v6871_v38 = vpop.f32.mrb[79].mxu0  ;;  %7200 = vmatprep.subr.bf16.mxu0 %v7791_v57 }
 0x37e   :  { %v2465_v39 = vpop.f32.mrb[78].mxu1  ;;  %7187 = vmatpush3.bf16.msra.mxu1 %v7695_v42  ;;  %v7719_v42 = vld [vmem:[%s9358_s4 + $0x708] sm:$0xff]  }
 0x37f   :  { %v6859_v43 = vpop.f32.mrb[79].mxu1  ;;  %7188 = vmatprep.subr.bf16.mxu1 %v7791_v57  ;;  %v2545_v33 = vadd.f32 %v2539_v30, %v2468_v35  ;;  %v692_v35 = vmax.f32 %v8269_v53, 0.0  ;;  %v7722_v53 = vld [vmem:[%s9358_s4 + $0x738] sm:$0xff]  }
 0x380   :  { %7201 = vmatpush3.bf16.msra.mxu0 %v7696_v34  ;;  %v7720_v34 = vld [vmem:[%s9358_s4 + $0x730] sm:$0xff]  }
 0x381   :  { %7202 = vmatprep.subr.bf16.mxu0 %v7791_v57  ;;  %v7721_v43 = vld [vmem:[%s9358_s4 + $0x710] sm:$0xff]  }
 0x382   :  { %7189 = vmatpush3.bf16.msra.mxu1 %v7697_v40 }
 0x383   :  { %7190 = vmatprep.subr.bf16.mxu1 %v7791_v57 }
 0x384   :  { %7203 = vmatpush3.bf16.msra.mxu0 %v7698_v44 }
 0x385   :  { %7220 = vmatprep.subr.bf16.mxu0 %v7791_v57 }
 0x386   :  { %7191 = vmatpush3.bf16.msra.mxu1 %v7699_v45  ;;  %v5018_v45 = vpack.c.bf16 %v692_v35, %v692_v35 }
 0x387   :  { %7205 = vmatmul.mubr.msk.bf16.vlgmr.msra.gmra.mrb[132].mxu0 %vm267_vm0, %v4640_v49  ;;  %7208 = vmatprep.subr.bf16.mxu1 %v7791_v57  ;;  %v7724_v49 = vld [vmem:[%s9358_s4 + $0x760] sm:$0xff]  }
 0x388   :  { %7221 = vmatpush3.bf16.msra.mxu0 %v7700_v48  ;;  %7228 = vmatprep.mubr.msk.bf16.mxu0 %vm7792_vm1, %v7791_v57  ;;  %v7723_v48 = vld [vmem:[%s9358_s4 + $0x718] sm:$0xff]  }
 0x389   :  { %7193 = vmatmul.mubr.msk.bf16.vlgmr.msra.gmra.mrb[132].mxu1 %vm267_vm0, %v4563_v51  ;;  %7222 = vmatprep.subr.bf16.mxu0 %v7791_v57  ;;  %v7725_v51 = vld [vmem:[%s9358_s4 + $0x740] sm:$0xff]  }
 0x38a   :  { %v2694_v54 = vpop.f32.mrb[80].mxu0  ;;  %7209 = vmatpush3.bf16.msra.mxu1 %v7701_v50  ;;  %7216 = vmatprep.mubr.msk.bf16.mxu1 %vm7792_vm1, %v7791_v57  ;;  %v5104_v50 = vrot.slane %v5018_v45, 1 }
 0x38b   :  { %v6894_v55 = vpop.f32.mrb[81].mxu0  ;;  %7210 = vmatprep.subr.bf16.mxu1 %v7791_v57 }
 0x38c   :  { %v2616_v56 = vpop.f32.mrb[80].mxu1  ;;  %v2697_v59 = vpop.f32.mrb[82].mxu0  ;;  %7223 = vmatpush3.bf16.msra.mxu0 %v7702_v52  ;;  %v7726_v52 = vld [vmem:[%s9358_s4 + $0x768] sm:$0xff]  }
 0x38d   :  { %v2622_v61 = vadd.f32 %v2616_v56, %v2545_v33  ;;  %v6882_v62 = vpop.f32.mrb[81].mxu1  ;;  %v6895_v63 = vpop.f32.mrb[83].mxu0  ;;  %7224 = vmatprep.subr.bf16.mxu0 %v7791_v57 }
 0x38e   :  { %v2619_v29 = vpop.f32.mrb[82].mxu1  ;;  %7211 = vmatpush3.bf16.msra.mxu1 %v7703_v9  ;;  %v7727_v9 = vld [vmem:[%s9358_s4 + $0x748] sm:$0xff]  }
 0x38f   :  { %v6883_v1 = vpop.f32.mrb[83].mxu1  ;;  %7212 = vmatprep.subr.bf16.mxu1 %v7791_v57  ;;  %v2700_v2 = vadd.f32 %v2694_v54, %v2622_v61  ;;  %v7729_v29 = vld [vmem:[%s9358_s4 + $0x750] sm:$0xff]  }
 0x390   :  { %7225 = vmatpush3.bf16.msra.mxu0 %v7704_v60  ;;  %v7728_v60 = vld [vmem:[%s9358_s4 + $0x770] sm:$0xff]  }
 0x391   :  { %7226 = vmatprep.subr.bf16.mxu0 %v7791_v57 }
 0x392   :  { %7213 = vmatpush3.bf16.msra.mxu1 %v7705_v0 }
 0x393   :  { %7214 = vmatprep.subr.bf16.mxu1 %v7791_v57 }
 0x394   :  { %7227 = vmatpush3.bf16.msra.mxu0 %v7706_v47  ;;  %v7731_v47 = vld [vmem:[%s9358_s4 + $0x758] sm:$0xff]  }
 0x395   :  { %7244 = vmatprep.subr.bf16.mxu0 %v7791_v57 }
 0x396   :  { %7215 = vmatpush3.bf16.msra.mxu1 %v7707_v4  ;;  %v5258_v4 = vrot.slane %v5018_v45, 3 }
 0x397   :  { %7229 = vmatmul.mubr.msk.bf16.vlgmr.msra.gmra.mrb[136].mxu0 %vm267_vm0, %v4795_v7  ;;  %7232 = vmatprep.subr.bf16.mxu1 %v7791_v57  ;;  %v5181_v7 = vrot.slane %v5018_v45, 2 }
 0x398   :  { %7245 = vmatpush3.bf16.msra.mxu0 %v7708_v6  ;;  %7252 = vmatprep.mubr.msk.bf16.mxu0 %vm7792_vm1, %v7791_v57  ;;  %v7733_v6 = vld [vmem:[%s9358_s4 + $0x780] sm:$0xff]  }
 0x399   :  { %7217 = vmatmul.mubr.msk.bf16.vlgmr.msra.gmra.mrb[136].mxu1 %vm267_vm0, %v4709_v3  ;;  %7246 = vmatprep.subr.bf16.mxu0 %v7791_v57  ;;  %v7732_v3 = vld [vmem:[%s9358_s4 + $0x7a0] sm:$0xff]  }
 0x39a   :  { %v2848_v10 = vpop.f32.mrb[84].mxu0  ;;  %7233 = vmatpush3.bf16.msra.mxu1 %v7709_v36  ;;  %7240 = vmatprep.mubr.msk.bf16.mxu1 %vm7792_vm1, %v7791_v57  ;;  %v7734_v36 = vld [vmem:[%s9358_s4 + $0x7a8] sm:$0xff]  }
 0x39b   :  { %v6918_v12 = vpop.f32.mrb[85].mxu0  ;;  %7234 = vmatprep.subr.bf16.mxu1 %v7791_v57 }
 0x39c   :  { %v2771_v13 = vpop.f32.mrb[84].mxu1  ;;  %v2851_v14 = vpop.f32.mrb[86].mxu0  ;;  %7247 = vmatpush3.bf16.msra.mxu0 %v7710_v8 }
 0x39d   :  { %v2777_v16 = vadd.f32 %v2771_v13, %v2700_v2  ;;  %v6906_v21 = vpop.f32.mrb[85].mxu1  ;;  %v6919_v18 = vpop.f32.mrb[87].mxu0  ;;  %7248 = vmatprep.subr.bf16.mxu0 %v7791_v57  ;;  %v7730_v2 = vld [vmem:[%s9358_s4 + $0x778] sm:$0xff]   ;;  %v7736_v14 = vld [vmem:[%s9358_s4 + $0x7b0] sm:$0xff]  }
 0x39e   :  { %v2774_v5 = vpop.f32.mrb[86].mxu1  ;;  %7235 = vmatpush3.bf16.msra.mxu1 %v7711_v11 }
 0x39f   :  { %v6907_v20 = vpop.f32.mrb[87].mxu1  ;;  %7236 = vmatprep.subr.bf16.mxu1 %v7791_v57  ;;  %v2854_v22 = vadd.f32 %v2848_v10, %v2777_v16  ;;  %v7735_v10 = vld [vmem:[%s9358_s4 + $0x788] sm:$0xff]  }
 0x3a0   :  { %7249 = vmatpush3.bf16.msra.mxu0 %v7712_v15  ;;  %v693_v15 = vmax.f32 %v8275_v58, 0.0  ;;  %v7738_v58 = vld [vmem:[%s9358_s4 + $0x7b8] sm:$0xff]  }
 0x3a1   :  { %7250 = vmatprep.subr.bf16.mxu0 %v7791_v57 }
 0x3a2   :  { %7237 = vmatpush3.bf16.msra.mxu1 %v7713_v19  ;;  %v7737_v19 = vld [vmem:[%s9358_s4 + $0x790] sm:$0xff]  }
 0x3a3   :  { %7238 = vmatprep.subr.bf16.mxu1 %v7791_v57 }
 0x3a4   :  { %7251 = vmatpush3.bf16.msra.mxu0 %v7714_v41  ;;  %v5327_v41 = vpack.c.bf16 %v693_v15, %v693_v15 }
 0x3a5   :  { %7268 = vmatprep.subr.bf16.mxu0 %v7791_v57 }
 0x3a6   :  { %7239 = vmatpush3.bf16.msra.mxu1 %v7715_v23  ;;  %v7739_v23 = vld [vmem:[%s9358_s4 + $0x798] sm:$0xff]  }
 0x3a7   :  { %7253 = vmatmul.mubr.msk.bf16.vlgmr.msra.gmra.mrb[140].mxu0 %vm267_vm0, %v4949_v25  ;;  %7256 = vmatprep.subr.bf16.mxu1 %v7791_v57  ;;  %v5413_v25 = vrot.slane %v5327_v41, 1 }
 0x3a8   :  { %7269 = vmatpush3.bf16.msra.mxu0 %v7716_v24  ;;  %7276 = vmatprep.mubr.msk.bf16.mxu0 %vm7792_vm1, %v7791_v57  ;;  %v7740_v24 = vld [vmem:[%s9358_s4 + $0x7e0] sm:$0xff]  }
 0x3a9   :  { %7241 = vmatmul.mubr.msk.bf16.vlgmr.msra.gmra.mrb[140].mxu1 %vm267_vm0, %v4872_v27  ;;  %7270 = vmatprep.subr.bf16.mxu0 %v7791_v57  ;;  %v7742_v27 = vld [vmem:[%s9358_s4 + $0x7e8] sm:$0xff]  }
 0x3aa   :  { %v3003_v30 = vpop.f32.mrb[88].mxu0  ;;  %7257 = vmatpush3.bf16.msra.mxu1 %v7717_v26  ;;  %7264 = vmatprep.mubr.msk.bf16.mxu1 %vm7792_vm1, %v7791_v57  ;;  %v7741_v26 = vld [vmem:[%s9358_s4 + $0x7c0] sm:$0xff]  }
 0x3ab   :  { %v6942_v31 = vpop.f32.mrb[89].mxu0  ;;  %7258 = vmatprep.subr.bf16.mxu1 %v7791_v57 }
 0x3ac   :  { %v2925_v32 = vpop.f32.mrb[88].mxu1  ;;  %v3006_v17 = vpop.f32.mrb[90].mxu0  ;;  %7271 = vmatpush3.bf16.msra.mxu0 %v7718_v28 }
 0x3ad   :  { %v2931_v37 = vadd.f32 %v2925_v32, %v2854_v22  ;;  %v6930_v38 = vpop.f32.mrb[89].mxu1  ;;  %v6943_v39 = vpop.f32.mrb[91].mxu0  ;;  %7272 = vmatprep.subr.bf16.mxu0 %v7791_v57  ;;  %v7744_v17 = vld [vmem:[%s9358_s4 + $0x7f0] sm:$0xff]  }
 0x3ae   :  { %v2928_v40 = vpop.f32.mrb[90].mxu1  ;;  %7259 = vmatpush3.bf16.msra.mxu1 %v7719_v42  ;;  %v7745_v39 = vld [vmem:[%s9358_s4 + $0x7d0] sm:$0xff]  }
 0x3af   :  { %v6931_v33 = vpop.f32.mrb[91].mxu1  ;;  %7260 = vmatprep.subr.bf16.mxu1 %v7791_v57  ;;  %v3009_v44 = vadd.f32 %v3003_v30, %v2931_v37  ;;  %v7743_v30 = vld [vmem:[%s9358_s4 + $0x7c8] sm:$0xff]  }
 0x3b0   :  { %7273 = vmatpush3.bf16.msra.mxu0 %v7720_v34  ;;  %v7746_v33 = vld [vmem:[%s9358_s4 + $0x7f8] sm:$0xff]  }
 0x3b1   :  { %7274 = vmatprep.subr.bf16.mxu0 %v7791_v57 }
 0x3b2   :  { %7261 = vmatpush3.bf16.msra.mxu1 %v7721_v43 }
 0x3b3   :  { %7262 = vmatprep.subr.bf16.mxu1 %v7791_v57 }
 0x3b4   :  { %7275 = vmatpush3.bf16.msra.mxu0 %v7722_v53  ;;  %v5567_v53 = vrot.slane %v5327_v41, 3 }
 0x3b5   :  { %7292 = vmatprep.subr.bf16.mxu0 %v7791_v57 }
 0x3b6   :  { %7263 = vmatpush3.bf16.msra.mxu1 %v7723_v48 }
 0x3b7   :  { %7277 = vmatmul.mubr.msk.bf16.vlgmr.msra.gmra.mrb[144].mxu0 %vm267_vm0, %v5104_v50  ;;  %7280 = vmatprep.subr.bf16.mxu1 %v7791_v57 }
 0x3b8   :  { %7293 = vmatpush3.bf16.msra.mxu0 %v7724_v49  ;;  %7300 = vmatprep.mubr.msk.bf16.mxu0 %vm7792_vm1, %v7791_v57 }
 0x3b9   :  { %7265 = vmatmul.mubr.msk.bf16.vlgmr.msra.gmra.mrb[144].mxu1 %vm267_vm0, %v5018_v45  ;;  %7294 = vmatprep.subr.bf16.mxu0 %v7791_v57  ;;  %v5490_v45 = vrot.slane %v5327_v41, 2 }
 0x3ba   :  { %v3157_v54 = vpop.f32.mrb[92].mxu0  ;;  %7281 = vmatpush3.bf16.msra.mxu1 %v7725_v51  ;;  %7288 = vmatprep.mubr.msk.bf16.mxu1 %vm7792_vm1, %v7791_v57 }
 0x3bb   :  { %v6966_v55 = vpop.f32.mrb[93].mxu0  ;;  %7282 = vmatprep.subr.bf16.mxu1 %v7791_v57 }
 0x3bc   :  { %v3080_v56 = vpop.f32.mrb[92].mxu1  ;;  %v3160_v59 = vpop.f32.mrb[94].mxu0  ;;  %7295 = vmatpush3.bf16.msra.mxu0 %v7726_v52 }
 0x3bd   :  { %v3086_v46 = vadd.f32 %v3080_v56, %v3009_v44  ;;  %v6954_v61 = vpop.f32.mrb[93].mxu1  ;;  %v6967_v62 = vpop.f32.mrb[95].mxu0  ;;  %7296 = vmatprep.subr.bf16.mxu0 %v7791_v57  ;;  %v7747_v44 = vld [vmem:[%s9358_s4 + $0x7d8] sm:$0xff]  }
 0x3be   :  { %v3083_v63 = vpop.f32.mrb[94].mxu1  ;;  %7283 = vmatpush3.bf16.msra.mxu1 %v7727_v9 }
 0x3bf   :  { %v6955_v0 = vpop.f32.mrb[95].mxu1  ;;  %7284 = vmatprep.subr.bf16.mxu1 %v7791_v57  ;;  %v3163_v1 = vadd.f32 %v3157_v54, %v3086_v46 }
 0x3c0   :  { %7297 = vmatpush3.bf16.msra.mxu0 %v7728_v60 }
 0x3c1   :  { %7298 = vmatprep.subr.bf16.mxu0 %v7791_v57 }
 0x3c2   :  { %7285 = vmatpush3.bf16.msra.mxu1 %v7729_v29 }
 0x3c3   :  { %7286 = vmatprep.subr.bf16.mxu1 %v7791_v57 }
 0x3c4   :  { %7299 = vmatpush3.bf16.msra.mxu0 %v7730_v2 }
 0x3c5   :  { %7316 = vmatprep.subr.bf16.mxu0 %v7791_v57 }
 0x3c6   :  { %7287 = vmatpush3.bf16.msra.mxu1 %v7731_v47 }
 0x3c7   :  { %7301 = vmatmul.mubr.msk.bf16.vlgmr.msra.gmra.mrb[148].mxu0 %vm267_vm0, %v5258_v4  ;;  %7304 = vmatprep.subr.bf16.mxu1 %v7791_v57 }
 0x3c8   :  { %7317 = vmatpush3.bf16.msra.mxu0 %v7732_v3  ;;  %7324 = vmatprep.mubr.msk.bf16.mxu0 %vm7792_vm1, %v7791_v57 }
 0x3c9   :  { %7289 = vmatmul.mubr.msk.bf16.vlgmr.msra.gmra.mrb[148].mxu1 %vm267_vm0, %v5181_v7  ;;  %7318 = vmatprep.subr.bf16.mxu0 %v7791_v57 }
 0x3ca   :  { %v3312_v8 = vpop.f32.mrb[96].mxu0  ;;  %7305 = vmatpush3.bf16.msra.mxu1 %v7733_v6  ;;  %7312 = vmatprep.mubr.msk.bf16.mxu1 %vm7792_vm1, %v7791_v57 }
 0x3cb   :  { %v6990_v11 = vpop.f32.mrb[97].mxu0  ;;  %7306 = vmatprep.subr.bf16.mxu1 %v7791_v57 }
 0x3cc   :  { %v3234_v12 = vpop.f32.mrb[96].mxu1  ;;  %v3315_v13 = vpop.f32.mrb[98].mxu0  ;;  %7319 = vmatpush3.bf16.msra.mxu0 %v7734_v36 }
 0x3cd   :  { %v3240_v16 = vadd.f32 %v3234_v12, %v3163_v1  ;;  %v6978_v21 = vpop.f32.mrb[97].mxu1  ;;  %v6991_v18 = vpop.f32.mrb[99].mxu0  ;;  %7320 = vmatprep.subr.bf16.mxu0 %v7791_v57 }
 0x3ce   :  { %v3237_v5 = vpop.f32.mrb[98].mxu1  ;;  %7307 = vmatpush3.bf16.msra.mxu1 %v7735_v10 }
 0x3cf   :  { %v6979_v20 = vpop.f32.mrb[99].mxu1  ;;  %7308 = vmatprep.subr.bf16.mxu1 %v7791_v57  ;;  %v3318_v22 = vadd.f32 %v3312_v8, %v3240_v16 }
 0x3d0   :  { %7321 = vmatpush3.bf16.msra.mxu0 %v7736_v14 }
 0x3d1   :  { %7322 = vmatprep.subr.bf16.mxu0 %v7791_v57 }
 0x3d2   :  { %7309 = vmatpush3.bf16.msra.mxu1 %v7737_v19 }
 0x3d3   :  { %7310 = vmatprep.subr.bf16.mxu1 %v7791_v57 }
 0x3d4   :  { %7323 = vmatpush3.bf16.msra.mxu0 %v7738_v58  ;;  %v5647_v58 = vld [vmem:[%s9360_s6] sm:$0xff] }
 0x3d5   :  { %7340 = vmatprep.subr.bf16.mxu0 %v7791_v57 }
 0x3d6   :  { %7311 = vmatpush3.bf16.msra.mxu1 %v7739_v23  ;;  %v7793_v23 = vmov 0.0|0.0  }
 0x3d7   :  { %7325 = vmatmul.mubr.msk.bf16.vlgmr.msra.gmra.mrb[152].mxu0 %vm267_vm0, %v5413_v25  ;;  %7328 = vmatprep.subr.bf16.mxu1 %v7791_v57  ;;  %v5649_v25 = vld [vmem:[%s9360_s6 + $0x10] sm:$0xff] }
 0x3d8   :  { %7341 = vmatpush3.bf16.msra.mxu0 %v7740_v24  ;;  %7348 = vmatprep.mubr.msk.bf16.mxu0 %vm7792_vm1, %v7791_v57 }
 0x3d9   :  { %7313 = vmatmul.mubr.msk.bf16.vlgmr.msra.gmra.mrb[152].mxu1 %vm267_vm0, %v5327_v41  ;;  %7342 = vmatprep.subr.bf16.mxu0 %v7791_v57  ;;  %v5648_v41 = vld [vmem:[%s9360_s6 + $0x8] sm:$0xff] }
 0x3da   :  { %v3466_v28 = vpop.f32.mrb[100].mxu0  ;;  %7329 = vmatpush3.bf16.msra.mxu1 %v7741_v26  ;;  %7336 = vmatprep.mubr.msk.bf16.mxu1 %vm7792_vm1, %v7791_v57  ;;  %v7388_v24 = vpack.c.bf16 %v5648_v41, %v5647_v58  ;;  %v5650_v26 = vld [vmem:[%s9360_s6 + $0x18] sm:$0xff] }
 0x3db   :  { %v7014_v42 = vpop.f32.mrb[101].mxu0  ;;  %7330 = vmatprep.subr.bf16.mxu1 %v7791_v57 }
 0x3dc   :  { %v3389_v31 = vpop.f32.mrb[100].mxu1  ;;  %v3469_v32 = vpop.f32.mrb[102].mxu0  ;;  %7343 = vmatpush3.bf16.msra.mxu0 %v7742_v27  ;;  %v7391_v27 = vpack.c.bf16 %v5650_v26, %v5649_v25 }
 0x3dd   :  { %v3395_v34 = vadd.f32 %v3389_v31, %v3318_v22  ;;  %v7002_v35 = vpop.f32.mrb[101].mxu1  ;;  %v7015_v37 = vpop.f32.mrb[103].mxu0  ;;  %7344 = vmatprep.subr.bf16.mxu0 %v7791_v57  ;;  %v5651_v32 = vld [vmem:[%s9360_s6 + $0x20] sm:$0xff] }
 0x3de   :  { %v3392_v38 = vpop.f32.mrb[102].mxu1  ;;  %7331 = vmatpush3.bf16.msra.mxu1 %v7743_v30 }
 0x3df   :  { %v7003_v40 = vpop.f32.mrb[103].mxu1  ;;  %7332 = vmatprep.subr.bf16.mxu1 %v7791_v57  ;;  %v3472_v43 = vadd.f32 %v3466_v28, %v3395_v34 }
 0x3e0   :  { %7345 = vmatpush3.bf16.msra.mxu0 %v7744_v17  ;;  %v5652_v17 = vld [vmem:[%s9360_s6 + $0x28] sm:$0xff] }
 0x3e1   :  { %7346 = vmatprep.subr.bf16.mxu0 %v7791_v57  ;;  %v7394_v38 = vpack.c.bf16 %v5652_v17, %v5651_v32 }
 0x3e2   :  { %7333 = vmatpush3.bf16.msra.mxu1 %v7745_v39 }
 0x3e3   :  { %7334 = vmatprep.subr.bf16.mxu1 %v7791_v57 }
 0x3e4   :  { %7347 = vmatpush3.bf16.msra.mxu0 %v7746_v33  ;;  %v5653_v33 = vld [vmem:[%s9360_s6 + $0x30] sm:$0xff] }
 0x3e6   :  { %7335 = vmatpush3.bf16.msra.mxu1 %v7747_v44  ;;  %v5654_v44 = vld [vmem:[%s9360_s6 + $0x38] sm:$0xff] }
 0x3e7   :  { %7349 = vmatmul.mubr.msk.bf16.vlgmr.msra.gmra.mrb[156].mxu0 %vm267_vm0, %v5567_v53  ;;  %7387 = vmatprep.subr.bf16.mxu1 %v7793_v23  ;;  %v7397_v53 = vpack.c.bf16 %v5654_v44, %v5653_v33 }
 0x3e9   :  { %7337 = vmatmul.mubr.msk.bf16.vlgmr.msra.gmra.mrb[156].mxu1 %vm267_vm0, %v5490_v45  ;;  %v5655_v45 = vld [vmem:[%s9360_s6 + $0x40] sm:$0xff] }
 0x3ea   :  { %v3621_v48 = vpop.f32.mrb[104].mxu0  ;;  %7384 = vmatprep.mubr.msk.f32.mxu1 %vm7792_vm1, %v7791_v57  ;;  %7389 = vmatpush3.bf16.msra.mxu1 %v7388_v24 }
 0x3eb   :  { %v7038_v49 = vpop.f32.mrb[105].mxu0  ;;  %7390 = vmatprep.subr.bf16.mxu1 %v7793_v23 }
 0x3ec   :  { %v3543_v50 = vpop.f32.mrb[104].mxu1  ;;  %v3624_v51 = vpop.f32.mrb[106].mxu0 }
 0x3ed   :  { %v3549_v52 = vadd.f32 %v3543_v50, %v3472_v43  ;;  %v7026_v54 = vpop.f32.mrb[105].mxu1  ;;  %v7039_v9 = vpop.f32.mrb[107].mxu0  ;;  %v5657_v50 = vld [vmem:[%s9360_s6 + $0x50] sm:$0xff]  ;;  %v5658_v51 = vld [vmem:[%s9360_s6 + $0x58] sm:$0xff] }
 0x3ee   :  { %v3546_v55 = vpop.f32.mrb[106].mxu1  ;;  %7392 = vmatpush3.bf16.msra.mxu1 %v7391_v27 }
 0x3ef   :  { %v7027_v56 = vpop.f32.mrb[107].mxu1  ;;  %v3627_v59 = vadd.f32 %v3621_v48, %v3549_v52  ;;  %7393 = vmatprep.subr.bf16.mxu1 %v7793_v23  ;;  %v5656_v48 = vld [vmem:[%s9360_s6 + $0x48] sm:$0xff]  ;;  %v7403_v52 = vpack.c.bf16 %v5658_v51, %v5657_v50 }
 0x3f0   :  { %v7400_v49 = vpack.c.bf16 %v5656_v48, %v5655_v45 }
 0x3f2   :  { %7395 = vmatpush3.bf16.msra.mxu1 %v7394_v38 }
 0x3f3   :  { %7396 = vmatprep.subr.bf16.mxu1 %v7793_v23 }
 0x3f6   :  { %7398 = vmatpush3.bf16.msra.mxu1 %v7397_v53 }
 0x3f7   :  { %7399 = vmatprep.subr.bf16.mxu1 %v7793_v23 }
 0x3fa   :  { %v3775_v60 = vpop.f32.mrb[108].mxu0  ;;  %7401 = vmatpush3.bf16.msra.mxu1 %v7400_v49 }
 0x3fb   :  { %v7062_v46 = vpop.f32.mrb[109].mxu0  ;;  %7402 = vmatprep.subr.bf16.mxu1 %v7793_v23 }
 0x3fc   :  { %v3698_v61 = vpop.f32.mrb[108].mxu1  ;;  %v3778_v62 = vpop.f32.mrb[110].mxu0 }
 0x3fd   :  { %v3704_v63 = vadd.f32 %v3698_v61, %v3627_v59  ;;  %v7050_v29 = vpop.f32.mrb[109].mxu1  ;;  %v7063_v0 = vpop.f32.mrb[111].mxu0  ;;  %v5659_v59 = vld [vmem:[%s9360_s6 + $0x60] sm:$0xff] }
 0x3fe   :  { %v3701_v1 = vpop.f32.mrb[110].mxu1  ;;  %7404 = vmatpush3.bf16.msra.mxu1 %v7403_v52 }
 0x3ff   :  { %v7051_v2 = vpop.f32.mrb[111].mxu1  ;;  %v3781_v47 = vadd.f32 %v3775_v60, %v3704_v63  ;;  %7405 = vmatprep.subr.bf16.mxu1 %v7793_v23  ;;  %v5660_v60 = vld [vmem:[%s9360_s6 + $0x68] sm:$0xff] }
 0x400   :  { %v7406_v63 = vpack.c.bf16 %v5660_v60, %v5659_v59  ;;  %v5661_v2 = vld [vmem:[%s9360_s6 + $0x70] sm:$0xff] }
 0x402   :  { %7407 = vmatpush3.bf16.msra.mxu1 %v7406_v63 }
 0x403   :  { %7408 = vmatprep.subr.bf16.mxu1 %v7793_v23 }
 0x40a   :  { %v3930_v57 = vpop.f32.mrb[112].mxu0 }
 0x40b   :  { %v7086_v3 = vpop.f32.mrb[113].mxu0 }
 0x40c   :  { %v3852_v4 = vpop.f32.mrb[112].mxu1  ;;  %v3933_v6 = vpop.f32.mrb[114].mxu0 }
 0x40d   :  { %v3858_v7 = vadd.f32 %v3852_v4, %v3781_v47  ;;  %v7074_v36 = vpop.f32.mrb[113].mxu1  ;;  %v7087_v8 = vpop.f32.mrb[115].mxu0  ;;  %v5662_v47 = vld [vmem:[%s9360_s6 + $0x78] sm:$0xff] }
 0x40e   :  { %v3855_v10 = vpop.f32.mrb[114].mxu1 }
 0x40f   :  { %v7075_v11 = vpop.f32.mrb[115].mxu1  ;;  %v3936_v12 = vadd.f32 %v3930_v57, %v3858_v7  ;;  %v7409_v57 = vpack.c.bf16 %v5662_v47, %v5661_v2 }
 0x411   :  { %7410 = vmatpush3.bf16.msra.mxu1 %v7409_v57 }
 0x41a   :  { %v4084_v13 = vpop.f32.mrb[116].mxu0 }
 0x41b   :  { %v7110_v14 = vpop.f32.mrb[117].mxu0 }
 0x41c   :  { %v4007_v15 = vpop.f32.mrb[116].mxu1  ;;  %v4087_v16 = vpop.f32.mrb[118].mxu0 }
 0x41d   :  { %v4013_v21 = vadd.f32 %v4007_v15, %v3936_v12  ;;  %v7098_v18 = vpop.f32.mrb[117].mxu1  ;;  %v7111_v5 = vpop.f32.mrb[119].mxu0 }
 0x41e   :  { %v4010_v19 = vpop.f32.mrb[118].mxu1 }
 0x41f   :  { %v7099_v20 = vpop.f32.mrb[119].mxu1  ;;  %v4090_v22 = vadd.f32 %v4084_v13, %v4013_v21 }
 0x42a   :  { %v4239_v28 = vpop.f32.mrb[120].mxu0 }
 0x42b   :  { %v7134_v30 = vpop.f32.mrb[121].mxu0 }
 0x42c   :  { %v4161_v42 = vpop.f32.mrb[120].mxu1  ;;  %v4242_v31 = vpop.f32.mrb[122].mxu0 }
 0x42d   :  { %v4167_v34 = vadd.f32 %v4161_v42, %v4090_v22  ;;  %v7122_v35 = vpop.f32.mrb[121].mxu1  ;;  %v7135_v37 = vpop.f32.mrb[123].mxu0 }
 0x42e   :  { %v4164_v39 = vpop.f32.mrb[122].mxu1 }
 0x42f   :  { %v7123_v40 = vpop.f32.mrb[123].mxu1  ;;  %v4245_v43 = vadd.f32 %v4239_v28, %v4167_v34 }
 0x43a   :  { %v4393_v54 = vpop.f32.mrb[124].mxu0 }
 0x43b   :  { %v7158_v9 = vpop.f32.mrb[125].mxu0 }
 0x43c   :  { %v4316_v55 = vpop.f32.mrb[124].mxu1  ;;  %v4396_v56 = vpop.f32.mrb[126].mxu0 }
 0x43d   :  { %v4322_v46 = vadd.f32 %v4316_v55, %v4245_v43  ;;  %v7146_v61 = vpop.f32.mrb[125].mxu1  ;;  %v7159_v62 = vpop.f32.mrb[127].mxu0 }
 0x43e   :  { %v4319_v29 = vpop.f32.mrb[126].mxu1 }
 0x43f   :  { %v7147_v0 = vpop.f32.mrb[127].mxu1  ;;  %v4399_v1 = vadd.f32 %v4393_v54, %v4322_v46 }
 0x44a   :  { %v4548_v3 = vpop.f32.mrb[128].mxu0 }
 0x44b   :  { %v7182_v4 = vpop.f32.mrb[129].mxu0 }
 0x44c   :  { %v4470_v6 = vpop.f32.mrb[128].mxu1  ;;  %v4551_v7 = vpop.f32.mrb[130].mxu0 }
 0x44d   :  { %v4476_v36 = vadd.f32 %v4470_v6, %v4399_v1  ;;  %v7170_v8 = vpop.f32.mrb[129].mxu1  ;;  %v7183_v10 = vpop.f32.mrb[131].mxu0 }
 0x44e   :  { %v4473_v11 = vpop.f32.mrb[130].mxu1 }
 0x44f   :  { %v7171_v12 = vpop.f32.mrb[131].mxu1  ;;  %v4554_v13 = vadd.f32 %v4548_v3, %v4476_v36 }
 0x45a   :  { %v4702_v14 = vpop.f32.mrb[132].mxu0 }
 0x45b   :  { %v7206_v15 = vpop.f32.mrb[133].mxu0 }
 0x45c   :  { %v4625_v16 = vpop.f32.mrb[132].mxu1  ;;  %v4705_v21 = vpop.f32.mrb[134].mxu0 }
 0x45d   :  { %v4631_v18 = vadd.f32 %v4625_v16, %v4554_v13  ;;  %v7194_v5 = vpop.f32.mrb[133].mxu1  ;;  %v7207_v19 = vpop.f32.mrb[135].mxu0  ;;  %v6180_v21 = vld [vmem:[%s9359_s5] ss:$0 sm:$0xff] }
 0x45e   :  { %v4628_v20 = vpop.f32.mrb[134].mxu1 }
 0x45f   :  { %v7195_v22 = vpop.f32.mrb[135].mxu1  ;;  %v4708_v58 = vadd.f32 %v4702_v14, %v4631_v18 }
 0x46a   :  { %v4857_v41 = vpop.f32.mrb[136].mxu0 }
 0x46b   :  { %v7230_v23 = vpop.f32.mrb[137].mxu0 }
 0x46c   :  { %v4779_v24 = vpop.f32.mrb[136].mxu1  ;;  %v4860_v25 = vpop.f32.mrb[138].mxu0 }
 0x46d   :  { %v4785_v26 = vadd.f32 %v4779_v24, %v4708_v58  ;;  %v7218_v27 = vpop.f32.mrb[137].mxu1  ;;  %v7231_v28 = vpop.f32.mrb[139].mxu0  ;;  %v5759_v24 = vstv %s5758_s24 }
 0x46e   :  { %v4782_v30 = vpop.f32.mrb[138].mxu1 }
 0x46f   :  { %v7219_v42 = vpop.f32.mrb[139].mxu1  ;;  %v4863_v31 = vadd.f32 %v4857_v41, %v4785_v26  ;;  %v5753_v41 = vlaneseq  ;;  %v5763_v26 = vstv %s6182_s25  ;;  %v6181_v30 = vld [vmem:[%s9361_s7] ss:$0 sm:$0xff]  ;;  %s7794_s7 = smov [#allocation4]  }
 0x470   :  { %s5788_s1 = sshll.u32 %s7794_s7, 4  ;;  %s5789_s1 = int_to_ptr.vmem [resolvable:$true] %s5788_s1 }
 0x471   :  { %v5754_v23 = vshrl.u32 %v5753_v41, 7  ;;  %v5756_v27 = vand.u32 127, %v5753_v41  ;;  %s7764_s27 = scalar_lea.vmem %s5789_s1, 16  ;;  %s7768_s28 = scalar_lea.vmem %s5789_s1, 32 }
 0x472   :  { %p7765_p5 = scmp.ne.s32.totalorder %s5789_s1, %s7764_s27  ;;  %p7769_p6 = scmp.lt.s32.totalorder %s5789_s1, %s5789_s1 }
 0x473   :  { %vm5757_vm3 = vcmp.eq.s32.totalorder %v5754_v23, 0  ;;  %vm5761_vm4 = vcmp.eq.s32.totalorder %v5754_v23, 1  ;;  %p7770_p7 = scmp.lt.s32.totalorder %s7768_s28, %s7764_s27 }
 0x474   :  { %v5760_v25 = vsel %vm5757_vm3, %v5759_v24, 0 }
 0x475   :  { %v5764_v28 = vsel %vm5761_vm4, %v5763_v26, %v5760_v25  ;;  %p7771_p8 = por %p7770_p7, %p7769_p6 }
 0x476   :  { %vm5765_vm6 = vcmp.eq.s32.totalorder %v5756_v27, %v5764_v28 }
 0x477   :  { %p7772_p9 = pnand %p7771_p8, %p7765_p5 }
 0x47a   :  { %v5011_v32 = vpop.f32.mrb[140].mxu0 }
 0x47b   :  { %v7254_v17 = vpop.f32.mrb[141].mxu0 }
 0x47c   :  { %v4934_v34 = vpop.f32.mrb[140].mxu1  ;;  %v5014_v35 = vpop.f32.mrb[142].mxu0 }
 0x47d   :  { %v4940_v37 = vadd.f32 %v4934_v34, %v4863_v31  ;;  %v7242_v38 = vpop.f32.mrb[141].mxu1  ;;  %v7255_v39 = vpop.f32.mrb[143].mxu0 }
 0x47e   :  { %v4937_v40 = vpop.f32.mrb[142].mxu1 }
 0x47f   :  { %v7243_v43 = vpop.f32.mrb[143].mxu1  ;;  %v5017_v33 = vadd.f32 %v5011_v32, %v4940_v37 }
 0x48a   :  { %v5166_v44 = vpop.f32.mrb[144].mxu0 }
 0x48b   :  { %v7278_v53 = vpop.f32.mrb[145].mxu0 }
 0x48c   :  { %v5088_v45 = vpop.f32.mrb[144].mxu1  ;;  %v5169_v48 = vpop.f32.mrb[146].mxu0 }
 0x48d   :  { %v5094_v49 = vadd.f32 %v5088_v45, %v5017_v33  ;;  %v7266_v50 = vpop.f32.mrb[145].mxu1  ;;  %v7279_v51 = vpop.f32.mrb[147].mxu0 }
 0x48e   :  { %v5091_v52 = vpop.f32.mrb[146].mxu1 }
 0x48f   :  { %v7267_v54 = vpop.f32.mrb[147].mxu1  ;;  %v5172_v9 = vadd.f32 %v5166_v44, %v5094_v49 }
 0x49a   :  { %v5320_v55 = vpop.f32.mrb[148].mxu0 }
 0x49b   :  { %v7302_v56 = vpop.f32.mrb[149].mxu0 }
 0x49c   :  { %v5243_v59 = vpop.f32.mrb[148].mxu1  ;;  %v5323_v60 = vpop.f32.mrb[150].mxu0 }
 0x49d   :  { %v5249_v46 = vadd.f32 %v5243_v59, %v5172_v9  ;;  %v7290_v61 = vpop.f32.mrb[149].mxu1  ;;  %v7303_v62 = vpop.f32.mrb[151].mxu0 }
 0x49e   :  { %v5246_v63 = vpop.f32.mrb[150].mxu1 }
 0x49f   :  { %v7291_v29 = vpop.f32.mrb[151].mxu1  ;;  %v5326_v0 = vadd.f32 %v5320_v55, %v5249_v46 }
 0x4aa   :  { %v5475_v1 = vpop.f32.mrb[152].mxu0 }
 0x4ab   :  { %v7326_v2 = vpop.f32.mrb[153].mxu0 }
 0x4ac   :  { %v5397_v47 = vpop.f32.mrb[152].mxu1  ;;  %v5478_v57 = vpop.f32.mrb[154].mxu0 }
 0x4ad   :  { %v5403_v3 = vadd.f32 %v5397_v47, %v5326_v0  ;;  %v7314_v4 = vpop.f32.mrb[153].mxu1  ;;  %v7327_v6 = vpop.f32.mrb[155].mxu0 }
 0x4ae   :  { %v5400_v7 = vpop.f32.mrb[154].mxu1 }
 0x4af   :  { %v7315_v36 = vpop.f32.mrb[155].mxu1  ;;  %v5481_v8 = vadd.f32 %v5475_v1, %v5403_v3 }
 0x4ba   :  { %v5629_v10 = vpop.f32.mrb[156].mxu0 }
 0x4bb   :  { %v7350_v11 = vpop.f32.mrb[157].mxu0 }
 0x4bc   :  { %v5552_v12 = vpop.f32.mrb[156].mxu1  ;;  %v5632_v13 = vpop.f32.mrb[158].mxu0 }
 0x4bd   :  { %v5558_v14 = vadd.f32 %v5552_v12, %v5481_v8  ;;  %v7338_v15 = vpop.f32.mrb[157].mxu1  ;;  %v7351_v16 = vpop.f32.mrb[159].mxu0 }
 0x4be   :  { %v5555_v18 = vpop.f32.mrb[158].mxu1 }
 0x4bf   :  { %v5635_v5 = vadd.f32 %v5629_v10, %v5558_v14  ;;  %v7339_v19 = vpop.f32.mrb[159].mxu1 }
 0x4c1   :  { %v5643_v20 = vadd.f32 %v6180_v21, %v5635_v5 }
 0x4c3   :  { %vm5644_vm2 = vcmp.ge.f32.partialorder %v5643_v20, 0.0  ;;  %v5645_v22 = vmul.f32 0.01, %v5643_v20 }
 0x4c5   :  { %v5646_v58 = vsel %vm5644_vm2, %v5643_v20, %v5645_v22 }
 0x4c6   :  { %7385 = vmatmul.mubr.f32.vlgmr.msra.gmra.mrb[160].mxu1 %v5646_v58 }
 0x599   :  { %v5736_v42 = vpop.f32.mrb[160].mxu1 }
 0x59a   :  { %v5737_v31 = vadd.f32 %v6181_v30, %v5736_v42  ;;  %v7386_v32 = vpop.f32.mrb[161].mxu1 }
 0x59c   :  { %v5741_v17 = vsel %vm5740_vm5, %v5737_v31, -inf  ;;  %v5766_v34 = vsel %vm5765_vm6, %v5737_v31, 0.0 }
 0x59d   :  { %5742 = vmax.xlane.f32.xlu0 %v5741_v17  ;;  %v5767_v35 = vsel %vm5740_vm5, %v5766_v34, 0.0 }
 0x59e   :  { %5768 = vadd.xlane.f32.xlu1 %v5767_v35 }
 0x62a   :  { %v5743_v37 = vpop.xlane.xlu0 %5742 }
 0x62b   :  { %v5744_v38 = vsub.f32 %v5737_v31, %v5743_v37  ;;  %v5769_v48 = vpop.xlane.xlu1 %5768 }
 0x62d   :  { %v5745_v39 = vmul.f32 1.442695, %v5744_v38 }
 0x62f   :  { %7748 = vpow2.f32 %v5745_v39 }
 0x639   :  { %v7749_v40 = vpop.eup %7748 }
 0x63a   :  { %v5747_v43 = vsel %vm5740_vm5, %v7749_v40, 0.0 }
 0x63b   :  { %5748 = vadd.xlane.f32.xlu0 %v5747_v43 }
 0x6c8   :  { %v5749_v33 = vpop.xlane.xlu0 %5748 }
 0x6c9   :  { %7750 = vlog2.f32 %v5749_v33 }
 0x6d3   :  { %v7751_v44 = vpop.eup %7750 }
 0x6d4   :  { %v5751_v53 = vmul.f32 0.6931472, %v7751_v44 }
 0x6d6   :  { %v5752_v45 = vadd.f32 %v5751_v53, %v5743_v37 }
 0x6d8   :  { %v5770_v49 = vsub.f32 %v5752_v45, %v5769_v48 }
 0x6da   :  { %v5772_v50 = vsel %vm5771_vm7, %v5770_v49, 0.0 }
 0x6db   :  { %v5773_v51 = vrot.slane %v5772_v50, 4 }
 0x6dd   :  { %v5774_v52 = vadd.f32 %v5773_v51, %v5772_v50 }
 0x6df   :  { %v5775_v54 = vrot.slane %v5774_v52, 2 }
 0x6e1   :  { %v5776_v9 = vadd.f32 %v5775_v54, %v5774_v52 }
 0x6e3   :  { %v5777_v55 = vrot.slane %v5776_v9, 1 }
 0x6e5   :  { %v5778_v56 = vadd.f32 %v5777_v55, %v5776_v9 }
 0x6e7   :  { %v5779_v59 = vmul.f32 0.5, %v5778_v56 }
 0x6e9   :  { %5781 = vst.msk [vmem:[#allocation4] sm:$0x1] %vm5780_vm8, %v5779_v59 }
 0x6ea   :  { %7775 = shalt.err (!%p7772_p9)
}
 0x6eb   :  { %s7776_s30 = scalar_lea.hbm %s9362_s8, 16 }
 0x6ec   :  { %p7777_p10 = scmp.ne.s32.totalorder %s9362_s8, %s7776_s30  ;;  %p7780_p11 = scmp.lt.u32.totalorder %s7776_s30, %s9362_s8 }
 0x6ee   :  { %p7782_p12 = pnand %p7780_p11, %p7777_p10 }
 0x6f0   :  { %7785 = shalt.err (!%p7782_p12)
}
 0x6f1   :  { %5791 = dma.vmem_to_hbm [thread:$0]  %s5789_s1, 16, %s9362_s8, [#allocation5]  }
 0x6f2   :  { %7788 = dma.done.wait [#allocation5], 16  }
 0x6f3   :  { %7789 = vsyncadd [#allocation5], 4294967280 }
 0x6f4   :  { %5795 = vsyncpa [#allocation5], 1 }

</bundles_post_ra>
